<compile_context>
chip_gen: v7x
topology: tpu7x:2x2x1
jax: 0.10.0
libtpu: 0.0.40
codegen_flags: <defaults>
</compile_context>

<pallas_src>
import numpy as np
import jax
import jax.numpy as jnp
from jax.experimental import pallas as pl
from jax.experimental.pallas import tpu as pltpu


# ----------------------------------------------------------------------------
# Kernel 1: AvgPool2d(5, 3) + 1x1 Conv + ReLU for one batch tile.
#   x_ref : (NB, H*W, Cin)  f32   batch tile, spatial flattened row-major
#   pt_ref: (J, H*W)        f32   pooling matrix (contains the 1/25 factor)
#   w_ref : (Cin, Co)       f32   1x1 conv weight (Co = 128)
#   b_ref : (1, Co)         f32   conv bias
#   o_ref : (NB*J, Co)      bf16  lane-dense activations (minor dim = 128)
# ----------------------------------------------------------------------------
def pool_conv_kernel(x_ref, pt_ref, w_ref, b_ref, o_ref):
    nb = x_ref.shape[0]
    # Per-sample pooling matmuls (M = J = 16), then one stacked conv matmul
    # with M = NB*J so the MXU sees a wide M instead of NB tiny matmuls.
    pooled = [jnp.dot(pt_ref[...], x_ref[n], preferred_element_type=jnp.float32)
              for n in range(nb)]                                        # NB x (J, Cin)
    stacked = pooled[0] if nb == 1 else jnp.concatenate(pooled, axis=0)  # (NB*J, Cin)
    conv = jnp.dot(stacked, w_ref[...],
                   preferred_element_type=jnp.float32)                   # (NB*J, Co)
    o_ref[...] = jnp.maximum(conv + b_ref[...], 0.0).astype(o_ref.dtype)


# ----------------------------------------------------------------------------
# Kernel 2: fc1 (2048->1024) + ReLU + fc2 (1024->Kp), weights fully resident.
#   x_ref  : (NB2, 2048)  bf16 activations (feature order j*128 + o)
#   w1_ref : (2048, TH)   bf16 fc1 weight (rows permuted to match x's order)
#   b1_ref : (1, TH)      f32
#   w2_ref : (TH, Kp)     bf16 fc2 weight
#   b2_ref : (1, Kp)      f32
#   o_ref  : (NB2, Kp)    f32
# ----------------------------------------------------------------------------
def mlp_kernel(x_ref, w1_ref, b1_ref, w2_ref, b2_ref, o_ref):
    h = jnp.dot(x_ref[...], w1_ref[...],
                preferred_element_type=jnp.float32)                      # (NB2, TH)
    h = jnp.maximum(h + b1_ref[...], 0.0)
    out = jnp.dot(h.astype(jnp.bfloat16), w2_ref[...],
                  preferred_element_type=jnp.float32)                    # (NB2, Kp)
    o_ref[...] = (out + b2_ref[...]).astype(o_ref.dtype)


def make_pool_matrix_t(H, W, k, s):
    """Transposed pooling matrix Pt (Ho*Wo, H*W): Pt @ x_hw_c == avg-pooled (Ho*Wo, C)."""
    Ho = (H - k) // s + 1
    Wo = (W - k) // s + 1
    Pt = np.zeros((Ho * Wo, H * W), np.float32)
    for i in range(Ho):
        for j in range(Wo):
            for dh in range(k):
                for dw in range(k):
                    Pt[i * Wo + j, (s * i + dh) * W + (s * j + dw)] = 1.0 / (k * k)
    return jnp.asarray(Pt), Ho, Wo


def _largest_divisor_leq(n, cap):
    for b in range(min(n, cap), 0, -1):
        if n % b == 0:
            return b
    return 1


def _mlp_batch_block(n, cap=128):
    # second-minor dim of the MLP blocks: must equal n or be a multiple of 8.
    if n <= cap:
        return n
    for b in range(cap, 7, -8):
        if n % b == 0:
            return b
    return n


def inception_aux_forward(x_nchw, params):
    """x_nchw: (N, Cin, H, W) float32, H = W = 14. Returns (N, num_classes) float32."""
    N, Cin, H, W = x_nchw.shape
    conv_w, conv_b, fc1_w, fc1_b, fc2_w, fc2_b = params
    Co = conv_w.shape[0]                      # 128
    TH = fc1_w.shape[0]                       # 1024
    num_classes = fc2_w.shape[0]

    Pt, Ho, Wo = make_pool_matrix_t(H, W, k=5, s=3)
    J = Ho * Wo
    assert Co * J == fc1_w.shape[1], "fc1 expects Co*Ho*Wo features (spatial must be 14x14)"

    # glue: NCHW -> (N, H*W, Cin) so both kernel-1 matmuls are lane-dense.
    x_hwc = jnp.transpose(x_nchw, (0, 2, 3, 1)).reshape(N, H * W, Cin)
    w_conv = jnp.transpose(conv_w.reshape(Co, Cin))       # (Cin, Co)
    b_conv = conv_b.reshape(1, Co)

    # ---- Pallas call 1: avgpool + 1x1 conv + relu, grid over batch tiles ----
    # NB=8 gives M = NB*J = 128 for the stacked conv matmul (v5e MXU width);
    # raise to 16 on v6e/v7x for large N if this kernel becomes MXU-bound.
    NB = _largest_divisor_leq(N, 8)
    act = pl.pallas_call(
        pool_conv_kernel,
        out_shape=jax.ShapeDtypeStruct((N * J, Co), jnp.bfloat16),
        grid=(N // NB,),
        in_specs=[
            pl.BlockSpec((NB, H * W, Cin), lambda b: (b, 0, 0)),
            pl.BlockSpec((J, H * W), lambda b: (0, 0)),
            pl.BlockSpec((Cin, Co), lambda b: (0, 0)),
            pl.BlockSpec((1, Co), lambda b: (0, 0)),
        ],
        out_specs=pl.BlockSpec((NB * J, Co), lambda b: (b, 0)),
        compiler_params=pltpu.CompilerParams(
            dimension_semantics=("parallel",),
            vmem_limit_bytes=32 * 1024 * 1024),
    )(x_hwc, Pt, w_conv, b_conv)

    # flatten: feature order j*Co + o.  torch.flatten's order (o*J + j) is
    # recovered exactly by permuting fc1's weight rows below.
    flat = act.reshape(N, J * Co)                         # (N, 2048) bf16
    # dropout(p=0.5) in eval mode == identity.

    # fc weight prep (one-time, XLA-side): permute fc1 rows to our feature
    # order, cast to bf16, pad fc2's output dim to a multiple of 128 lanes.
    w1 = jnp.transpose(fc1_w)                                             # (2048, TH), row o*J + j
    w1 = w1.reshape(Co, J, TH).transpose(1, 0, 2).reshape(Co * J, TH)     # row j*Co + o
    w1 = w1.astype(jnp.bfloat16)
    b1 = fc1_b.reshape(1, TH).astype(jnp.float32)

    Kp = ((num_classes + 127) // 128) * 128
    w2 = jnp.pad(jnp.transpose(fc2_w).astype(jnp.bfloat16),
                 ((0, 0), (0, Kp - num_classes)))                         # (TH, Kp)
    b2 = jnp.pad(fc2_b.reshape(1, -1).astype(jnp.float32),
                 ((0, 0), (0, Kp - num_classes)))                         # (1, Kp)

    # ---- Pallas call 2: fc1(+relu) + fc2, weights resident, grid over batch ----
    NB2 = _mlp_batch_block(N)
    out_p = pl.pallas_call(
        mlp_kernel,
        out_shape=jax.ShapeDtypeStruct((N, Kp), jnp.float32),
        grid=(N // NB2,),
        in_specs=[
            pl.BlockSpec((NB2, Co * J), lambda b: (b, 0)),
            pl.BlockSpec((Co * J, TH), lambda b: (0, 0)),
            pl.BlockSpec((1, TH), lambda b: (0, 0)),
            pl.BlockSpec((TH, Kp), lambda b: (0, 0)),
            pl.BlockSpec((1, Kp), lambda b: (0, 0)),
        ],
        out_specs=pl.BlockSpec((NB2, Kp), lambda b: (b, 0)),
        compiler_params=pltpu.CompilerParams(
            dimension_semantics=("parallel",),
            vmem_limit_bytes=32 * 1024 * 1024),
    )(flat, w1, b1, w2, b2)

    return out_p[:, :num_classes]


def ref_forward(x_nchw, params):
    """Pure-JAX reference mirroring the PyTorch module (eval mode) and the
    kernels' precision policy (bf16 matmul inputs, f32 accumulation) for fc1/fc2."""
    conv_w, conv_b, fc1_w, fc1_b, fc2_w, fc2_b = params
    N = x_nchw.shape[0]
    pooled = jax.lax.reduce_window(
        x_nchw, 0.0, jax.lax.add,
        window_dimensions=(1, 1, 5, 5), window_strides=(1, 1, 3, 3),
        padding="VALID") / 25.0
    conv = jnp.einsum("nchw,oc->nohw", pooled, conv_w.reshape(conv_w.shape[0], -1))
    conv = jnp.maximum(conv + conv_b[None, :, None, None], 0.0)
    flat = conv.reshape(N, -1)                                   # torch flatten order
    h = jnp.dot(flat.astype(jnp.bfloat16), fc1_w.T.astype(jnp.bfloat16),
                preferred_element_type=jnp.float32) + fc1_b
    h = jnp.maximum(h, 0.0)
    out = jnp.dot(h.astype(jnp.bfloat16), fc2_w.T.astype(jnp.bfloat16),
                  preferred_element_type=jnp.float32) + fc2_b
    return out


if __name__ == "__main__":
    # Spatial must be 14x14 so that avgpool -> 4x4 and 128*4*4 == 2048 == fc1 in-dim.
    N, Cin, H, W = 2, 16, 14, 14
    num_classes = 10

    key = jax.random.PRNGKey(0)
    k = jax.random.split(key, 7)
    x = jax.random.normal(k[0], (N, Cin, H, W), jnp.float32)

    conv_w = 0.1 * jax.random.normal(k[1], (128, Cin, 1, 1), jnp.float32)
    conv_b = 0.1 * jax.random.normal(k[2], (128,), jnp.float32)
    fc1_w = 0.02 * jax.random.normal(k[3], (1024, 2048), jnp.float32)
    fc1_b = 0.02 * jax.random.normal(k[4], (1024,), jnp.float32)
    fc2_w = 0.05 * jax.random.normal(k[5], (num_classes, 1024), jnp.float32)
    fc2_b = 0.05 * jax.random.normal(k[6], (num_classes,), jnp.float32)
    params = (conv_w, conv_b, fc1_w, fc1_b, fc2_w, fc2_b)

    out = jax.jit(inception_aux_forward)(x, params)
    out = jax.block_until_ready(out)

    ref = ref_forward(x, params)
    np.testing.assert_allclose(np.asarray(out), np.asarray(ref), rtol=2e-3, atol=2e-3)

    print("KERNEL_OK")
</pallas_src>

<mosaic_0001>
module attributes {stable_mosaic.version = 11 : i64} {
  func.func @pool_conv_kernel(%arg0: i32, %arg1: memref<2x196x16xf32, #tpu.memory_space<vmem>>, %arg2: memref<16x196xf32, #tpu.memory_space<vmem>>, %arg3: memref<16x128xf32, #tpu.memory_space<vmem>>, %arg4: memref<1x128xf32, #tpu.memory_space<vmem>>, %arg5: memref<32x128xbf16, #tpu.memory_space<vmem>>) attributes {dimension_semantics = [#tpu.dimension_semantics<parallel>], iteration_bounds = array<i64: 1>, scalar_prefetch = 0 : i64, scratch_operands = 0 : i64, tpu.core_type = #tpu.core_type<tc>, window_params = [{transform_indices = @transform_0, window_bounds = array<i64: 2, 196, 16>}, {pipeline_mode = #tpu.pipeline_mode<synchronous>, transform_indices = @transform_1, window_bounds = array<i64: 16, 196>}, {pipeline_mode = #tpu.pipeline_mode<synchronous>, transform_indices = @transform_2, window_bounds = array<i64: 16, 128>}, {pipeline_mode = #tpu.pipeline_mode<synchronous>, transform_indices = @transform_3, window_bounds = array<i64: 1, 128>}, {transform_indices = @transform_4, window_bounds = array<i64: 32, 128>}]} {
    %c0 = arith.constant 0 : index
    %c0_0 = arith.constant 0 : index
    %0 = vector.load %arg2[%c0, %c0_0] : memref<16x196xf32, #tpu.memory_space<vmem>>, vector<16x196xf32>
    %c0_1 = arith.constant 0 : index
    %c0_2 = arith.constant 0 : index
    %c0_3 = arith.constant 0 : index
    %1 = vector.load %arg1[%c0_1, %c0_2, %c0_3] : memref<2x196x16xf32, #tpu.memory_space<vmem>>, vector<1x196x16xf32>
    %2 = vector.shape_cast %1 : vector<1x196x16xf32> to vector<196x16xf32>
    %cst = arith.constant dense<0.000000e+00> : vector<16x16xf32>
    %3 = tpu.matmul %0, %2, %cst {dimension_numbers = #tpu.dot_dimension_numbers<[1], [0], [0], [1], [0, 0, 1, 1], [], []>} : vector<16x196xf32>, vector<196x16xf32>, vector<16x16xf32> -> vector<16x16xf32>
    %c0_4 = arith.constant 0 : index
    %c0_5 = arith.constant 0 : index
    %4 = vector.load %arg2[%c0_4, %c0_5] : memref<16x196xf32, #tpu.memory_space<vmem>>, vector<16x196xf32>
    %c1 = arith.constant 1 : index
    %c0_6 = arith.constant 0 : index
    %c0_7 = arith.constant 0 : index
    %5 = vector.load %arg1[%c1, %c0_6, %c0_7] : memref<2x196x16xf32, #tpu.memory_space<vmem>>, vector<1x196x16xf32>
    %6 = vector.shape_cast %5 : vector<1x196x16xf32> to vector<196x16xf32>
    %cst_8 = arith.constant dense<0.000000e+00> : vector<16x16xf32>
    %7 = tpu.matmul %4, %6, %cst_8 {dimension_numbers = #tpu.dot_dimension_numbers<[1], [0], [0], [1], [0, 0, 1, 1], [], []>} : vector<16x196xf32>, vector<196x16xf32>, vector<16x16xf32> -> vector<16x16xf32>
    %8 = tpu.concatenate %3, %7 in 0 : vector<16x16xf32>, vector<16x16xf32> -> vector<32x16xf32>
    %c0_9 = arith.constant 0 : index
    %c0_10 = arith.constant 0 : index
    %9 = vector.load %arg3[%c0_9, %c0_10] : memref<16x128xf32, #tpu.memory_space<vmem>>, vector<16x128xf32>
    %cst_11 = arith.constant dense<0.000000e+00> : vector<32x128xf32>
    %10 = tpu.matmul %8, %9, %cst_11 {dimension_numbers = #tpu.dot_dimension_numbers<[1], [0], [0], [1], [0, 0, 1, 1], [], []>} : vector<32x16xf32>, vector<16x128xf32>, vector<32x128xf32> -> vector<32x128xf32>
    %c0_12 = arith.constant 0 : index
    %c0_13 = arith.constant 0 : index
    %11 = vector.load %arg4[%c0_12, %c0_13] : memref<1x128xf32, #tpu.memory_space<vmem>>, vector<1x128xf32>
    %12 = vector.broadcast %11 : vector<1x128xf32> to vector<32x128xf32>
    %13 = arith.addf %10, %12 : vector<32x128xf32>
    %cst_14 = arith.constant 0.000000e+00 : f32
    %14 = vector.broadcast %cst_14 : f32 to vector<32x128xf32>
    %15 = arith.maximumf %13, %14 : vector<32x128xf32>
    %16 = arith.truncf %15 : vector<32x128xf32> to vector<32x128xbf16>
    %c0_15 = arith.constant 0 : index
    %c0_16 = arith.constant 0 : index
    %17 = vector.load %arg5[%c0_15, %c0_16] : memref<32x128xbf16, #tpu.memory_space<vmem>>, vector<32x128xbf16>
    tpu.vector_store %arg5[%c0_15, %c0_16], %16 {strides = array<i32>} : memref<32x128xbf16, #tpu.memory_space<vmem>>, vector<32x128xbf16>,
    return
  }
  func.func @transform_0(%arg0: i32) -> (i32, i32, i32) {
    %c0_i32 = arith.constant 0 : i32
    %c0_i32_0 = arith.constant 0 : i32
    %c0_i32_1 = arith.constant 0 : i32
    return %arg0, %c0_i32, %c0_i32_0 : i32, i32, i32
  }
  func.func @transform_1(%arg0: i32) -> (i32, i32) {
    %c0_i32 = arith.constant 0 : i32
    %c0_i32_0 = arith.constant 0 : i32
    %c0_i32_1 = arith.constant 0 : i32
    return %c0_i32, %c0_i32_0 : i32, i32
  }
  func.func @transform_2(%arg0: i32) -> (i32, i32) {
    %c0_i32 = arith.constant 0 : i32
    %c0_i32_0 = arith.constant 0 : i32
    %c0_i32_1 = arith.constant 0 : i32
    return %c0_i32, %c0_i32_0 : i32, i32
  }
  func.func @transform_3(%arg0: i32) -> (i32, i32) {
    %c0_i32 = arith.constant 0 : i32
    %c0_i32_0 = arith.constant 0 : i32
    %c0_i32_1 = arith.constant 0 : i32
    return %c0_i32, %c0_i32_0 : i32, i32
  }
  func.func @transform_4(%arg0: i32) -> (i32, i32) {
    %c0_i32 = arith.constant 0 : i32
    %c0_i32_0 = arith.constant 0 : i32
    return %arg0, %c0_i32 : i32, i32
  }
}

module attributes {stable_mosaic.version = 11 : i64} {
  func.func @mlp_kernel(%arg0: i32, %arg1: memref<2x2048xbf16, #tpu.memory_space<vmem>>, %arg2: memref<2048x1024xbf16, #tpu.memory_space<vmem>>, %arg3: memref<1x1024xf32, #tpu.memory_space<vmem>>, %arg4: memref<1024x128xbf16, #tpu.memory_space<vmem>>, %arg5: memref<1x128xf32, #tpu.memory_space<vmem>>, %arg6: memref<2x128xf32, #tpu.memory_space<vmem>>) attributes {dimension_semantics = [#tpu.dimension_semantics<parallel>], iteration_bounds = array<i64: 1>, scalar_prefetch = 0 : i64, scratch_operands = 0 : i64, tpu.core_type = #tpu.core_type<tc>, window_params = [{transform_indices = @transform_0, window_bounds = array<i64: 2, 2048>}, {pipeline_mode = #tpu.pipeline_mode<synchronous>, transform_indices = @transform_1, window_bounds = array<i64: 2048, 1024>}, {pipeline_mode = #tpu.pipeline_mode<synchronous>, transform_indices = @transform_2, window_bounds = array<i64: 1, 1024>}, {pipeline_mode = #tpu.pipeline_mode<synchronous>, transform_indices = @transform_3, window_bounds = array<i64: 1024, 128>}, {pipeline_mode = #tpu.pipeline_mode<synchronous>, transform_indices = @transform_4, window_bounds = array<i64: 1, 128>}, {transform_indices = @transform_5, window_bounds = array<i64: 2, 128>}]} {
    %c0 = arith.constant 0 : index
    %c0_0 = arith.constant 0 : index
    %0 = vector.load %arg1[%c0, %c0_0] : memref<2x2048xbf16, #tpu.memory_space<vmem>>, vector<2x2048xbf16>
    %c0_1 = arith.constant 0 : index
    %c0_2 = arith.constant 0 : index
    %1 = vector.load %arg2[%c0_1, %c0_2] : memref<2048x1024xbf16, #tpu.memory_space<vmem>>, vector<2048x1024xbf16>
    %cst = arith.constant dense<0.000000e+00> : vector<2x1024xf32>
    %2 = tpu.matmul %0, %1, %cst {dimension_numbers = #tpu.dot_dimension_numbers<[1], [0], [0], [1], [0, 0, 1, 1], [], []>} : vector<2x2048xbf16>, vector<2048x1024xbf16>, vector<2x1024xf32> -> vector<2x1024xf32>
    %c0_3 = arith.constant 0 : index
    %c0_4 = arith.constant 0 : index
    %3 = vector.load %arg3[%c0_3, %c0_4] : memref<1x1024xf32, #tpu.memory_space<vmem>>, vector<1x1024xf32>
    %4 = vector.broadcast %3 : vector<1x1024xf32> to vector<2x1024xf32>
    %5 = arith.addf %2, %4 : vector<2x1024xf32>
    %cst_5 = arith.constant 0.000000e+00 : f32
    %6 = vector.broadcast %cst_5 : f32 to vector<2x1024xf32>
    %7 = arith.maximumf %5, %6 : vector<2x1024xf32>
    %8 = arith.truncf %7 : vector<2x1024xf32> to vector<2x1024xbf16>
    %c0_6 = arith.constant 0 : index
    %c0_7 = arith.constant 0 : index
    %9 = vector.load %arg4[%c0_6, %c0_7] : memref<1024x128xbf16, #tpu.memory_space<vmem>>, vector<1024x128xbf16>
    %cst_8 = arith.constant dense<0.000000e+00> : vector<2x128xf32>
    %10 = tpu.matmul %8, %9, %cst_8 {dimension_numbers = #tpu.dot_dimension_numbers<[1], [0], [0], [1], [0, 0, 1, 1], [], []>} : vector<2x1024xbf16>, vector<1024x128xbf16>, vector<2x128xf32> -> vector<2x128xf32>
    %c0_9 = arith.constant 0 : index
    %c0_10 = arith.constant 0 : index
    %11 = vector.load %arg5[%c0_9, %c0_10] : memref<1x128xf32, #tpu.memory_space<vmem>>, vector<1x128xf32>
    %12 = vector.broadcast %11 : vector<1x128xf32> to vector<2x128xf32>
    %13 = arith.addf %10, %12 : vector<2x128xf32>
    %c0_11 = arith.constant 0 : index
    %c0_12 = arith.constant 0 : index
    %14 = vector.load %arg6[%c0_11, %c0_12] : memref<2x128xf32, #tpu.memory_space<vmem>>, vector<2x128xf32>
    tpu.vector_store %arg6[%c0_11, %c0_12], %13 {strides = array<i32>} : memref<2x128xf32, #tpu.memory_space<vmem>>, vector<2x128xf32>,
    return
  }
  func.func @transform_0(%arg0: i32) -> (i32, i32) {
    %c0_i32 = arith.constant 0 : i32
    %c0_i32_0 = arith.constant 0 : i32
    return %arg0, %c0_i32 : i32, i32
  }
  func.func @transform_1(%arg0: i32) -> (i32, i32) {
    %c0_i32 = arith.constant 0 : i32
    %c0_i32_0 = arith.constant 0 : i32
    %c0_i32_1 = arith.constant 0 : i32
    return %c0_i32, %c0_i32_0 : i32, i32
  }
  func.func @transform_2(%arg0: i32) -> (i32, i32) {
    %c0_i32 = arith.constant 0 : i32
    %c0_i32_0 = arith.constant 0 : i32
    %c0_i32_1 = arith.constant 0 : i32
    return %c0_i32, %c0_i32_0 : i32, i32
  }
  func.func @transform_3(%arg0: i32) -> (i32, i32) {
    %c0_i32 = arith.constant 0 : i32
    %c0_i32_0 = arith.constant 0 : i32
    %c0_i32_1 = arith.constant 0 : i32
    return %c0_i32, %c0_i32_0 : i32, i32
  }
  func.func @transform_4(%arg0: i32) -> (i32, i32) {
    %c0_i32 = arith.constant 0 : i32
    %c0_i32_0 = arith.constant 0 : i32
    %c0_i32_1 = arith.constant 0 : i32
    return %c0_i32, %c0_i32_0 : i32, i32
  }
  func.func @transform_5(%arg0: i32) -> (i32, i32) {
    %c0_i32 = arith.constant 0 : i32
    %c0_i32_0 = arith.constant 0 : i32
    return %arg0, %c0_i32 : i32, i32
  }
}

</mosaic_0001>

<bundles_post_ra>
// kernel: inception_aux_forward.2
= control target key start
LH: loop header
LB: loop body
LE: loop exit
PB: predicated region body
PF: predicated region fallthrough
CT: control target
= control target key end

     0   :  { %v522_v0 = vmov 0.0|0.0   ;;  %vm46_vm0 = vcmask 556032   ;;  %vm53_vm1 = vcmask 1043456   ;;  %vm245_vm2 = vcmask 130048   ;;  %s754_s0 = inlined_call_operand.vmem [shape: f32[2,196,16], index: 0, kind: input, shape index: {}]   ;;  %s755_s1 = inlined_call_operand.vmem [shape: f32[16,196], index: 1, kind: input, shape index: {}]   ;;  %s756_s2 = inlined_call_operand.vmem [shape: f32[16,128], index: 2, kind: input, shape index: {}]   ;;  %s757_s3 = inlined_call_operand.vmem [shape: f32[1,128], index: 3, kind: input, shape index: {}]   ;;  %s758_s4 = inlined_call_operand.vmem [shape: bf16[32,128], index: 4, kind: output, shape index: {}]  }
   0x1   :  { %442 = vmatprep.subr.bf16.mxu0 %v522_v0  ;;  %478 = vmatprep.subr.bf16.mxu1 %v522_v0  ;;  %v21_v1 = vld [vmem:[%s754_s0] sm:$0xff]  ;;  %v22_v2 = vld [vmem:[%s754_s0 + $0x8] sm:$0xff]  ;;  %v375_v5 = vld [vmem:[%s754_s0 + $0xd0] sm:$0xff] }
   0x2   :  { %v374_v3 = vld [vmem:[%s754_s0 + $0xc8] sm:$0xff]  ;;  %v443_v4 = vpack.c.bf16 %v22_v2, %v21_v1  ;;  %v23_v6 = vld [vmem:[%s754_s0 + $0x10] sm:$0xff]  ;;  %v24_v7 = vld [vmem:[%s754_s0 + $0x18] sm:$0xff] }
   0x3   :  { %v479_v8 = vpack.c.bf16 %v375_v5, %v374_v3  ;;  %v376_v9 = vld [vmem:[%s754_s0 + $0xd8] sm:$0xff]  ;;  %v377_v10 = vld [vmem:[%s754_s0 + $0xe0] sm:$0xff]  ;;  %v446_v11 = vpack.c.bf16 %v24_v7, %v23_v6  ;;  %v26_v14 = vld [vmem:[%s754_s0 + $0x28] sm:$0xff] }
   0x4   :  { %444 = vmatpush1.bf16.msra.mxu0 %v443_v4  ;;  %v482_v12 = vpack.c.bf16 %v377_v10, %v376_v9  ;;  %v25_v13 = vld [vmem:[%s754_s0 + $0x20] sm:$0xff]  ;;  %v378_v15 = vld [vmem:[%s754_s0 + $0xe8] sm:$0xff]  ;;  %v379_v16 = vld [vmem:[%s754_s0 + $0xf0] sm:$0xff] }
   0x5   :  { %480 = vmatpush1.bf16.msra.mxu1 %v479_v8  ;;  %445 = vmatprep.subr.bf16.mxu0 %v522_v0  ;;  %v449_v17 = vpack.c.bf16 %v26_v14, %v25_v13  ;;  %v485_v18 = vpack.c.bf16 %v379_v16, %v378_v15  ;;  %v27_v19 = vld [vmem:[%s754_s0 + $0x30] sm:$0xff]  ;;  %v28_v20 = vld [vmem:[%s754_s0 + $0x38] sm:$0xff]  ;;  %v381_v22 = vld [vmem:[%s754_s0 + $0x100] sm:$0xff]  ;;  %v523_v13 = vmov 0.0  }
   0x6   :  { %481 = vmatprep.subr.bf16.mxu1 %v522_v0  ;;  %v380_v21 = vld [vmem:[%s754_s0 + $0xf8] sm:$0xff]  ;;  %v452_v23 = vpack.c.bf16 %v28_v20, %v27_v19  ;;  %v29_v25 = vld [vmem:[%s754_s0 + $0x40] sm:$0xff]  ;;  %v30_v26 = vld [vmem:[%s754_s0 + $0x48] sm:$0xff] }
   0x7   :  { %v488_v24 = vpack.c.bf16 %v381_v22, %v380_v21  ;;  %v382_v27 = vld [vmem:[%s754_s0 + $0x108] sm:$0xff]  ;;  %v383_v28 = vld [vmem:[%s754_s0 + $0x110] sm:$0xff]  ;;  %v455_v29 = vpack.c.bf16 %v30_v26, %v29_v25  ;;  %v32_v32 = vld [vmem:[%s754_s0 + $0x58] sm:$0xff] }
   0x8   :  { %447 = vmatpush1.bf16.msra.mxu0 %v446_v11  ;;  %v491_v30 = vpack.c.bf16 %v383_v28, %v382_v27  ;;  %v31_v31 = vld [vmem:[%s754_s0 + $0x50] sm:$0xff]  ;;  %v18_v33 = vld [vmem:[%s755_s1 + $0x8] sm:$0xff]  ;;  %v384_v34 = vld [vmem:[%s754_s0 + $0x118] sm:$0xff] }
   0x9   :  { %483 = vmatpush1.bf16.msra.mxu1 %v482_v12  ;;  %448 = vmatprep.subr.bf16.mxu0 %v522_v0  ;;  %v385_v35 = vld [vmem:[%s754_s0 + $0x120] sm:$0xff]  ;;  %v458_v36 = vpack.c.bf16 %v32_v32, %v31_v31  ;;  %v34_v39 = vld [vmem:[%s754_s0 + $0x68] sm:$0xff]  ;;  %v387_v41 = vld [vmem:[%s754_s0 + $0x130] sm:$0xff] }
   0xa   :  { %484 = vmatprep.subr.bf16.mxu1 %v522_v0  ;;  %372 = vmatprep.mubr.msk.f32.mxu0 %vm46_vm0, %v18_v33  ;;  %v494_v37 = vpack.c.bf16 %v385_v35, %v384_v34  ;;  %v33_v38 = vld [vmem:[%s754_s0 + $0x60] sm:$0xff]  ;;  %v386_v40 = vld [vmem:[%s754_s0 + $0x128] sm:$0xff]  ;;  %v35_v44 = vld [vmem:[%s754_s0 + $0x70] sm:$0xff] }
   0xb   :  { %400 = vmatprep.mubr.msk.f32.mxu1 %vm46_vm0, %v18_v33  ;;  %v461_v42 = vpack.c.bf16 %v34_v39, %v33_v38  ;;  %v497_v43 = vpack.c.bf16 %v387_v41, %v386_v40  ;;  %v36_v45 = vld [vmem:[%s754_s0 + $0x78] sm:$0xff]  ;;  %v389_v47 = vld [vmem:[%s754_s0 + $0x140] sm:$0xff]  ;;  %v38_v51 = vld [vmem:[%s754_s0 + $0x88] sm:$0xff] }
   0xc   :  { %450 = vmatpush1.bf16.msra.mxu0 %v449_v17  ;;  %v388_v46 = vld [vmem:[%s754_s0 + $0x138] sm:$0xff]  ;;  %v464_v48 = vpack.c.bf16 %v36_v45, %v35_v44  ;;  %v37_v50 = vld [vmem:[%s754_s0 + $0x80] sm:$0xff]  ;;  %v390_v52 = vld [vmem:[%s754_s0 + $0x148] sm:$0xff] }
   0xd   :  { %486 = vmatpush1.bf16.msra.mxu1 %v485_v18  ;;  %451 = vmatprep.subr.bf16.mxu0 %v522_v0  ;;  %v500_v49 = vpack.c.bf16 %v389_v47, %v388_v46  ;;  %v391_v53 = vld [vmem:[%s754_s0 + $0x150] sm:$0xff]  ;;  %v467_v54 = vpack.c.bf16 %v38_v51, %v37_v50  ;;  %v40_v57 = vld [vmem:[%s754_s0 + $0x98] sm:$0xff]  ;;  %v393_v59 = vld [vmem:[%s754_s0 + $0x160] sm:$0xff] }
   0xe   :  { %487 = vmatprep.subr.bf16.mxu1 %v522_v0  ;;  %v503_v55 = vpack.c.bf16 %v391_v53, %v390_v52  ;;  %v39_v56 = vld [vmem:[%s754_s0 + $0x90] sm:$0xff]  ;;  %v392_v58 = vld [vmem:[%s754_s0 + $0x158] sm:$0xff]  ;;  %v41_v62 = vld [vmem:[%s754_s0 + $0xa0] sm:$0xff] }
   0xf   :  { %v470_v60 = vpack.c.bf16 %v40_v57, %v39_v56  ;;  %v506_v61 = vpack.c.bf16 %v393_v59, %v392_v58  ;;  %v42_v63 = vld [vmem:[%s754_s0 + $0xa8] sm:$0xff]  ;;  %v395_v2 = vld [vmem:[%s754_s0 + $0x170] sm:$0xff]  ;;  %v44_v6 = vld [vmem:[%s754_s0 + $0xb8] sm:$0xff] }
  0x10   :  { %453 = vmatpush1.bf16.msra.mxu0 %v452_v23  ;;  %v394_v1 = vld [vmem:[%s754_s0 + $0x168] sm:$0xff]  ;;  %v473_v3 = vpack.c.bf16 %v42_v63, %v41_v62  ;;  %v43_v5 = vld [vmem:[%s754_s0 + $0xb0] sm:$0xff]  ;;  %v396_v7 = vld [vmem:[%s754_s0 + $0x178] sm:$0xff] }
  0x11   :  { %489 = vmatpush1.bf16.msra.mxu1 %v488_v24  ;;  %454 = vmatprep.subr.bf16.mxu0 %v522_v0  ;;  %v509_v4 = vpack.c.bf16 %v395_v2, %v394_v1  ;;  %v397_v8 = vld [vmem:[%s754_s0 + $0x180] sm:$0xff]  ;;  %v476_v9 = vpack.c.bf16 %v44_v6, %v43_v5  ;;  %v237_v12 = vld [vmem:[%s756_s2 + $0x8] sm:$0xff]  ;;  %v20_v16 = vld [vmem:[%s755_s1 + $0x18] sm:$0xff] }
  0x12   :  { %490 = vmatprep.subr.bf16.mxu1 %v522_v0  ;;  %v512_v10 = vpack.c.bf16 %v397_v8, %v396_v7  ;;  %v236_v11 = vld [vmem:[%s756_s2] sm:$0xff]  ;;  %v19_v18 = vld [vmem:[%s755_s1 + $0x10] sm:$0xff] }
  0x13   :  { %v45_v14 = vld [vmem:[%s754_s0 + $0xc0] sm:$0xf]  ;;  %v514_v17 = vpack.c.bf16 %v237_v12, %v236_v11 }
  0x14   :  { %456 = vmatpush1.bf16.msra.mxu0 %v455_v29  ;;  %v17_v15 = vld [vmem:[%s755_s1] sm:$0xff] }
  0x15   :  { %492 = vmatpush1.bf16.msra.mxu1 %v491_v30  ;;  %457 = vmatprep.subr.bf16.mxu0 %v522_v0  ;;  %v402_v27 = vld [vmem:[%s757_s3] ss:$0 sm:$0xff] }
  0x16   :  { %493 = vmatprep.subr.bf16.mxu1 %v522_v0 }
  0x18   :  { %459 = vmatpush1.bf16.msra.mxu0 %v458_v36 }
  0x19   :  { %495 = vmatpush1.bf16.msra.mxu1 %v494_v37  ;;  %460 = vmatprep.subr.bf16.mxu0 %v522_v0 }
  0x1a   :  { %496 = vmatprep.subr.bf16.mxu1 %v522_v0 }
  0x1c   :  { %462 = vmatpush1.bf16.msra.mxu0 %v461_v42 }
  0x1d   :  { %498 = vmatpush1.bf16.msra.mxu1 %v497_v43  ;;  %463 = vmatprep.subr.bf16.mxu0 %v522_v0 }
  0x1e   :  { %499 = vmatprep.subr.bf16.mxu1 %v522_v0 }
  0x20   :  { %465 = vmatpush1.bf16.msra.mxu0 %v464_v48 }
  0x21   :  { %501 = vmatpush1.bf16.msra.mxu1 %v500_v49  ;;  %466 = vmatprep.subr.bf16.mxu0 %v522_v0 }
  0x22   :  { %502 = vmatprep.subr.bf16.mxu1 %v522_v0 }
  0x24   :  { %468 = vmatpush1.bf16.msra.mxu0 %v467_v54 }
  0x25   :  { %504 = vmatpush1.bf16.msra.mxu1 %v503_v55  ;;  %469 = vmatprep.subr.bf16.mxu0 %v522_v0 }
  0x26   :  { %505 = vmatprep.subr.bf16.mxu1 %v522_v0 }
  0x28   :  { %471 = vmatpush1.bf16.msra.mxu0 %v470_v60 }
  0x29   :  { %507 = vmatpush1.bf16.msra.mxu1 %v506_v61  ;;  %472 = vmatprep.subr.bf16.mxu0 %v522_v0 }
  0x2a   :  { %508 = vmatprep.subr.bf16.mxu1 %v522_v0 }
  0x2c   :  { %474 = vmatpush1.bf16.msra.mxu0 %v473_v3 }
  0x2d   :  { %510 = vmatpush1.bf16.msra.mxu1 %v509_v4  ;;  %475 = vmatprep.subr.bf16.mxu0 %v522_v0 }
  0x2e   :  { %511 = vmatprep.subr.bf16.mxu1 %v522_v0  ;;  %v398_v0 = vld [vmem:[%s754_s0 + $0x188] sm:$0xf] }
  0x30   :  { %477 = vmatpush1.bf16.msra.mxu0 %v476_v9 }
  0x31   :  { %513 = vmatpush1.bf16.msra.mxu1 %v512_v10  ;;  %105 = vmatprep.subr.mxu0 %v523_v13 }
  0x32   :  { %209 = vmatprep.subr.mxu1 %v523_v13 }
  0x34   :  { %371 = vmatpush1.msk.msra.mxu0 %vm53_vm1, %v45_v14 }
  0x35   :  { %399 = vmatpush1.msk.msra.mxu1 %vm53_vm1, %v398_v0  ;;  %122 = vmatmul.mubr.f32.vlgmr.msra.gmra.mrb[0].mxu0 %v17_v15 }
  0x36   :  { %226 = vmatmul.mubr.f32.vlgmr.msra.gmra.mrb[0].mxu1 %v17_v15  ;;  %373 = vmatprep.mubr.msk.f32.mxu0 %vm46_vm0, %v20_v16 }
  0x37   :  { %401 = vmatprep.mubr.msk.f32.mxu1 %vm46_vm0, %v20_v16  ;;  %515 = vmatprep.subr.bf16.mxu0 %v514_v17 }
  0x38   :  { %518 = vmatprep.subr.bf16.mxu1 %v514_v17  ;;  %517 = vmatpush3.bf16.msra.mxu0 %v514_v17 }
  0x39   :  { %127 = vmatmul.mubr.f32.gmra.mrb[2].mxu0 %v19_v18  ;;  %519 = vmatpush3.bf16.msra.mxu1 %v514_v17 }
  0x3a   :  { %231 = vmatmul.mubr.f32.gmra.mrb[2].mxu1 %v19_v18 }
 0x108   :  { %v123_v19 = vpop.f32.mrb[0].mxu0 }
 0x109   :  { %v227_v20 = vpop.f32.mrb[0].mxu1  ;;  %v125_v21 = vpop.f32.mrb[1].mxu0  ;;  %436 = vmatprep.mubr.msk.f32.mxu0 %vm245_vm2, %v123_v19 }
 0x10a   :  { %v229_v22 = vpop.f32.mrb[1].mxu1  ;;  %439 = vmatprep.mubr.msk.f32.mxu1 %vm245_vm2, %v227_v20 }
 0x10c   :  { %v128_v23 = vpop.f32.mrb[2].mxu0 }
 0x10d   :  { %v232_v24 = vpop.f32.mrb[2].mxu1  ;;  %v130_v25 = vpop.f32.mrb[3].mxu0  ;;  %437 = vmatmul.mubr.msk.f32.vlgmr.msra.gmra.mrb[4].mxu0 %vm245_vm2, %v128_v23 }
 0x10e   :  { %v234_v26 = vpop.f32.mrb[3].mxu1  ;;  %440 = vmatmul.mubr.msk.f32.vlgmr.msra.gmra.mrb[4].mxu1 %vm245_vm2, %v232_v24 }
 0x1e0   :  { %v438_v28 = vpop.f32.mrb[4].mxu0 }
 0x1e1   :  { %v330_v29 = vadd.f32 %v438_v28, %v402_v27  ;;  %v441_v30 = vpop.f32.mrb[4].mxu1  ;;  %v324_v31 = vpop.f32.mrb[5].mxu0 }
 0x1e2   :  { %v340_v32 = vadd.f32 %v441_v30, %v402_v27  ;;  %v325_v33 = vadd.f32 %v402_v27, %v324_v31  ;;  %v334_v34 = vpop.f32.mrb[5].mxu1 }
 0x1e3   :  { %v344_v35 = vmax.f32 %v330_v29, 0.0  ;;  %v335_v36 = vadd.f32 %v402_v27, %v334_v34 }
 0x1e4   :  { %v346_v37 = vmax.f32 %v340_v32, 0.0  ;;  %v343_v38 = vmax.f32 %v325_v33, 0.0 }
 0x1e5   :  { %v345_v39 = vmax.f32 %v335_v36, 0.0 }
 0x1e6   :  { %v418_v40 = vpack.c.bf16 %v344_v35, %v343_v38 }
 0x1e7   :  { %v423_v41 = vpack.c.bf16 %v346_v37, %v345_v39 }
 0x1e8   :  { %419 = vst [vmem:[%s758_s4] sm:$0xff] %v418_v40  }
 0x1e9   :  { %425 = vst [vmem:[%s758_s4 + $0x8] sm:$0xff] %v423_v41  }

// kernel: inception_aux_forward.3
= control target key start
LH: loop header
LB: loop body
LE: loop exit
PB: predicated region body
PF: predicated region fallthrough
CT: control target
= control target key end

     0   :  { %v1050_v32 = vlaneseq  ;;  %v9737_v33 = vmov 1966171168   ;;  %s13246_s0 = inlined_call_operand.vmem [shape: bf16[2,2048], index: 0, kind: input, shape index: {}]   ;;  %s13247_s1 = inlined_call_operand.vmem [shape: bf16[2048,1024], index: 1, kind: input, shape index: {}]   ;;  %s13248_s2 = inlined_call_operand.vmem [shape: f32[1,1024], index: 2, kind: input, shape index: {}]   ;;  %s13249_s3 = inlined_call_operand.vmem [shape: bf16[1024,128], index: 3, kind: input, shape index: {}]   ;;  %s13250_s4 = inlined_call_operand.vmem [shape: f32[1,128], index: 4, kind: input, shape index: {}]   ;;  %s13251_s5 = inlined_call_operand.hbm [shape: f32[2,128], index: 5, kind: output, shape index: {}]  }
   0x1   :  { %v24_v0 = vld [vmem:[%s13247_s1] sm:$0xff]  ;;  %v25_v2 = vld [vmem:[%s13247_s1 + $0x8] sm:$0xff]  ;;  %v1094_v34 = vunpack.c.l.s4 %v9737_v33 }
   0x2   :  { %v28_v1 = vld [vmem:[%s13247_s1 + $0x20] sm:$0xff]  ;;  %v29_v4 = vld [vmem:[%s13247_s1 + $0x28] sm:$0xff]  ;;  %v9835_v43 = vshrl.u32 %v1050_v32, 7 }
   0x3   :  { %v8349_v3 = vcombine.high %v24_v0, %v28_v1  ;;  %v8348_v5 = vcombine.low %v24_v0, %v28_v1  ;;  %v32_v6 = vld [vmem:[%s13247_s1 + $0x40] sm:$0xff]  ;;  %v8351_v8 = vcombine.high %v25_v2, %v29_v4  ;;  %v8350_v9 = vcombine.low %v25_v2, %v29_v4  ;;  %v33_v11 = vld [vmem:[%s13247_s1 + $0x48] sm:$0xff] }
   0x4   :  { %v36_v7 = vld [vmem:[%s13247_s1 + $0x60] sm:$0xff]  ;;  %v37_v12 = vld [vmem:[%s13247_s1 + $0x68] sm:$0xff]  ;;  %v1095_v44 = vunpack.c.0.s8 %v1094_v34 }
   0x5   :  { %v8357_v10 = vcombine.high %v32_v6, %v36_v7  ;;  %v40_v13 = vld [vmem:[%s13247_s1 + $0x80] sm:$0xff]  ;;  %6326 = vmatprep.subr.bf16.mxu0 %v8349_v3  ;;  %v8359_v14 = vcombine.high %v33_v11, %v37_v12  ;;  %v41_v16 = vld [vmem:[%s13247_s1 + $0x88] sm:$0xff]  ;;  %6654 = vmatprep.subr.bf16.mxu1 %v8351_v8  ;;  %v8356_v18 = vcombine.low %v32_v6, %v36_v7 }
   0x6   :  { %v44_v15 = vld [vmem:[%s13247_s1 + $0xa0] sm:$0xff]  ;;  %v45_v17 = vld [vmem:[%s13247_s1 + $0xa8] sm:$0xff]  ;;  %6327 = vmatpush1.bf16.msra.mxu0 %v8348_v5  ;;  %6655 = vmatpush1.bf16.msra.mxu1 %v8350_v9  ;;  %v8358_v19 = vcombine.low %v33_v11, %v37_v12  ;;  %v9850_v53 = vsub.s32 %v1095_v44, %v9835_v43 }
   0x7   :  { %6328 = vmatprep.subr.bf16.mxu0 %v8357_v10  ;;  %v8365_v20 = vcombine.high %v40_v13, %v44_v15  ;;  %6656 = vmatprep.subr.bf16.mxu1 %v8359_v14  ;;  %v8367_v21 = vcombine.high %v41_v16, %v45_v17  ;;  %v48_v22 = vld [vmem:[%s13247_s1 + $0xc0] sm:$0xff]  ;;  %v49_v24 = vld [vmem:[%s13247_s1 + $0xc8] sm:$0xff]  ;;  %v8364_v26 = vcombine.low %v40_v13, %v44_v15 }
   0x8   :  { %v52_v23 = vld [vmem:[%s13247_s1 + $0xe0] sm:$0xff]  ;;  %v53_v25 = vld [vmem:[%s13247_s1 + $0xe8] sm:$0xff]  ;;  %v8366_v27 = vcombine.low %v41_v16, %v45_v17 }
   0x9   :  { %v8373_v28 = vcombine.high %v48_v22, %v52_v23  ;;  %v8375_v29 = vcombine.high %v49_v24, %v53_v25  ;;  %v56_v30 = vld [vmem:[%s13247_s1 + $0x100] sm:$0xff]  ;;  %v57_v35 = vld [vmem:[%s13247_s1 + $0x108] sm:$0xff]  ;;  %v8372_v37 = vcombine.low %v48_v22, %v52_v23  ;;  %v8374_v38 = vcombine.low %v49_v24, %v53_v25 }
   0xa   :  { %6329 = vmatpush1.bf16.msra.mxu0 %v8356_v18  ;;  %6657 = vmatpush1.bf16.msra.mxu1 %v8358_v19  ;;  %v60_v31 = vld [vmem:[%s13247_s1 + $0x120] sm:$0xff]  ;;  %v61_v36 = vld [vmem:[%s13247_s1 + $0x128] sm:$0xff] }
   0xb   :  { %6330 = vmatprep.subr.bf16.mxu0 %v8365_v20  ;;  %6658 = vmatprep.subr.bf16.mxu1 %v8367_v21  ;;  %v8381_v39 = vcombine.high %v56_v30, %v60_v31  ;;  %v8383_v40 = vcombine.high %v57_v35, %v61_v36  ;;  %v64_v41 = vld [vmem:[%s13247_s1 + $0x140] sm:$0xff]  ;;  %v65_v45 = vld [vmem:[%s13247_s1 + $0x148] sm:$0xff]  ;;  %v8380_v47 = vcombine.low %v56_v30, %v60_v31 }
   0xc   :  { %v68_v42 = vld [vmem:[%s13247_s1 + $0x160] sm:$0xff]  ;;  %v69_v46 = vld [vmem:[%s13247_s1 + $0x168] sm:$0xff]  ;;  %v8382_v48 = vcombine.low %v57_v35, %v61_v36 }
   0xd   :  { %v8389_v49 = vcombine.high %v64_v41, %v68_v42  ;;  %v8391_v50 = vcombine.high %v65_v45, %v69_v46  ;;  %v72_v51 = vld [vmem:[%s13247_s1 + $0x180] sm:$0xff]  ;;  %v73_v54 = vld [vmem:[%s13247_s1 + $0x188] sm:$0xff]  ;;  %v8388_v56 = vcombine.low %v64_v41, %v68_v42  ;;  %v8390_v57 = vcombine.low %v65_v45, %v69_v46 }
   0xe   :  { %6331 = vmatpush1.bf16.msra.mxu0 %v8364_v26  ;;  %6659 = vmatpush1.bf16.msra.mxu1 %v8366_v27  ;;  %v76_v52 = vld [vmem:[%s13247_s1 + $0x1a0] sm:$0xff]  ;;  %v77_v55 = vld [vmem:[%s13247_s1 + $0x1a8] sm:$0xff] }
   0xf   :  { %6332 = vmatprep.subr.bf16.mxu0 %v8373_v28  ;;  %6660 = vmatprep.subr.bf16.mxu1 %v8375_v29  ;;  %v8397_v58 = vcombine.high %v72_v51, %v76_v52  ;;  %v9861_v59 = vld [vmem:[%s13246_s0] sm:$0xff]  ;;  %v8399_v60 = vcombine.high %v73_v54, %v77_v55  ;;  %v81_v0 = vld [vmem:[%s13247_s1 + $0x1c8] sm:$0xff]  ;;  %v8396_v2 = vcombine.low %v72_v51, %v76_v52 }
  0x10   :  { %v80_v61 = vld [vmem:[%s13247_s1 + $0x1c0] sm:$0xff]  ;;  %v9871_v63 = vrot.slane %v9861_v59, %v9850_v53  ;;  %v85_v1 = vld [vmem:[%s13247_s1 + $0x1e8] sm:$0xff]  ;;  %v8398_v4 = vcombine.low %v73_v54, %v77_v55 }
  0x11   :  { %v84_v62 = vld [vmem:[%s13247_s1 + $0x1e0] sm:$0xff]  ;;  %v8407_v6 = vcombine.high %v81_v0, %v85_v1  ;;  %v89_v10 = vld [vmem:[%s13247_s1 + $0x208] sm:$0xff]  ;;  %v8406_v13 = vcombine.low %v81_v0, %v85_v1 }
  0x12   :  { %6333 = vmatpush1.bf16.msra.mxu0 %v8372_v37  ;;  %6661 = vmatpush1.bf16.msra.mxu1 %v8374_v38  ;;  %v1107_v3 = vcombine.high %v9871_v63, %v9871_v63  ;;  %v8405_v5 = vcombine.high %v80_v61, %v84_v62  ;;  %v88_v7 = vld [vmem:[%s13247_s1 + $0x200] sm:$0xff]  ;;  %v93_v11 = vld [vmem:[%s13247_s1 + $0x228] sm:$0xff]  ;;  %v8404_v12 = vcombine.low %v80_v61, %v84_v62 }
  0x13   :  { %6334 = vmatprep.subr.bf16.mxu0 %v8381_v39  ;;  %6662 = vmatprep.subr.bf16.mxu1 %v8383_v40  ;;  %v92_v8 = vld [vmem:[%s13247_s1 + $0x220] sm:$0xff]  ;;  %v8415_v15 = vcombine.high %v89_v10, %v93_v11  ;;  %v97_v18 = vld [vmem:[%s13247_s1 + $0x248] sm:$0xff]  ;;  %v8414_v21 = vcombine.low %v89_v10, %v93_v11 }
  0x14   :  { %v9888_v9 = vrot.slane %v1107_v3, %v9850_v53  ;;  %v8413_v14 = vcombine.high %v88_v7, %v92_v8  ;;  %v96_v16 = vld [vmem:[%s13247_s1 + $0x240] sm:$0xff]  ;;  %v101_v19 = vld [vmem:[%s13247_s1 + $0x268] sm:$0xff]  ;;  %v8412_v20 = vcombine.low %v88_v7, %v92_v8 }
  0x15   :  { %v100_v17 = vld [vmem:[%s13247_s1 + $0x260] sm:$0xff]  ;;  %v8423_v23 = vcombine.high %v97_v18, %v101_v19  ;;  %v105_v26 = vld [vmem:[%s13247_s1 + $0x288] sm:$0xff]  ;;  %v8422_v29 = vcombine.low %v97_v18, %v101_v19 }
  0x16   :  { %6335 = vmatpush1.bf16.msra.mxu0 %v8380_v47  ;;  %6663 = vmatpush1.bf16.msra.mxu1 %v8382_v48  ;;  %v8421_v22 = vcombine.high %v96_v16, %v100_v17  ;;  %v104_v24 = vld [vmem:[%s13247_s1 + $0x280] sm:$0xff]  ;;  %v109_v27 = vld [vmem:[%s13247_s1 + $0x2a8] sm:$0xff]  ;;  %v8420_v28 = vcombine.low %v96_v16, %v100_v17 }
  0x17   :  { %6336 = vmatprep.subr.bf16.mxu0 %v8389_v49  ;;  %6664 = vmatprep.subr.bf16.mxu1 %v8391_v50  ;;  %v108_v25 = vld [vmem:[%s13247_s1 + $0x2a0] sm:$0xff]  ;;  %v8431_v31 = vcombine.high %v105_v26, %v109_v27  ;;  %v113_v34 = vld [vmem:[%s13247_s1 + $0x2c8] sm:$0xff]  ;;  %v8430_v37 = vcombine.low %v105_v26, %v109_v27 }
  0x18   :  { %6358 = vmatprep.mubr.bf16.mxu0 %v9888_v9  ;;  %6686 = vmatprep.mubr.bf16.mxu1 %v9888_v9  ;;  %v8429_v30 = vcombine.high %v104_v24, %v108_v25  ;;  %v112_v32 = vld [vmem:[%s13247_s1 + $0x2c0] sm:$0xff]  ;;  %v117_v35 = vld [vmem:[%s13247_s1 + $0x2e8] sm:$0xff]  ;;  %v8428_v36 = vcombine.low %v104_v24, %v108_v25 }
  0x19   :  { %v116_v33 = vld [vmem:[%s13247_s1 + $0x2e0] sm:$0xff]  ;;  %v8439_v39 = vcombine.high %v113_v34, %v117_v35  ;;  %v121_v42 = vld [vmem:[%s13247_s1 + $0x308] sm:$0xff]  ;;  %v8438_v46 = vcombine.low %v113_v34, %v117_v35 }
  0x1a   :  { %6337 = vmatpush1.bf16.msra.mxu0 %v8388_v56  ;;  %6665 = vmatpush1.bf16.msra.mxu1 %v8390_v57  ;;  %v8437_v38 = vcombine.high %v112_v32, %v116_v33  ;;  %v120_v40 = vld [vmem:[%s13247_s1 + $0x300] sm:$0xff]  ;;  %v125_v44 = vld [vmem:[%s13247_s1 + $0x328] sm:$0xff]  ;;  %v8436_v45 = vcombine.low %v112_v32, %v116_v33  ;;  %v10024_v33 = vcombine.high %v9888_v9, %v9888_v9 }
  0x1b   :  { %6338 = vmatprep.subr.bf16.mxu0 %v8397_v58  ;;  %6666 = vmatprep.subr.bf16.mxu1 %v8399_v60  ;;  %v124_v41 = vld [vmem:[%s13247_s1 + $0x320] sm:$0xff]  ;;  %v8447_v48 = vcombine.high %v121_v42, %v125_v44  ;;  %v129_v51 = vld [vmem:[%s13247_s1 + $0x348] sm:$0xff]  ;;  %v8446_v55 = vcombine.low %v121_v42, %v125_v44 }
  0x1c   :  { %v8445_v47 = vcombine.high %v120_v40, %v124_v41  ;;  %v128_v49 = vld [vmem:[%s13247_s1 + $0x340] sm:$0xff]  ;;  %v133_v52 = vld [vmem:[%s13247_s1 + $0x368] sm:$0xff]  ;;  %v8444_v54 = vcombine.low %v120_v40, %v124_v41 }
  0x1d   :  { %v132_v50 = vld [vmem:[%s13247_s1 + $0x360] sm:$0xff]  ;;  %v8455_v57 = vcombine.high %v129_v51, %v133_v52  ;;  %v137_v61 = vld [vmem:[%s13247_s1 + $0x388] sm:$0xff]  ;;  %v8454_v1 = vcombine.low %v129_v51, %v133_v52 }
  0x1e   :  { %6339 = vmatpush1.bf16.msra.mxu0 %v8396_v2  ;;  %6667 = vmatpush1.bf16.msra.mxu1 %v8398_v4  ;;  %v8453_v56 = vcombine.high %v128_v49, %v132_v50  ;;  %v136_v58 = vld [vmem:[%s13247_s1 + $0x380] sm:$0xff]  ;;  %v141_v62 = vld [vmem:[%s13247_s1 + $0x3a8] sm:$0xff]  ;;  %v8452_v0 = vcombine.low %v128_v49, %v132_v50 }
  0x1f   :  { %6340 = vmatprep.subr.bf16.mxu0 %v8405_v5  ;;  %6668 = vmatprep.subr.bf16.mxu1 %v8407_v6  ;;  %v140_v60 = vld [vmem:[%s13247_s1 + $0x3a0] sm:$0xff]  ;;  %v8463_v3 = vcombine.high %v137_v61, %v141_v62  ;;  %v145_v6 = vld [vmem:[%s13247_s1 + $0x3c8] sm:$0xff]  ;;  %v8462_v10 = vcombine.low %v137_v61, %v141_v62 }
  0x20   :  { %v8461_v2 = vcombine.high %v136_v58, %v140_v60  ;;  %v144_v4 = vld [vmem:[%s13247_s1 + $0x3c0] sm:$0xff]  ;;  %v149_v7 = vld [vmem:[%s13247_s1 + $0x3e8] sm:$0xff]  ;;  %v8460_v8 = vcombine.low %v136_v58, %v140_v60 }
  0x21   :  { %v148_v5 = vld [vmem:[%s13247_s1 + $0x3e0] sm:$0xff]  ;;  %v157_v16 = vld [vmem:[%s13247_s1 + $0x428] sm:$0xff]  ;;  %v8470_v18 = vcombine.low %v145_v6, %v149_v7 }
  0x22   :  { %6341 = vmatpush1.bf16.msra.mxu0 %v8404_v12  ;;  %6669 = vmatpush1.bf16.msra.mxu1 %v8406_v13  ;;  %v8469_v11 = vcombine.high %v144_v4, %v148_v5  ;;  %v8471_v12 = vcombine.high %v145_v6, %v149_v7  ;;  %v152_v13 = vld [vmem:[%s13247_s1 + $0x400] sm:$0xff]  ;;  %v8468_v17 = vcombine.low %v144_v4, %v148_v5  ;;  %v161_v24 = vld [vmem:[%s13247_s1 + $0x448] sm:$0xff] }
  0x23   :  { %6342 = vmatprep.subr.bf16.mxu0 %v8413_v14  ;;  %6670 = vmatprep.subr.bf16.mxu1 %v8415_v15  ;;  %v156_v14 = vld [vmem:[%s13247_s1 + $0x420] sm:$0xff]  ;;  %v153_v15 = vld [vmem:[%s13247_s1 + $0x408] sm:$0xff] }
  0x24   :  { %v8477_v19 = vcombine.high %v152_v13, %v156_v14  ;;  %v165_v25 = vld [vmem:[%s13247_s1 + $0x468] sm:$0xff]  ;;  %v8476_v26 = vcombine.low %v152_v13, %v156_v14  ;;  %v8478_v27 = vcombine.low %v153_v15, %v157_v16 }
  0x25   :  { %v173_v32 = vld [vmem:[%s13247_s1 + $0x4a8] sm:$0xff]  ;;  %v8486_v35 = vcombine.low %v161_v24, %v165_v25 }
  0x26   :  { %6343 = vmatpush1.bf16.msra.mxu0 %v8412_v20  ;;  %6671 = vmatpush1.bf16.msra.mxu1 %v8414_v21  ;;  %v8479_v20 = vcombine.high %v153_v15, %v157_v16  ;;  %v160_v21 = vld [vmem:[%s13247_s1 + $0x440] sm:$0xff]  ;;  %v181_v41 = vld [vmem:[%s13247_s1 + $0x4e8] sm:$0xff] }
  0x27   :  { %6344 = vmatprep.subr.bf16.mxu0 %v8421_v22  ;;  %6672 = vmatprep.subr.bf16.mxu1 %v8423_v23  ;;  %v164_v22 = vld [vmem:[%s13247_s1 + $0x460] sm:$0xff]  ;;  %v10002_v23 = vrot.slane %v9871_v63, %v9850_v53  ;;  %v189_v50 = vld [vmem:[%s13247_s1 + $0x528] sm:$0xff] }
  0x28   :  { %v172_v63 = vld [vmem:[%s13247_s1 + $0x4a0] sm:$0xff]  ;;  %v8484_v34 = vcombine.low %v160_v21, %v164_v22  ;;  %v197_v60 = vld [vmem:[%s13247_s1 + $0x568] sm:$0xff] }
  0x29   :  { %v205_v5 = vld [vmem:[%s13247_s1 + $0x5a8] sm:$0xff] }
  0x2a   :  { %6345 = vmatpush1.bf16.msra.mxu0 %v8420_v28  ;;  %6673 = vmatpush1.bf16.msra.mxu1 %v8422_v29  ;;  %v8485_v28 = vcombine.high %v160_v21, %v164_v22  ;;  %v168_v29 = vld [vmem:[%s13247_s1 + $0x480] sm:$0xff]  ;;  %v213_v14 = vld [vmem:[%s13247_s1 + $0x5e8] sm:$0xff] }
  0x2b   :  { %6346 = vmatprep.subr.bf16.mxu0 %v8429_v30  ;;  %6674 = vmatprep.subr.bf16.mxu1 %v8431_v31  ;;  %v169_v30 = vld [vmem:[%s13247_s1 + $0x488] sm:$0xff]  ;;  %v8487_v31 = vcombine.high %v161_v24, %v165_v25  ;;  %v8492_v42 = vcombine.low %v168_v29, %v172_v63 }
  0x2c   :  { %v8495_v40 = vcombine.high %v169_v30, %v173_v32  ;;  %v8494_v44 = vcombine.low %v169_v30, %v173_v32  ;;  %v221_v22 = vld [vmem:[%s13247_s1 + $0x628] sm:$0xff] }
  0x2d   :  { %v229_v30 = vld [vmem:[%s13247_s1 + $0x668] sm:$0xff] }
  0x2e   :  { %6347 = vmatpush1.bf16.msra.mxu0 %v8428_v36  ;;  %6675 = vmatpush1.bf16.msra.mxu1 %v8430_v37  ;;  %v8493_v36 = vcombine.high %v168_v29, %v172_v63  ;;  %v176_v37 = vld [vmem:[%s13247_s1 + $0x4c0] sm:$0xff]  ;;  %v225_v29 = vld [vmem:[%s13247_s1 + $0x648] sm:$0xff] }
  0x2f   :  { %6348 = vmatprep.subr.bf16.mxu0 %v8437_v38  ;;  %6676 = vmatprep.subr.bf16.mxu1 %v8439_v39  ;;  %v180_v38 = vld [vmem:[%s13247_s1 + $0x4e0] sm:$0xff]  ;;  %v177_v39 = vld [vmem:[%s13247_s1 + $0x4c8] sm:$0xff] }
  0x30   :  { %v8503_v49 = vcombine.high %v177_v39, %v181_v41  ;;  %v8500_v51 = vcombine.low %v176_v37, %v180_v38  ;;  %v8502_v52 = vcombine.low %v177_v39, %v181_v41  ;;  %v237_v39 = vld [vmem:[%s13247_s1 + $0x6a8] sm:$0xff]  ;;  %v8550_v41 = vcombine.low %v225_v29, %v229_v30 }
  0x32   :  { %6349 = vmatpush1.bf16.msra.mxu0 %v8436_v45  ;;  %6677 = vmatpush1.bf16.msra.mxu1 %v8438_v46  ;;  %v8501_v45 = vcombine.high %v176_v37, %v180_v38  ;;  %v184_v46 = vld [vmem:[%s13247_s1 + $0x500] sm:$0xff]  ;;  %v233_v37 = vld [vmem:[%s13247_s1 + $0x688] sm:$0xff]  ;;  %v8551_v38 = vcombine.high %v225_v29, %v229_v30 }
  0x33   :  { %6350 = vmatprep.subr.bf16.mxu0 %v8445_v47  ;;  %6678 = vmatprep.subr.bf16.mxu1 %v8447_v48  ;;  %v188_v47 = vld [vmem:[%s13247_s1 + $0x520] sm:$0xff]  ;;  %v185_v48 = vld [vmem:[%s13247_s1 + $0x508] sm:$0xff] }
  0x34   :  { %v8511_v58 = vcombine.high %v185_v48, %v189_v50  ;;  %v8508_v61 = vcombine.low %v184_v46, %v188_v47  ;;  %v8510_v62 = vcombine.low %v185_v48, %v189_v50  ;;  %v245_v48 = vld [vmem:[%s13247_s1 + $0x6e8] sm:$0xff]  ;;  %v8558_v50 = vcombine.low %v233_v37, %v237_v39 }
  0x35   :  { %v285_v29 = vld [vmem:[%s13247_s1 + $0x828] sm:$0xff] }
  0x36   :  { %6351 = vmatpush1.bf16.msra.mxu0 %v8444_v54  ;;  %6679 = vmatpush1.bf16.msra.mxu1 %v8446_v55  ;;  %v8509_v54 = vcombine.high %v184_v46, %v188_v47  ;;  %v192_v55 = vld [vmem:[%s13247_s1 + $0x540] sm:$0xff]  ;;  %v241_v46 = vld [vmem:[%s13247_s1 + $0x6c8] sm:$0xff]  ;;  %v8559_v47 = vcombine.high %v233_v37, %v237_v39 }
  0x37   :  { %6352 = vmatprep.subr.bf16.mxu0 %v8453_v56  ;;  %6680 = vmatprep.subr.bf16.mxu1 %v8455_v57  ;;  %v196_v56 = vld [vmem:[%s13247_s1 + $0x560] sm:$0xff]  ;;  %v193_v57 = vld [vmem:[%s13247_s1 + $0x548] sm:$0xff] }
  0x38   :  { %v8519_v4 = vcombine.high %v193_v57, %v197_v60  ;;  %v8516_v6 = vcombine.low %v192_v55, %v196_v56  ;;  %v8518_v7 = vcombine.low %v193_v57, %v197_v60  ;;  %v253_v57 = vld [vmem:[%s13247_s1 + $0x728] sm:$0xff]  ;;  %v8566_v60 = vcombine.low %v241_v46, %v245_v48 }
  0x3a   :  { %6353 = vmatpush1.bf16.msra.mxu0 %v8452_v0  ;;  %6681 = vmatpush1.bf16.msra.mxu1 %v8454_v1  ;;  %v8517_v0 = vcombine.high %v192_v55, %v196_v56  ;;  %v200_v1 = vld [vmem:[%s13247_s1 + $0x580] sm:$0xff]  ;;  %v249_v55 = vld [vmem:[%s13247_s1 + $0x708] sm:$0xff]  ;;  %v8567_v56 = vcombine.high %v241_v46, %v245_v48 }
  0x3b   :  { %6354 = vmatprep.subr.bf16.mxu0 %v8461_v2  ;;  %6682 = vmatprep.subr.bf16.mxu1 %v8463_v3  ;;  %v204_v2 = vld [vmem:[%s13247_s1 + $0x5a0] sm:$0xff]  ;;  %v201_v3 = vld [vmem:[%s13247_s1 + $0x588] sm:$0xff] }
  0x3c   :  { %v8527_v13 = vcombine.high %v201_v3, %v205_v5  ;;  %v8524_v15 = vcombine.low %v200_v1, %v204_v2  ;;  %v8526_v16 = vcombine.low %v201_v3, %v205_v5  ;;  %v261_v3 = vld [vmem:[%s13247_s1 + $0x768] sm:$0xff]  ;;  %v8574_v5 = vcombine.low %v249_v55, %v253_v57 }
  0x3e   :  { %6355 = vmatpush1.bf16.msra.mxu0 %v8460_v8  ;;  %6683 = vmatpush1.bf16.msra.mxu1 %v8462_v10  ;;  %v8525_v8 = vcombine.high %v200_v1, %v204_v2  ;;  %v208_v10 = vld [vmem:[%s13247_s1 + $0x5c0] sm:$0xff]  ;;  %v257_v1 = vld [vmem:[%s13247_s1 + $0x748] sm:$0xff]  ;;  %v8575_v2 = vcombine.high %v249_v55, %v253_v57 }
  0x3f   :  { %6356 = vmatprep.subr.bf16.mxu0 %v8469_v11  ;;  %6684 = vmatprep.subr.bf16.mxu1 %v8471_v12  ;;  %v212_v11 = vld [vmem:[%s13247_s1 + $0x5e0] sm:$0xff]  ;;  %v209_v12 = vld [vmem:[%s13247_s1 + $0x5c8] sm:$0xff] }
  0x40   :  { %v8535_v21 = vcombine.high %v209_v12, %v213_v14  ;;  %v8532_v24 = vcombine.low %v208_v10, %v212_v11  ;;  %v8534_v25 = vcombine.low %v209_v12, %v213_v14  ;;  %v269_v12 = vld [vmem:[%s13247_s1 + $0x7a8] sm:$0xff]  ;;  %v8582_v14 = vcombine.low %v257_v1, %v261_v3 }
  0x42   :  { %6357 = vmatpush1.bf16.msra.mxu0 %v8468_v17  ;;  %6685 = vmatpush1.bf16.msra.mxu1 %v8470_v18  ;;  %v8533_v17 = vcombine.high %v208_v10, %v212_v11  ;;  %v216_v18 = vld [vmem:[%s13247_s1 + $0x600] sm:$0xff]  ;;  %v265_v10 = vld [vmem:[%s13247_s1 + $0x788] sm:$0xff]  ;;  %v8583_v11 = vcombine.high %v257_v1, %v261_v3 }
  0x43   :  { %6367 = vmatprep.subr.bf16.mxu0 %v8477_v19  ;;  %6695 = vmatprep.subr.bf16.mxu1 %v8479_v20  ;;  %v220_v19 = vld [vmem:[%s13247_s1 + $0x620] sm:$0xff]  ;;  %v217_v20 = vld [vmem:[%s13247_s1 + $0x608] sm:$0xff] }
  0x44   :  { %v8543_v63 = vcombine.high %v217_v20, %v221_v22  ;;  %v8542_v32 = vcombine.low %v217_v20, %v221_v22  ;;  %v277_v20 = vld [vmem:[%s13247_s1 + $0x7e8] sm:$0xff] }
  0x45   :  { %6359 = vmatmul.mubr.bf16.vlgmr.msra.gmra.mrb[0].mxu0 %v10002_v23  ;;  %6687 = vmatmul.mubr.bf16.vlgmr.msra.gmra.mrb[0].mxu1 %v10002_v23 }
  0x46   :  { %6368 = vmatpush1.bf16.msra.mxu0 %v8476_v26  ;;  %6696 = vmatpush1.bf16.msra.mxu1 %v8478_v27  ;;  %v8541_v26 = vcombine.high %v216_v18, %v220_v19  ;;  %v224_v27 = vld [vmem:[%s13247_s1 + $0x640] sm:$0xff] }
  0x47   :  { %6369 = vmatprep.subr.bf16.mxu0 %v8485_v28  ;;  %6697 = vmatprep.subr.bf16.mxu1 %v8487_v31  ;;  %v228_v28 = vld [vmem:[%s13247_s1 + $0x660] sm:$0xff]  ;;  %v8540_v31 = vcombine.low %v216_v18, %v220_v19  ;;  %v273_v18 = vld [vmem:[%s13247_s1 + $0x7c8] sm:$0xff]  ;;  %v8591_v19 = vcombine.high %v265_v10, %v269_v12 }
  0x48   :  { %6399 = vmatprep.mubr.bf16.mxu0 %v10024_v33  ;;  %6727 = vmatprep.mubr.bf16.mxu1 %v10024_v33 }
  0x4a   :  { %6370 = vmatpush1.bf16.msra.mxu0 %v8484_v34  ;;  %6698 = vmatpush1.bf16.msra.mxu1 %v8486_v35  ;;  %v8549_v34 = vcombine.high %v224_v27, %v228_v28  ;;  %v232_v35 = vld [vmem:[%s13247_s1 + $0x680] sm:$0xff] }
  0x4b   :  { %6371 = vmatprep.subr.bf16.mxu0 %v8493_v36  ;;  %6699 = vmatprep.subr.bf16.mxu1 %v8495_v40  ;;  %v236_v36 = vld [vmem:[%s13247_s1 + $0x6a0] sm:$0xff]  ;;  %v8548_v40 = vcombine.low %v224_v27, %v228_v28  ;;  %v281_v28 = vld [vmem:[%s13247_s1 + $0x808] sm:$0xff] }
  0x4c   :  { %v284_v27 = vld [vmem:[%s13247_s1 + $0x820] sm:$0xff]  ;;  %v8607_v37 = vcombine.high %v281_v28, %v285_v29 }
  0x4e   :  { %6372 = vmatpush1.bf16.msra.mxu0 %v8492_v42  ;;  %6700 = vmatpush1.bf16.msra.mxu1 %v8494_v44  ;;  %v8557_v42 = vcombine.high %v232_v35, %v236_v36  ;;  %v240_v44 = vld [vmem:[%s13247_s1 + $0x6c0] sm:$0xff] }
  0x4f   :  { %6373 = vmatprep.subr.bf16.mxu0 %v8501_v45  ;;  %6701 = vmatprep.subr.bf16.mxu1 %v8503_v49  ;;  %v244_v45 = vld [vmem:[%s13247_s1 + $0x6e0] sm:$0xff]  ;;  %v8556_v49 = vcombine.low %v232_v35, %v236_v36  ;;  %v289_v36 = vld [vmem:[%s13247_s1 + $0x848] sm:$0xff] }
  0x50   :  { %v292_v35 = vld [vmem:[%s13247_s1 + $0x860] sm:$0xff] }
  0x52   :  { %6374 = vmatpush1.bf16.msra.mxu0 %v8500_v51  ;;  %6702 = vmatpush1.bf16.msra.mxu1 %v8502_v52  ;;  %v8565_v51 = vcombine.high %v240_v44, %v244_v45  ;;  %v248_v52 = vld [vmem:[%s13247_s1 + $0x700] sm:$0xff] }
  0x53   :  { %6375 = vmatprep.subr.bf16.mxu0 %v8509_v54  ;;  %6703 = vmatprep.subr.bf16.mxu1 %v8511_v58  ;;  %v252_v54 = vld [vmem:[%s13247_s1 + $0x720] sm:$0xff]  ;;  %v8564_v58 = vcombine.low %v240_v44, %v244_v45 }
  0x56   :  { %6376 = vmatpush1.bf16.msra.mxu0 %v8508_v61  ;;  %6704 = vmatpush1.bf16.msra.mxu1 %v8510_v62  ;;  %v8573_v61 = vcombine.high %v248_v52, %v252_v54  ;;  %v256_v62 = vld [vmem:[%s13247_s1 + $0x740] sm:$0xff] }
  0x57   :  { %6377 = vmatprep.subr.bf16.mxu0 %v8517_v0  ;;  %6705 = vmatprep.subr.bf16.mxu1 %v8519_v4  ;;  %v260_v0 = vld [vmem:[%s13247_s1 + $0x760] sm:$0xff]  ;;  %v8572_v4 = vcombine.low %v248_v52, %v252_v54 }
  0x5a   :  { %6378 = vmatpush1.bf16.msra.mxu0 %v8516_v6  ;;  %6706 = vmatpush1.bf16.msra.mxu1 %v8518_v7  ;;  %v8581_v6 = vcombine.high %v256_v62, %v260_v0  ;;  %v264_v7 = vld [vmem:[%s13247_s1 + $0x780] sm:$0xff] }
  0x5b   :  { %6379 = vmatprep.subr.bf16.mxu0 %v8525_v8  ;;  %6707 = vmatprep.subr.bf16.mxu1 %v8527_v13  ;;  %v268_v8 = vld [vmem:[%s13247_s1 + $0x7a0] sm:$0xff]  ;;  %v8580_v13 = vcombine.low %v256_v62, %v260_v0 }
  0x5c   :  { %v8588_v22 = vcombine.low %v264_v7, %v268_v8 }
  0x5e   :  { %6380 = vmatpush1.bf16.msra.mxu0 %v8524_v15  ;;  %6708 = vmatpush1.bf16.msra.mxu1 %v8526_v16  ;;  %v8589_v15 = vcombine.high %v264_v7, %v268_v8  ;;  %v272_v16 = vld [vmem:[%s13247_s1 + $0x7c0] sm:$0xff] }
  0x5f   :  { %6381 = vmatprep.subr.bf16.mxu0 %v8533_v17  ;;  %6709 = vmatprep.subr.bf16.mxu1 %v8535_v21  ;;  %v276_v17 = vld [vmem:[%s13247_s1 + $0x7e0] sm:$0xff]  ;;  %v1092_v21 = vcombine.high %v9861_v59, %v9861_v59  ;;  %v8599_v59 = vcombine.high %v273_v18, %v277_v20 }
  0x60   :  { %v8596_v30 = vcombine.low %v272_v16, %v276_v17 }
  0x62   :  { %6382 = vmatpush1.bf16.msra.mxu0 %v8532_v24  ;;  %6710 = vmatpush1.bf16.msra.mxu1 %v8534_v25  ;;  %v8590_v24 = vcombine.low %v265_v10, %v269_v12  ;;  %v8597_v25 = vcombine.high %v272_v16, %v276_v17 }
  0x63   :  { %6383 = vmatprep.subr.bf16.mxu0 %v8541_v26  ;;  %6711 = vmatprep.subr.bf16.mxu1 %v8543_v63  ;;  %v280_v26 = vld [vmem:[%s13247_s1 + $0x800] sm:$0xff]  ;;  %v10201_v63 = vrot.slane %v1092_v21, %v9850_v53 }
  0x65   :  { %v1108_v39 = vcombine.high %v10201_v63, %v10201_v63 }
  0x66   :  { %6384 = vmatpush1.bf16.msra.mxu0 %v8540_v31  ;;  %6712 = vmatpush1.bf16.msra.mxu1 %v8542_v32  ;;  %v8598_v31 = vcombine.low %v273_v18, %v277_v20  ;;  %v8605_v32 = vcombine.high %v280_v26, %v284_v27 }
  0x67   :  { %6385 = vmatprep.subr.bf16.mxu0 %v8549_v34  ;;  %6713 = vmatprep.subr.bf16.mxu1 %v8551_v38  ;;  %v288_v34 = vld [vmem:[%s13247_s1 + $0x840] sm:$0xff]  ;;  %v293_v38 = vld [vmem:[%s13247_s1 + $0x868] sm:$0xff] }
  0x6a   :  { %6386 = vmatpush1.bf16.msra.mxu0 %v8548_v40  ;;  %6714 = vmatpush1.bf16.msra.mxu1 %v8550_v41  ;;  %v10219_v40 = vcombine.high %v10002_v23, %v10002_v23  ;;  %v8604_v41 = vcombine.low %v280_v26, %v284_v27 }
  0x6b   :  { %6387 = vmatprep.subr.bf16.mxu0 %v8557_v42  ;;  %6715 = vmatprep.subr.bf16.mxu1 %v8559_v47 }
  0x6e   :  { %6388 = vmatpush1.bf16.msra.mxu0 %v8556_v49  ;;  %6716 = vmatpush1.bf16.msra.mxu1 %v8558_v50 }
  0x6f   :  { %6389 = vmatprep.subr.bf16.mxu0 %v8565_v51  ;;  %6717 = vmatprep.subr.bf16.mxu1 %v8567_v56 }
  0x72   :  { %6390 = vmatpush1.bf16.msra.mxu0 %v8564_v58  ;;  %6718 = vmatpush1.bf16.msra.mxu1 %v8566_v60 }
  0x73   :  { %6391 = vmatprep.subr.bf16.mxu0 %v8573_v61  ;;  %6719 = vmatprep.subr.bf16.mxu1 %v8575_v2 }
  0x76   :  { %6392 = vmatpush1.bf16.msra.mxu0 %v8572_v4  ;;  %6720 = vmatpush1.bf16.msra.mxu1 %v8574_v5 }
  0x77   :  { %6393 = vmatprep.subr.bf16.mxu0 %v8581_v6  ;;  %6721 = vmatprep.subr.bf16.mxu1 %v8583_v11 }
  0x7a   :  { %6394 = vmatpush1.bf16.msra.mxu0 %v8580_v13  ;;  %6722 = vmatpush1.bf16.msra.mxu1 %v8582_v14 }
  0x7b   :  { %6395 = vmatprep.subr.bf16.mxu0 %v8589_v15  ;;  %6723 = vmatprep.subr.bf16.mxu1 %v8591_v19 }
  0x7e   :  { %6396 = vmatpush1.bf16.msra.mxu0 %v8588_v22  ;;  %6724 = vmatpush1.bf16.msra.mxu1 %v8590_v24 }
  0x7f   :  { %6397 = vmatprep.subr.bf16.mxu0 %v8597_v25  ;;  %6725 = vmatprep.subr.bf16.mxu1 %v8599_v59 }
  0x82   :  { %6398 = vmatpush1.bf16.msra.mxu0 %v8596_v30 }
  0x83   :  { %10 = vsyncpa [#allocation3], 0  ;;  %6726 = vmatpush1.bf16.msra.mxu1 %v8598_v31  ;;  %6408 = vmatprep.subr.bf16.mxu0 %v8605_v32  ;;  %v8606_v42 = vcombine.low %v281_v28, %v285_v29  ;;  %v8613_v44 = vcombine.high %v288_v34, %v292_v35  ;;  %v8615_v45 = vcombine.high %v289_v36, %v293_v38  ;;  %v296_v46 = vld [vmem:[%s13247_s1 + $0x880] sm:$0xff]  ;;  %v297_v49 = vld [vmem:[%s13247_s1 + $0x888] sm:$0xff] }
  0x84   :  { %6736 = vmatprep.subr.bf16.mxu1 %v8607_v37  ;;  %v300_v47 = vld [vmem:[%s13247_s1 + $0x8a0] sm:$0xff]  ;;  %v10228_v48 = vrot.slane %v1108_v39, %v9850_v53  ;;  %v301_v50 = vld [vmem:[%s13247_s1 + $0x8a8] sm:$0xff]  ;;  %v8612_v51 = vcombine.low %v288_v34, %v292_v35  ;;  %v8614_v52 = vcombine.low %v289_v36, %v293_v38 }
  0x85   :  { %6400 = vmatmul.mubr.bf16.vlgmr.msra.gmra.mrb[0].mxu0 %v10219_v40  ;;  %v8621_v54 = vcombine.high %v296_v46, %v300_v47  ;;  %v8623_v55 = vcombine.high %v297_v49, %v301_v50  ;;  %v304_v56 = vld [vmem:[%s13247_s1 + $0x8c0] sm:$0xff]  ;;  %v305_v58 = vld [vmem:[%s13247_s1 + $0x8c8] sm:$0xff]  ;;  %v8620_v61 = vcombine.low %v296_v46, %v300_v47  ;;  %v8622_v62 = vcombine.low %v297_v49, %v301_v50 }
  0x86   :  { %6409 = vmatpush1.bf16.msra.mxu0 %v8604_v41  ;;  %6728 = vmatmul.mubr.bf16.vlgmr.msra.gmra.mrb[0].mxu1 %v10219_v40  ;;  %v308_v57 = vld [vmem:[%s13247_s1 + $0x8e0] sm:$0xff]  ;;  %v309_v60 = vld [vmem:[%s13247_s1 + $0x8e8] sm:$0xff] }
  0x87   :  { %6737 = vmatpush1.bf16.msra.mxu1 %v8606_v42  ;;  %6410 = vmatprep.subr.bf16.mxu0 %v8613_v44  ;;  %v8629_v0 = vcombine.high %v304_v56, %v308_v57  ;;  %v8631_v1 = vcombine.high %v305_v58, %v309_v60  ;;  %v312_v2 = vld [vmem:[%s13247_s1 + $0x900] sm:$0xff]  ;;  %v313_v4 = vld [vmem:[%s13247_s1 + $0x908] sm:$0xff]  ;;  %v8628_v6 = vcombine.low %v304_v56, %v308_v57 }
  0x88   :  { %6738 = vmatprep.subr.bf16.mxu1 %v8615_v45  ;;  %6440 = vmatprep.mubr.bf16.mxu0 %v10228_v48  ;;  %v316_v3 = vld [vmem:[%s13247_s1 + $0x920] sm:$0xff]  ;;  %v317_v5 = vld [vmem:[%s13247_s1 + $0x928] sm:$0xff]  ;;  %v8630_v7 = vcombine.low %v305_v58, %v309_v60 }
  0x89   :  { %6768 = vmatprep.mubr.bf16.mxu1 %v10228_v48  ;;  %v8637_v8 = vcombine.high %v312_v2, %v316_v3  ;;  %v8639_v10 = vcombine.high %v313_v4, %v317_v5  ;;  %v320_v11 = vld [vmem:[%s13247_s1 + $0x940] sm:$0xff]  ;;  %v321_v13 = vld [vmem:[%s13247_s1 + $0x948] sm:$0xff]  ;;  %v8636_v15 = vcombine.low %v312_v2, %v316_v3  ;;  %v8638_v16 = vcombine.low %v313_v4, %v317_v5 }
  0x8a   :  { %6411 = vmatpush1.bf16.msra.mxu0 %v8612_v51  ;;  %v324_v12 = vld [vmem:[%s13247_s1 + $0x960] sm:$0xff]  ;;  %v325_v14 = vld [vmem:[%s13247_s1 + $0x968] sm:$0xff] }
  0x8b   :  { %6739 = vmatpush1.bf16.msra.mxu1 %v8614_v52  ;;  %6412 = vmatprep.subr.bf16.mxu0 %v8621_v54  ;;  %v8645_v17 = vcombine.high %v320_v11, %v324_v12  ;;  %v8647_v18 = vcombine.high %v321_v13, %v325_v14  ;;  %v328_v19 = vld [vmem:[%s13247_s1 + $0x980] sm:$0xff]  ;;  %v329_v21 = vld [vmem:[%s13247_s1 + $0x988] sm:$0xff]  ;;  %v8644_v24 = vcombine.low %v320_v11, %v324_v12 }
  0x8c   :  { %6740 = vmatprep.subr.bf16.mxu1 %v8623_v55  ;;  %v332_v20 = vld [vmem:[%s13247_s1 + $0x9a0] sm:$0xff]  ;;  %v333_v22 = vld [vmem:[%s13247_s1 + $0x9a8] sm:$0xff]  ;;  %v8646_v25 = vcombine.low %v321_v13, %v325_v14 }
  0x8d   :  { %v8653_v26 = vcombine.high %v328_v19, %v332_v20  ;;  %v8655_v27 = vcombine.high %v329_v21, %v333_v22  ;;  %v336_v28 = vld [vmem:[%s13247_s1 + $0x9c0] sm:$0xff]  ;;  %v337_v29 = vld [vmem:[%s13247_s1 + $0x9c8] sm:$0xff]  ;;  %v8652_v31 = vcombine.low %v328_v19, %v332_v20  ;;  %v8654_v32 = vcombine.low %v329_v21, %v333_v22 }
  0x8e   :  { %6413 = vmatpush1.bf16.msra.mxu0 %v8620_v61  ;;  %v340_v59 = vld [vmem:[%s13247_s1 + $0x9e0] sm:$0xff]  ;;  %v341_v30 = vld [vmem:[%s13247_s1 + $0x9e8] sm:$0xff] }
  0x8f   :  { %6741 = vmatpush1.bf16.msra.mxu1 %v8622_v62  ;;  %6414 = vmatprep.subr.bf16.mxu0 %v8629_v0  ;;  %v8661_v34 = vcombine.high %v336_v28, %v340_v59  ;;  %v8663_v35 = vcombine.high %v337_v29, %v341_v30  ;;  %v344_v36 = vld [vmem:[%s13247_s1 + $0xa00] sm:$0xff]  ;;  %v345_v38 = vld [vmem:[%s13247_s1 + $0xa08] sm:$0xff]  ;;  %v8660_v41 = vcombine.low %v336_v28, %v340_v59 }
  0x90   :  { %6742 = vmatprep.subr.bf16.mxu1 %v8631_v1  ;;  %v348_v37 = vld [vmem:[%s13247_s1 + $0xa20] sm:$0xff]  ;;  %v349_v39 = vld [vmem:[%s13247_s1 + $0xa28] sm:$0xff]  ;;  %v8662_v42 = vcombine.low %v337_v29, %v341_v30 }
  0x91   :  { %v8669_v44 = vcombine.high %v344_v36, %v348_v37  ;;  %v8671_v45 = vcombine.high %v345_v38, %v349_v39  ;;  %v352_v46 = vld [vmem:[%s13247_s1 + $0xa40] sm:$0xff]  ;;  %v353_v49 = vld [vmem:[%s13247_s1 + $0xa48] sm:$0xff]  ;;  %v8668_v51 = vcombine.low %v344_v36, %v348_v37  ;;  %v8670_v52 = vcombine.low %v345_v38, %v349_v39 }
  0x92   :  { %6415 = vmatpush1.bf16.msra.mxu0 %v8628_v6  ;;  %v356_v47 = vld [vmem:[%s13247_s1 + $0xa60] sm:$0xff]  ;;  %v357_v50 = vld [vmem:[%s13247_s1 + $0xa68] sm:$0xff] }
  0x93   :  { %6743 = vmatpush1.bf16.msra.mxu1 %v8630_v7  ;;  %6416 = vmatprep.subr.bf16.mxu0 %v8637_v8  ;;  %v8677_v54 = vcombine.high %v352_v46, %v356_v47  ;;  %v8679_v55 = vcombine.high %v353_v49, %v357_v50  ;;  %v360_v56 = vld [vmem:[%s13247_s1 + $0xa80] sm:$0xff]  ;;  %v361_v58 = vld [vmem:[%s13247_s1 + $0xa88] sm:$0xff]  ;;  %v8676_v61 = vcombine.low %v352_v46, %v356_v47 }
  0x94   :  { %6744 = vmatprep.subr.bf16.mxu1 %v8639_v10  ;;  %v364_v57 = vld [vmem:[%s13247_s1 + $0xaa0] sm:$0xff]  ;;  %v365_v60 = vld [vmem:[%s13247_s1 + $0xaa8] sm:$0xff]  ;;  %v8678_v62 = vcombine.low %v353_v49, %v357_v50 }
  0x95   :  { %v8685_v0 = vcombine.high %v360_v56, %v364_v57  ;;  %v8687_v1 = vcombine.high %v361_v58, %v365_v60  ;;  %v368_v2 = vld [vmem:[%s13247_s1 + $0xac0] sm:$0xff]  ;;  %v369_v4 = vld [vmem:[%s13247_s1 + $0xac8] sm:$0xff]  ;;  %v8684_v6 = vcombine.low %v360_v56, %v364_v57  ;;  %v8686_v7 = vcombine.low %v361_v58, %v365_v60 }
  0x96   :  { %6417 = vmatpush1.bf16.msra.mxu0 %v8636_v15  ;;  %v372_v3 = vld [vmem:[%s13247_s1 + $0xae0] sm:$0xff]  ;;  %v373_v5 = vld [vmem:[%s13247_s1 + $0xae8] sm:$0xff]  ;;  %v10416_v58 = vrot.slane %v10201_v63, %v9850_v53 }
  0x97   :  { %6745 = vmatpush1.bf16.msra.mxu1 %v8638_v16  ;;  %6418 = vmatprep.subr.bf16.mxu0 %v8645_v17  ;;  %v8693_v8 = vcombine.high %v368_v2, %v372_v3  ;;  %v8695_v10 = vcombine.high %v369_v4, %v373_v5  ;;  %v376_v11 = vld [vmem:[%s13247_s1 + $0xb00] sm:$0xff]  ;;  %v377_v13 = vld [vmem:[%s13247_s1 + $0xb08] sm:$0xff]  ;;  %v8692_v15 = vcombine.low %v368_v2, %v372_v3 }
  0x98   :  { %6746 = vmatprep.subr.bf16.mxu1 %v8647_v18  ;;  %v380_v12 = vld [vmem:[%s13247_s1 + $0xb20] sm:$0xff]  ;;  %v381_v14 = vld [vmem:[%s13247_s1 + $0xb28] sm:$0xff]  ;;  %v8694_v16 = vcombine.low %v369_v4, %v373_v5  ;;  %v10432_v4 = vcombine.high %v10228_v48, %v10228_v48 }
  0x99   :  { %v8701_v17 = vcombine.high %v376_v11, %v380_v12  ;;  %v8703_v18 = vcombine.high %v377_v13, %v381_v14  ;;  %v384_v19 = vld [vmem:[%s13247_s1 + $0xb40] sm:$0xff]  ;;  %v385_v21 = vld [vmem:[%s13247_s1 + $0xb48] sm:$0xff] }
  0x9a   :  { %6419 = vmatpush1.bf16.msra.mxu0 %v8644_v24  ;;  %v388_v20 = vld [vmem:[%s13247_s1 + $0xb60] sm:$0xff]  ;;  %v389_v22 = vld [vmem:[%s13247_s1 + $0xb68] sm:$0xff]  ;;  %v8700_v24 = vcombine.low %v376_v11, %v380_v12 }
  0x9b   :  { %6747 = vmatpush1.bf16.msra.mxu1 %v8646_v25  ;;  %6420 = vmatprep.subr.bf16.mxu0 %v8653_v26  ;;  %v8702_v25 = vcombine.low %v377_v13, %v381_v14  ;;  %v8709_v26 = vcombine.high %v384_v19, %v388_v20  ;;  %v392_v28 = vld [vmem:[%s13247_s1 + $0xb80] sm:$0xff]  ;;  %v393_v29 = vld [vmem:[%s13247_s1 + $0xb88] sm:$0xff] }
  0x9c   :  { %6748 = vmatprep.subr.bf16.mxu1 %v8655_v27  ;;  %v8711_v27 = vcombine.high %v385_v21, %v389_v22  ;;  %v396_v59 = vld [vmem:[%s13247_s1 + $0xba0] sm:$0xff]  ;;  %v397_v30 = vld [vmem:[%s13247_s1 + $0xba8] sm:$0xff] }
  0x9d   :  { %v400_v36 = vld [vmem:[%s13247_s1 + $0xbc0] sm:$0xff]  ;;  %v401_v38 = vld [vmem:[%s13247_s1 + $0xbc8] sm:$0xff] }
  0x9e   :  { %6421 = vmatpush1.bf16.msra.mxu0 %v8652_v31  ;;  %v8708_v31 = vcombine.low %v384_v19, %v388_v20  ;;  %v404_v37 = vld [vmem:[%s13247_s1 + $0xbe0] sm:$0xff]  ;;  %v405_v39 = vld [vmem:[%s13247_s1 + $0xbe8] sm:$0xff] }
  0x9f   :  { %6749 = vmatpush1.bf16.msra.mxu1 %v8654_v32  ;;  %6422 = vmatprep.subr.bf16.mxu0 %v8661_v34  ;;  %v8710_v32 = vcombine.low %v385_v21, %v389_v22  ;;  %v8717_v34 = vcombine.high %v392_v28, %v396_v59  ;;  %v408_v46 = vld [vmem:[%s13247_s1 + $0xc00] sm:$0xff]  ;;  %v409_v49 = vld [vmem:[%s13247_s1 + $0xc08] sm:$0xff] }
  0xa0   :  { %6750 = vmatprep.subr.bf16.mxu1 %v8663_v35  ;;  %v8719_v35 = vcombine.high %v393_v29, %v397_v30  ;;  %v412_v47 = vld [vmem:[%s13247_s1 + $0xc20] sm:$0xff]  ;;  %v413_v50 = vld [vmem:[%s13247_s1 + $0xc28] sm:$0xff] }
  0xa1   :  { %v416_v56 = vld [vmem:[%s13247_s1 + $0xc40] sm:$0xff]  ;;  %v417_v60 = vld [vmem:[%s13247_s1 + $0xc48] sm:$0xff] }
  0xa2   :  { %6423 = vmatpush1.bf16.msra.mxu0 %v8660_v41  ;;  %v8716_v41 = vcombine.low %v392_v28, %v396_v59  ;;  %v420_v57 = vld [vmem:[%s13247_s1 + $0xc60] sm:$0xff]  ;;  %v425_v5 = vld [vmem:[%s13247_s1 + $0xc88] sm:$0xff] }
  0xa3   :  { %6751 = vmatpush1.bf16.msra.mxu1 %v8662_v42  ;;  %6424 = vmatprep.subr.bf16.mxu0 %v8669_v44  ;;  %v8718_v42 = vcombine.low %v393_v29, %v397_v30  ;;  %v8725_v44 = vcombine.high %v400_v36, %v404_v37  ;;  %v424_v63 = vld [vmem:[%s13247_s1 + $0xc80] sm:$0xff]  ;;  %v433_v14 = vld [vmem:[%s13247_s1 + $0xcc8] sm:$0xff] }
  0xa4   :  { %6752 = vmatprep.subr.bf16.mxu1 %v8671_v45  ;;  %v8727_v45 = vcombine.high %v401_v38, %v405_v39  ;;  %v428_v3 = vld [vmem:[%s13247_s1 + $0xca0] sm:$0xff]  ;;  %v441_v22 = vld [vmem:[%s13247_s1 + $0xd08] sm:$0xff] }
  0xa5   :  { %v432_v12 = vld [vmem:[%s13247_s1 + $0xcc0] sm:$0xff]  ;;  %v449_v30 = vld [vmem:[%s13247_s1 + $0xd48] sm:$0xff] }
  0xa6   :  { %6425 = vmatpush1.bf16.msra.mxu0 %v8668_v51  ;;  %v8724_v51 = vcombine.low %v400_v36, %v404_v37  ;;  %v436_v13 = vld [vmem:[%s13247_s1 + $0xce0] sm:$0xff] }
  0xa7   :  { %6753 = vmatpush1.bf16.msra.mxu1 %v8670_v52  ;;  %6426 = vmatprep.subr.bf16.mxu0 %v8677_v54  ;;  %v8726_v52 = vcombine.low %v401_v38, %v405_v39  ;;  %v8733_v54 = vcombine.high %v408_v46, %v412_v47  ;;  %v440_v20 = vld [vmem:[%s13247_s1 + $0xd00] sm:$0xff]  ;;  %v457_v39 = vld [vmem:[%s13247_s1 + $0xd88] sm:$0xff] }
  0xa8   :  { %6754 = vmatprep.subr.bf16.mxu1 %v8679_v55  ;;  %v8735_v55 = vcombine.high %v409_v49, %v413_v50  ;;  %v444_v21 = vld [vmem:[%s13247_s1 + $0xd20] sm:$0xff] }
  0xa9   :  { %v448_v59 = vld [vmem:[%s13247_s1 + $0xd40] sm:$0xff] }
  0xaa   :  { %6427 = vmatpush1.bf16.msra.mxu0 %v8676_v61  ;;  %v421_v61 = vld [vmem:[%s13247_s1 + $0xc68] sm:$0xff]  ;;  %v452_v29 = vld [vmem:[%s13247_s1 + $0xd60] sm:$0xff] }
  0xab   :  { %6755 = vmatpush1.bf16.msra.mxu1 %v8678_v62  ;;  %6428 = vmatprep.subr.bf16.mxu0 %v8685_v0  ;;  %v8732_v62 = vcombine.low %v408_v46, %v412_v47  ;;  %v8734_v0 = vcombine.low %v409_v49, %v413_v50  ;;  %v8743_v2 = vcombine.high %v417_v60, %v421_v61  ;;  %v456_v37 = vld [vmem:[%s13247_s1 + $0xd80] sm:$0xff]  ;;  %v465_v50 = vld [vmem:[%s13247_s1 + $0xdc8] sm:$0xff] }
  0xac   :  { %6756 = vmatprep.subr.bf16.mxu1 %v8687_v1  ;;  %v8741_v1 = vcombine.high %v416_v56, %v420_v57  ;;  %v460_v38 = vld [vmem:[%s13247_s1 + $0xda0] sm:$0xff] }
  0xad   :  { %v464_v47 = vld [vmem:[%s13247_s1 + $0xdc0] sm:$0xff] }
  0xae   :  { %6429 = vmatpush1.bf16.msra.mxu0 %v8684_v6  ;;  %v429_v6 = vld [vmem:[%s13247_s1 + $0xca8] sm:$0xff]  ;;  %v468_v49 = vld [vmem:[%s13247_s1 + $0xde0] sm:$0xff] }
  0xaf   :  { %6757 = vmatpush1.bf16.msra.mxu1 %v8686_v7  ;;  %6430 = vmatprep.subr.bf16.mxu0 %v8693_v8  ;;  %v8740_v7 = vcombine.low %v416_v56, %v420_v57  ;;  %v8742_v8 = vcombine.low %v417_v60, %v421_v61  ;;  %v8751_v11 = vcombine.high %v425_v5, %v429_v6  ;;  %v472_v57 = vld [vmem:[%s13247_s1 + $0xe00] sm:$0xff]  ;;  %v473_v61 = vld [vmem:[%s13247_s1 + $0xe08] sm:$0xff] }
  0xb0   :  { %6758 = vmatprep.subr.bf16.mxu1 %v8695_v10  ;;  %v8749_v10 = vcombine.high %v424_v63, %v428_v3  ;;  %v476_v60 = vld [vmem:[%s13247_s1 + $0xe20] sm:$0xff] }
  0xb2   :  { %6431 = vmatpush1.bf16.msra.mxu0 %v8692_v15  ;;  %v437_v15 = vld [vmem:[%s13247_s1 + $0xce8] sm:$0xff] }
  0xb3   :  { %6759 = vmatpush1.bf16.msra.mxu1 %v8694_v16  ;;  %6432 = vmatprep.subr.bf16.mxu0 %v8701_v17  ;;  %v8748_v16 = vcombine.low %v424_v63, %v428_v3  ;;  %v8750_v17 = vcombine.low %v425_v5, %v429_v6  ;;  %v8759_v19 = vcombine.high %v433_v14, %v437_v15  ;;  %v480_v3 = vld [vmem:[%s13247_s1 + $0xe40] sm:$0xff]  ;;  %v481_v6 = vld [vmem:[%s13247_s1 + $0xe48] sm:$0xff] }
  0xb4   :  { %6760 = vmatprep.subr.bf16.mxu1 %v8703_v18  ;;  %v8757_v18 = vcombine.high %v432_v12, %v436_v13  ;;  %v484_v5 = vld [vmem:[%s13247_s1 + $0xe60] sm:$0xff] }
  0xb6   :  { %6433 = vmatpush1.bf16.msra.mxu0 %v8700_v24  ;;  %v445_v24 = vld [vmem:[%s13247_s1 + $0xd28] sm:$0xff] }
  0xb7   :  { %6761 = vmatpush1.bf16.msra.mxu1 %v8702_v25  ;;  %6434 = vmatprep.subr.bf16.mxu0 %v8709_v26  ;;  %v8756_v25 = vcombine.low %v432_v12, %v436_v13  ;;  %v8758_v26 = vcombine.low %v433_v14, %v437_v15  ;;  %v8767_v28 = vcombine.high %v441_v22, %v445_v24  ;;  %v488_v13 = vld [vmem:[%s13247_s1 + $0xe80] sm:$0xff]  ;;  %v489_v15 = vld [vmem:[%s13247_s1 + $0xe88] sm:$0xff] }
  0xb8   :  { %6762 = vmatprep.subr.bf16.mxu1 %v8711_v27  ;;  %v8765_v27 = vcombine.high %v440_v20, %v444_v21  ;;  %v492_v14 = vld [vmem:[%s13247_s1 + $0xea0] sm:$0xff] }
  0xba   :  { %6435 = vmatpush1.bf16.msra.mxu0 %v8708_v31  ;;  %v453_v31 = vld [vmem:[%s13247_s1 + $0xd68] sm:$0xff] }
  0xbb   :  { %6763 = vmatpush1.bf16.msra.mxu1 %v8710_v32  ;;  %6436 = vmatprep.subr.bf16.mxu0 %v8717_v34  ;;  %v8764_v32 = vcombine.low %v440_v20, %v444_v21  ;;  %v8766_v34 = vcombine.low %v441_v22, %v445_v24  ;;  %v8775_v36 = vcombine.high %v449_v30, %v453_v31  ;;  %v496_v21 = vld [vmem:[%s13247_s1 + $0xec0] sm:$0xff]  ;;  %v497_v24 = vld [vmem:[%s13247_s1 + $0xec8] sm:$0xff] }
  0xbc   :  { %6764 = vmatprep.subr.bf16.mxu1 %v8719_v35  ;;  %v8773_v35 = vcombine.high %v448_v59, %v452_v29  ;;  %v500_v22 = vld [vmem:[%s13247_s1 + $0xee0] sm:$0xff] }
  0xbe   :  { %6437 = vmatpush1.bf16.msra.mxu0 %v8716_v41  ;;  %v461_v41 = vld [vmem:[%s13247_s1 + $0xda8] sm:$0xff] }
  0xbf   :  { %6765 = vmatpush1.bf16.msra.mxu1 %v8718_v42  ;;  %6438 = vmatprep.subr.bf16.mxu0 %v8725_v44  ;;  %v8772_v42 = vcombine.low %v448_v59, %v452_v29  ;;  %v8774_v44 = vcombine.low %v449_v30, %v453_v31  ;;  %v8783_v46 = vcombine.high %v457_v39, %v461_v41  ;;  %v504_v29 = vld [vmem:[%s13247_s1 + $0xf00] sm:$0xff]  ;;  %v505_v31 = vld [vmem:[%s13247_s1 + $0xf08] sm:$0xff] }
  0xc0   :  { %6766 = vmatprep.subr.bf16.mxu1 %v8727_v45  ;;  %v8781_v45 = vcombine.high %v456_v37, %v460_v38  ;;  %v508_v30 = vld [vmem:[%s13247_s1 + $0xf20] sm:$0xff] }
  0xc2   :  { %6439 = vmatpush1.bf16.msra.mxu0 %v8724_v51  ;;  %v469_v51 = vld [vmem:[%s13247_s1 + $0xde8] sm:$0xff] }
  0xc3   :  { %6767 = vmatpush1.bf16.msra.mxu1 %v8726_v52  ;;  %6449 = vmatprep.subr.bf16.mxu0 %v8733_v54  ;;  %v8780_v52 = vcombine.low %v456_v37, %v460_v38  ;;  %v8782_v54 = vcombine.low %v457_v39, %v461_v41  ;;  %v8791_v56 = vcombine.high %v465_v50, %v469_v51  ;;  %v512_v38 = vld [vmem:[%s13247_s1 + $0xf40] sm:$0xff]  ;;  %v513_v41 = vld [vmem:[%s13247_s1 + $0xf48] sm:$0xff] }
  0xc4   :  { %6777 = vmatprep.subr.bf16.mxu1 %v8735_v55  ;;  %v8789_v55 = vcombine.high %v464_v47, %v468_v49  ;;  %v516_v39 = vld [vmem:[%s13247_s1 + $0xf60] sm:$0xff] }
  0xc5   :  { %6441 = vmatmul.mubr.bf16.vlgmr.msra.gmra.mrb[0].mxu0 %v10416_v58 }
  0xc6   :  { %6450 = vmatpush1.bf16.msra.mxu0 %v8732_v62  ;;  %6769 = vmatmul.mubr.bf16.vlgmr.msra.gmra.mrb[0].mxu1 %v10416_v58  ;;  %v477_v62 = vld [vmem:[%s13247_s1 + $0xe28] sm:$0xff] }
  0xc7   :  { %6778 = vmatpush1.bf16.msra.mxu1 %v8734_v0  ;;  %6451 = vmatprep.subr.bf16.mxu0 %v8741_v1  ;;  %v8788_v0 = vcombine.low %v464_v47, %v468_v49  ;;  %v8790_v1 = vcombine.low %v465_v50, %v469_v51  ;;  %v8799_v63 = vcombine.high %v473_v61, %v477_v62  ;;  %v520_v49 = vld [vmem:[%s13247_s1 + $0xf80] sm:$0xff]  ;;  %v521_v51 = vld [vmem:[%s13247_s1 + $0xf88] sm:$0xff] }
  0xc8   :  { %6779 = vmatprep.subr.bf16.mxu1 %v8743_v2  ;;  %6481 = vmatprep.mubr.bf16.mxu0 %v10432_v4  ;;  %v8797_v2 = vcombine.high %v472_v57, %v476_v60  ;;  %v524_v50 = vld [vmem:[%s13247_s1 + $0xfa0] sm:$0xff] }
  0xc9   :  { %6809 = vmatprep.mubr.bf16.mxu1 %v10432_v4 }
  0xca   :  { %6452 = vmatpush1.bf16.msra.mxu0 %v8740_v7  ;;  %v485_v7 = vld [vmem:[%s13247_s1 + $0xe68] sm:$0xff] }
  0xcb   :  { %6780 = vmatpush1.bf16.msra.mxu1 %v8742_v8  ;;  %6453 = vmatprep.subr.bf16.mxu0 %v8749_v10  ;;  %v8796_v8 = vcombine.low %v472_v57, %v476_v60  ;;  %v8798_v10 = vcombine.low %v473_v61, %v477_v62  ;;  %v8807_v12 = vcombine.high %v481_v6, %v485_v7  ;;  %v528_v60 = vld [vmem:[%s13247_s1 + $0xfc0] sm:$0xff]  ;;  %v529_v62 = vld [vmem:[%s13247_s1 + $0xfc8] sm:$0xff] }
  0xcc   :  { %6781 = vmatprep.subr.bf16.mxu1 %v8751_v11  ;;  %v8805_v11 = vcombine.high %v480_v3, %v484_v5  ;;  %v532_v61 = vld [vmem:[%s13247_s1 + $0xfe0] sm:$0xff] }
  0xce   :  { %6454 = vmatpush1.bf16.msra.mxu0 %v8748_v16  ;;  %v493_v16 = vld [vmem:[%s13247_s1 + $0xea8] sm:$0xff] }
  0xcf   :  { %6782 = vmatpush1.bf16.msra.mxu1 %v8750_v17  ;;  %6455 = vmatprep.subr.bf16.mxu0 %v8757_v18  ;;  %v8804_v17 = vcombine.low %v480_v3, %v484_v5  ;;  %v8806_v18 = vcombine.low %v481_v6, %v485_v7  ;;  %v8815_v20 = vcombine.high %v489_v15, %v493_v16  ;;  %v536_v6 = vld [vmem:[%s13247_s1 + $0x1000] sm:$0xff] }
  0xd0   :  { %6783 = vmatprep.subr.bf16.mxu1 %v8759_v19  ;;  %v8813_v19 = vcombine.high %v488_v13, %v492_v14  ;;  %v8853_v3 = vcombine.high %v528_v60, %v532_v61  ;;  %v540_v7 = vld [vmem:[%s13247_s1 + $0x1020] sm:$0xff] }
  0xd2   :  { %6456 = vmatpush1.bf16.msra.mxu0 %v8756_v25  ;;  %v501_v25 = vld [vmem:[%s13247_s1 + $0xee8] sm:$0xff] }
  0xd3   :  { %6784 = vmatpush1.bf16.msra.mxu1 %v8758_v26  ;;  %6457 = vmatprep.subr.bf16.mxu0 %v8765_v27  ;;  %v8812_v26 = vcombine.low %v488_v13, %v492_v14  ;;  %v8814_v27 = vcombine.low %v489_v15, %v493_v16  ;;  %v8823_v59 = vcombine.high %v497_v24, %v501_v25  ;;  %v544_v16 = vld [vmem:[%s13247_s1 + $0x1040] sm:$0xff] }
  0xd4   :  { %6785 = vmatprep.subr.bf16.mxu1 %v8767_v28  ;;  %v8821_v28 = vcombine.high %v496_v21, %v500_v22  ;;  %v8861_v14 = vcombine.high %v536_v6, %v540_v7 }
  0xd6   :  { %6458 = vmatpush1.bf16.msra.mxu0 %v8764_v32  ;;  %v509_v32 = vld [vmem:[%s13247_s1 + $0xf28] sm:$0xff] }
  0xd7   :  { %6786 = vmatpush1.bf16.msra.mxu1 %v8766_v34  ;;  %6459 = vmatprep.subr.bf16.mxu0 %v8773_v35  ;;  %v8820_v34 = vcombine.low %v496_v21, %v500_v22  ;;  %v8822_v35 = vcombine.low %v497_v24, %v501_v25  ;;  %v8831_v37 = vcombine.high %v505_v31, %v509_v32  ;;  %v549_v21 = vld [vmem:[%s13247_s1 + $0x1068] sm:$0xff] }
  0xd8   :  { %6787 = vmatprep.subr.bf16.mxu1 %v8775_v36  ;;  %v8829_v36 = vcombine.high %v504_v29, %v508_v30  ;;  %v8860_v22 = vcombine.low %v536_v6, %v540_v7  ;;  %v585_v6 = vld [vmem:[%s13247_s1 + $0x1188] sm:$0xff] }
  0xd9   :  { %v589_v7 = vld [vmem:[%s13247_s1 + $0x11a8] sm:$0xff] }
  0xda   :  { %6460 = vmatpush1.bf16.msra.mxu0 %v8772_v42  ;;  %v517_v42 = vld [vmem:[%s13247_s1 + $0xf68] sm:$0xff] }
  0xdb   :  { %6788 = vmatpush1.bf16.msra.mxu1 %v8774_v44  ;;  %6461 = vmatprep.subr.bf16.mxu0 %v8781_v45  ;;  %v8828_v44 = vcombine.low %v504_v29, %v508_v30  ;;  %v8830_v45 = vcombine.low %v505_v31, %v509_v32  ;;  %v8839_v47 = vcombine.high %v513_v41, %v517_v42  ;;  %v553_v29 = vld [vmem:[%s13247_s1 + $0x1088] sm:$0xff] }
  0xdc   :  { %6789 = vmatprep.subr.bf16.mxu1 %v8783_v46  ;;  %v8837_v46 = vcombine.high %v512_v38, %v516_v39  ;;  %v557_v30 = vld [vmem:[%s13247_s1 + $0x10a8] sm:$0xff] }
  0xde   :  { %6462 = vmatpush1.bf16.msra.mxu0 %v8780_v52  ;;  %v525_v52 = vld [vmem:[%s13247_s1 + $0xfa8] sm:$0xff] }
  0xdf   :  { %6790 = vmatpush1.bf16.msra.mxu1 %v8782_v54  ;;  %6463 = vmatprep.subr.bf16.mxu0 %v8789_v55  ;;  %v8836_v54 = vcombine.low %v512_v38, %v516_v39  ;;  %v8838_v55 = vcombine.low %v513_v41, %v517_v42  ;;  %v8847_v57 = vcombine.high %v521_v51, %v525_v52  ;;  %v561_v38 = vld [vmem:[%s13247_s1 + $0x10c8] sm:$0xff] }
  0xe0   :  { %6791 = vmatprep.subr.bf16.mxu1 %v8791_v56  ;;  %v8845_v56 = vcombine.high %v520_v49, %v524_v50  ;;  %v565_v39 = vld [vmem:[%s13247_s1 + $0x10e8] sm:$0xff]  ;;  %v8878_v42 = vcombine.low %v553_v29, %v557_v30 }
  0xe2   :  { %6464 = vmatpush1.bf16.msra.mxu0 %v8788_v0  ;;  %v533_v0 = vld [vmem:[%s13247_s1 + $0xfe8] sm:$0xff] }
  0xe3   :  { %6792 = vmatpush1.bf16.msra.mxu1 %v8790_v1  ;;  %6465 = vmatprep.subr.bf16.mxu0 %v8797_v2  ;;  %v10603_v1 = vld [vmem:[%s13246_s0 + $0x8] sm:$0xff]  ;;  %v8844_v2 = vcombine.low %v520_v49, %v524_v50  ;;  %v8855_v5 = vcombine.high %v529_v62, %v533_v0  ;;  %v8854_v13 = vcombine.low %v529_v62, %v533_v0 }
  0xe4   :  { %6793 = vmatprep.subr.bf16.mxu1 %v8799_v63  ;;  %v8846_v63 = vcombine.low %v521_v51, %v525_v52  ;;  %v569_v49 = vld [vmem:[%s13247_s1 + $0x1108] sm:$0xff]  ;;  %v8886_v52 = vcombine.low %v561_v38, %v565_v39 }
  0xe5   :  { %v573_v50 = vld [vmem:[%s13247_s1 + $0x1128] sm:$0xff] }
  0xe6   :  { %6466 = vmatpush1.bf16.msra.mxu0 %v8796_v8  ;;  %v10613_v8 = vrot.slane %v10603_v1, %v9850_v53  ;;  %v8894_v0 = vcombine.low %v569_v49, %v573_v50 }
  0xe7   :  { %6794 = vmatpush1.bf16.msra.mxu1 %v8798_v10  ;;  %6467 = vmatprep.subr.bf16.mxu0 %v8805_v11  ;;  %v537_v10 = vld [vmem:[%s13247_s1 + $0x1008] sm:$0xff] }
  0xe8   :  { %6795 = vmatprep.subr.bf16.mxu1 %v8807_v12  ;;  %v541_v11 = vld [vmem:[%s13247_s1 + $0x1028] sm:$0xff]  ;;  %v8852_v12 = vcombine.low %v528_v60, %v532_v61 }
  0xe9   :  { %v8863_v15 = vcombine.high %v537_v10, %v541_v11  ;;  %v8862_v24 = vcombine.low %v537_v10, %v541_v11  ;;  %v577_v60 = vld [vmem:[%s13247_s1 + $0x1148] sm:$0xff] }
  0xea   :  { %6468 = vmatpush1.bf16.msra.mxu0 %v8804_v17  ;;  %v548_v17 = vld [vmem:[%s13247_s1 + $0x1060] sm:$0xff]  ;;  %v581_v61 = vld [vmem:[%s13247_s1 + $0x1168] sm:$0xff] }
  0xeb   :  { %6796 = vmatpush1.bf16.msra.mxu1 %v8806_v18  ;;  %6469 = vmatprep.subr.bf16.mxu0 %v8813_v19  ;;  %v1156_v18 = vcombine.high %v10613_v8, %v10613_v8  ;;  %v10631_v19 = vcombine.high %v10416_v58, %v10416_v58  ;;  %v8869_v25 = vcombine.high %v544_v16, %v548_v17 }
  0xec   :  { %6797 = vmatprep.subr.bf16.mxu1 %v8815_v20  ;;  %v545_v20 = vld [vmem:[%s13247_s1 + $0x1048] sm:$0xff]  ;;  %v8868_v31 = vcombine.low %v544_v16, %v548_v17  ;;  %v8902_v11 = vcombine.low %v577_v60, %v581_v61 }
  0xed   :  { %v8870_v32 = vcombine.low %v545_v20, %v549_v21  ;;  %v593_v16 = vld [vmem:[%s13247_s1 + $0x11c8] sm:$0xff] }
  0xee   :  { %6470 = vmatpush1.bf16.msra.mxu0 %v8812_v26  ;;  %v8871_v26 = vcombine.high %v545_v20, %v549_v21  ;;  %v597_v17 = vld [vmem:[%s13247_s1 + $0x11e8] sm:$0xff]  ;;  %v8910_v20 = vcombine.low %v585_v6, %v589_v7 }
  0xef   :  { %6798 = vmatpush1.bf16.msra.mxu1 %v8814_v27  ;;  %6471 = vmatprep.subr.bf16.mxu0 %v8821_v28  ;;  %v552_v27 = vld [vmem:[%s13247_s1 + $0x1080] sm:$0xff] }
  0xf0   :  { %6799 = vmatprep.subr.bf16.mxu1 %v8823_v59  ;;  %v556_v28 = vld [vmem:[%s13247_s1 + $0x10a0] sm:$0xff]  ;;  %v10646_v59 = vrot.slane %v1156_v18, %v9850_v53 }
  0xf1   :  { %v8876_v41 = vcombine.low %v552_v27, %v556_v28 }
  0xf2   :  { %6472 = vmatpush1.bf16.msra.mxu0 %v8820_v34  ;;  %v8877_v34 = vcombine.high %v552_v27, %v556_v28  ;;  %v605_v27 = vld [vmem:[%s13247_s1 + $0x1228] sm:$0xff] }
  0xf3   :  { %6800 = vmatpush1.bf16.msra.mxu1 %v8822_v35  ;;  %6473 = vmatprep.subr.bf16.mxu0 %v8829_v36  ;;  %v8879_v35 = vcombine.high %v553_v29, %v557_v30  ;;  %v560_v36 = vld [vmem:[%s13247_s1 + $0x10c0] sm:$0xff]  ;;  %v8918_v29 = vcombine.low %v593_v16, %v597_v17 }
  0xf4   :  { %6801 = vmatprep.subr.bf16.mxu1 %v8831_v37  ;;  %v564_v37 = vld [vmem:[%s13247_s1 + $0x10e0] sm:$0xff] }
  0xf5   :  { %v8884_v51 = vcombine.low %v560_v36, %v564_v37 }
  0xf6   :  { %6474 = vmatpush1.bf16.msra.mxu0 %v8828_v44  ;;  %v8885_v44 = vcombine.high %v560_v36, %v564_v37  ;;  %v613_v36 = vld [vmem:[%s13247_s1 + $0x1268] sm:$0xff] }
  0xf7   :  { %6802 = vmatpush1.bf16.msra.mxu1 %v8830_v45  ;;  %6475 = vmatprep.subr.bf16.mxu0 %v8837_v46  ;;  %v8887_v45 = vcombine.high %v561_v38, %v565_v39  ;;  %v568_v46 = vld [vmem:[%s13247_s1 + $0x1100] sm:$0xff] }
  0xf8   :  { %6803 = vmatprep.subr.bf16.mxu1 %v8839_v47  ;;  %v572_v47 = vld [vmem:[%s13247_s1 + $0x1120] sm:$0xff] }
  0xf9   :  { %v8892_v62 = vcombine.low %v568_v46, %v572_v47 }
  0xfa   :  { %6476 = vmatpush1.bf16.msra.mxu0 %v8836_v54  ;;  %v8893_v54 = vcombine.high %v568_v46, %v572_v47  ;;  %v621_v46 = vld [vmem:[%s13247_s1 + $0x12a8] sm:$0xff] }
  0xfb   :  { %6804 = vmatpush1.bf16.msra.mxu1 %v8838_v55  ;;  %6477 = vmatprep.subr.bf16.mxu0 %v8845_v56  ;;  %v8895_v55 = vcombine.high %v569_v49, %v573_v50  ;;  %v576_v56 = vld [vmem:[%s13247_s1 + $0x1140] sm:$0xff] }
  0xfc   :  { %6805 = vmatprep.subr.bf16.mxu1 %v8847_v57  ;;  %v580_v57 = vld [vmem:[%s13247_s1 + $0x1160] sm:$0xff] }
  0xfd   :  { %v8900_v10 = vcombine.low %v576_v56, %v580_v57 }
  0xfe   :  { %6478 = vmatpush1.bf16.msra.mxu0 %v8844_v2  ;;  %v8901_v2 = vcombine.high %v576_v56, %v580_v57  ;;  %v629_v56 = vld [vmem:[%s13247_s1 + $0x12e8] sm:$0xff] }
  0xff   :  { %6806 = vmatpush1.bf16.msra.mxu1 %v8846_v63  ;;  %6479 = vmatprep.subr.bf16.mxu0 %v8853_v3  ;;  %v8903_v63 = vcombine.high %v577_v60, %v581_v61  ;;  %v584_v3 = vld [vmem:[%s13247_s1 + $0x1180] sm:$0xff] }
 0x100   :  { %6807 = vmatprep.subr.bf16.mxu1 %v8855_v5  ;;  %v588_v5 = vld [vmem:[%s13247_s1 + $0x11a0] sm:$0xff] }
 0x101   :  { %v8908_v18 = vcombine.low %v584_v3, %v588_v5 }
 0x102   :  { %6480 = vmatpush1.bf16.msra.mxu0 %v8852_v12  ;;  %v8909_v12 = vcombine.high %v584_v3, %v588_v5  ;;  %v637_v3 = vld [vmem:[%s13247_s1 + $0x1328] sm:$0xff] }
 0x103   :  { %6808 = vmatpush1.bf16.msra.mxu1 %v8854_v13  ;;  %6490 = vmatprep.subr.bf16.mxu0 %v8861_v14  ;;  %v8911_v13 = vcombine.high %v585_v6, %v589_v7  ;;  %v592_v14 = vld [vmem:[%s13247_s1 + $0x11c0] sm:$0xff] }
 0x104   :  { %6818 = vmatprep.subr.bf16.mxu1 %v8863_v15  ;;  %v596_v15 = vld [vmem:[%s13247_s1 + $0x11e0] sm:$0xff] }
 0x105   :  { %6482 = vmatmul.mubr.bf16.vlgmr.msra.gmra.mrb[0].mxu0 %v10631_v19  ;;  %v8917_v21 = vcombine.high %v592_v14, %v596_v15  ;;  %v8916_v28 = vcombine.low %v592_v14, %v596_v15  ;;  %v645_v14 = vld [vmem:[%s13247_s1 + $0x1368] sm:$0xff] }
 0x106   :  { %6491 = vmatpush1.bf16.msra.mxu0 %v8860_v22  ;;  %6810 = vmatmul.mubr.bf16.vlgmr.msra.gmra.mrb[0].mxu1 %v10631_v19  ;;  %v8919_v22 = vcombine.high %v593_v16, %v597_v17 }
 0x107   :  { %6819 = vmatpush1.bf16.msra.mxu1 %v8862_v24  ;;  %6492 = vmatprep.subr.bf16.mxu0 %v8869_v25  ;;  %v600_v24 = vld [vmem:[%s13247_s1 + $0x1200] sm:$0xff] }
 0x108   :  { %6820 = vmatprep.subr.bf16.mxu1 %v8871_v26  ;;  %6522 = vmatprep.mubr.bf16.mxu0 %v10646_v59  ;;  %v604_v25 = vld [vmem:[%s13247_s1 + $0x1220] sm:$0xff]  ;;  %v601_v26 = vld [vmem:[%s13247_s1 + $0x1208] sm:$0xff] }
 0x109   :  { %6850 = vmatprep.mubr.bf16.mxu1 %v10646_v59  ;;  %v8925_v30 = vcombine.high %v600_v24, %v604_v25  ;;  %v8924_v37 = vcombine.low %v600_v24, %v604_v25  ;;  %v8926_v38 = vcombine.low %v601_v26, %v605_v27  ;;  %v653_v24 = vld [vmem:[%s13247_s1 + $0x13a8] sm:$0xff] }
 0x10a   :  { %6493 = vmatpush1.bf16.msra.mxu0 %v8868_v31  ;;  %v8927_v31 = vcombine.high %v601_v26, %v605_v27 }
 0x10b   :  { %6821 = vmatpush1.bf16.msra.mxu1 %v8870_v32  ;;  %6494 = vmatprep.subr.bf16.mxu0 %v8877_v34  ;;  %v608_v32 = vld [vmem:[%s13247_s1 + $0x1240] sm:$0xff] }
 0x10c   :  { %6822 = vmatprep.subr.bf16.mxu1 %v8879_v35  ;;  %v612_v34 = vld [vmem:[%s13247_s1 + $0x1260] sm:$0xff]  ;;  %v609_v35 = vld [vmem:[%s13247_s1 + $0x1248] sm:$0xff] }
 0x10d   :  { %v8933_v39 = vcombine.high %v608_v32, %v612_v34  ;;  %v8932_v47 = vcombine.low %v608_v32, %v612_v34  ;;  %v8934_v49 = vcombine.low %v609_v35, %v613_v36  ;;  %v661_v32 = vld [vmem:[%s13247_s1 + $0x13e8] sm:$0xff] }
 0x10e   :  { %6495 = vmatpush1.bf16.msra.mxu0 %v8876_v41  ;;  %v8935_v41 = vcombine.high %v609_v35, %v613_v36 }
 0x10f   :  { %6823 = vmatpush1.bf16.msra.mxu1 %v8878_v42  ;;  %6496 = vmatprep.subr.bf16.mxu0 %v8885_v44  ;;  %v616_v42 = vld [vmem:[%s13247_s1 + $0x1280] sm:$0xff] }
 0x110   :  { %6824 = vmatprep.subr.bf16.mxu1 %v8887_v45  ;;  %v620_v44 = vld [vmem:[%s13247_s1 + $0x12a0] sm:$0xff]  ;;  %v617_v45 = vld [vmem:[%s13247_s1 + $0x1288] sm:$0xff] }
 0x111   :  { %v8941_v50 = vcombine.high %v616_v42, %v620_v44  ;;  %v8940_v57 = vcombine.low %v616_v42, %v620_v44  ;;  %v8942_v60 = vcombine.low %v617_v45, %v621_v46  ;;  %v669_v42 = vld [vmem:[%s13247_s1 + $0x1428] sm:$0xff] }
 0x112   :  { %6497 = vmatpush1.bf16.msra.mxu0 %v8884_v51  ;;  %v8943_v51 = vcombine.high %v617_v45, %v621_v46 }
 0x113   :  { %6825 = vmatpush1.bf16.msra.mxu1 %v8886_v52  ;;  %6498 = vmatprep.subr.bf16.mxu0 %v8893_v54  ;;  %v624_v52 = vld [vmem:[%s13247_s1 + $0x12c0] sm:$0xff] }
 0x114   :  { %6826 = vmatprep.subr.bf16.mxu1 %v8895_v55  ;;  %v628_v54 = vld [vmem:[%s13247_s1 + $0x12e0] sm:$0xff]  ;;  %v625_v55 = vld [vmem:[%s13247_s1 + $0x12c8] sm:$0xff] }
 0x115   :  { %v8949_v61 = vcombine.high %v624_v52, %v628_v54  ;;  %v8948_v5 = vcombine.low %v624_v52, %v628_v54  ;;  %v8950_v6 = vcombine.low %v625_v55, %v629_v56  ;;  %v673_v52 = vld [vmem:[%s13247_s1 + $0x1448] sm:$0xff] }
 0x116   :  { %6499 = vmatpush1.bf16.msra.mxu0 %v8892_v62  ;;  %v8951_v62 = vcombine.high %v625_v55, %v629_v56  ;;  %v677_v54 = vld [vmem:[%s13247_s1 + $0x1468] sm:$0xff] }
 0x117   :  { %6827 = vmatpush1.bf16.msra.mxu1 %v8894_v0  ;;  %6500 = vmatprep.subr.bf16.mxu0 %v8901_v2  ;;  %v632_v0 = vld [vmem:[%s13247_s1 + $0x1300] sm:$0xff] }
 0x118   :  { %6828 = vmatprep.subr.bf16.mxu1 %v8903_v63  ;;  %v636_v2 = vld [vmem:[%s13247_s1 + $0x1320] sm:$0xff]  ;;  %v633_v63 = vld [vmem:[%s13247_s1 + $0x1308] sm:$0xff] }
 0x119   :  { %v8957_v7 = vcombine.high %v632_v0, %v636_v2  ;;  %v8956_v15 = vcombine.low %v632_v0, %v636_v2  ;;  %v8958_v16 = vcombine.low %v633_v63, %v637_v3  ;;  %v681_v0 = vld [vmem:[%s13247_s1 + $0x1488] sm:$0xff] }
 0x11a   :  { %6501 = vmatpush1.bf16.msra.mxu0 %v8900_v10  ;;  %v8959_v10 = vcombine.high %v633_v63, %v637_v3  ;;  %v685_v2 = vld [vmem:[%s13247_s1 + $0x14a8] sm:$0xff]  ;;  %v8998_v3 = vcombine.low %v673_v52, %v677_v54 }
 0x11b   :  { %6829 = vmatpush1.bf16.msra.mxu1 %v8902_v11  ;;  %6502 = vmatprep.subr.bf16.mxu0 %v8909_v12  ;;  %v640_v11 = vld [vmem:[%s13247_s1 + $0x1340] sm:$0xff] }
 0x11c   :  { %6830 = vmatprep.subr.bf16.mxu1 %v8911_v13  ;;  %v644_v12 = vld [vmem:[%s13247_s1 + $0x1360] sm:$0xff]  ;;  %v641_v13 = vld [vmem:[%s13247_s1 + $0x1348] sm:$0xff] }
 0x11d   :  { %v8965_v17 = vcombine.high %v640_v11, %v644_v12  ;;  %v8964_v25 = vcombine.low %v640_v11, %v644_v12  ;;  %v8966_v26 = vcombine.low %v641_v13, %v645_v14  ;;  %v689_v11 = vld [vmem:[%s13247_s1 + $0x14c8] sm:$0xff] }
 0x11e   :  { %6503 = vmatpush1.bf16.msra.mxu0 %v8908_v18  ;;  %v8967_v18 = vcombine.high %v641_v13, %v645_v14  ;;  %v693_v12 = vld [vmem:[%s13247_s1 + $0x14e8] sm:$0xff]  ;;  %v9006_v14 = vcombine.low %v681_v0, %v685_v2 }
 0x11f   :  { %6831 = vmatpush1.bf16.msra.mxu1 %v8910_v20  ;;  %6504 = vmatprep.subr.bf16.mxu0 %v8917_v21  ;;  %v648_v20 = vld [vmem:[%s13247_s1 + $0x1380] sm:$0xff] }
 0x120   :  { %6832 = vmatprep.subr.bf16.mxu1 %v8919_v22  ;;  %v652_v21 = vld [vmem:[%s13247_s1 + $0x13a0] sm:$0xff]  ;;  %v649_v22 = vld [vmem:[%s13247_s1 + $0x1388] sm:$0xff] }
 0x121   :  { %v8973_v27 = vcombine.high %v648_v20, %v652_v21  ;;  %v8972_v34 = vcombine.low %v648_v20, %v652_v21  ;;  %v8974_v35 = vcombine.low %v649_v22, %v653_v24  ;;  %v697_v20 = vld [vmem:[%s13247_s1 + $0x1508] sm:$0xff] }
 0x122   :  { %6505 = vmatpush1.bf16.msra.mxu0 %v8916_v28  ;;  %v8975_v28 = vcombine.high %v649_v22, %v653_v24  ;;  %v701_v21 = vld [vmem:[%s13247_s1 + $0x1528] sm:$0xff]  ;;  %v9014_v24 = vcombine.low %v689_v11, %v693_v12 }
 0x123   :  { %6833 = vmatpush1.bf16.msra.mxu1 %v8918_v29  ;;  %6506 = vmatprep.subr.bf16.mxu0 %v8925_v30  ;;  %v656_v29 = vld [vmem:[%s13247_s1 + $0x13c0] sm:$0xff] }
 0x124   :  { %6834 = vmatprep.subr.bf16.mxu1 %v8927_v31  ;;  %v660_v30 = vld [vmem:[%s13247_s1 + $0x13e0] sm:$0xff]  ;;  %v657_v31 = vld [vmem:[%s13247_s1 + $0x13c8] sm:$0xff] }
 0x125   :  { %v8981_v36 = vcombine.high %v656_v29, %v660_v30  ;;  %v8980_v44 = vcombine.low %v656_v29, %v660_v30  ;;  %v8982_v45 = vcombine.low %v657_v31, %v661_v32  ;;  %v705_v29 = vld [vmem:[%s13247_s1 + $0x1548] sm:$0xff] }
 0x126   :  { %6507 = vmatpush1.bf16.msra.mxu0 %v8924_v37  ;;  %v8983_v37 = vcombine.high %v657_v31, %v661_v32  ;;  %v709_v30 = vld [vmem:[%s13247_s1 + $0x1568] sm:$0xff]  ;;  %v9022_v32 = vcombine.low %v697_v20, %v701_v21 }
 0x127   :  { %6835 = vmatpush1.bf16.msra.mxu1 %v8926_v38  ;;  %6508 = vmatprep.subr.bf16.mxu0 %v8933_v39  ;;  %v664_v38 = vld [vmem:[%s13247_s1 + $0x1400] sm:$0xff] }
 0x128   :  { %6836 = vmatprep.subr.bf16.mxu1 %v8935_v41  ;;  %v668_v39 = vld [vmem:[%s13247_s1 + $0x1420] sm:$0xff]  ;;  %v665_v41 = vld [vmem:[%s13247_s1 + $0x1408] sm:$0xff] }
 0x129   :  { %v8989_v46 = vcombine.high %v664_v38, %v668_v39  ;;  %v8988_v55 = vcombine.low %v664_v38, %v668_v39  ;;  %v8990_v56 = vcombine.low %v665_v41, %v669_v42  ;;  %v713_v38 = vld [vmem:[%s13247_s1 + $0x1588] sm:$0xff] }
 0x12a   :  { %6509 = vmatpush1.bf16.msra.mxu0 %v8932_v47  ;;  %v8991_v47 = vcombine.high %v665_v41, %v669_v42  ;;  %v717_v39 = vld [vmem:[%s13247_s1 + $0x15a8] sm:$0xff]  ;;  %v9030_v42 = vcombine.low %v705_v29, %v709_v30 }
 0x12b   :  { %6837 = vmatpush1.bf16.msra.mxu1 %v8934_v49  ;;  %6510 = vmatprep.subr.bf16.mxu0 %v8941_v50  ;;  %v672_v49 = vld [vmem:[%s13247_s1 + $0x1440] sm:$0xff] }
 0x12c   :  { %6838 = vmatprep.subr.bf16.mxu1 %v8943_v51  ;;  %v676_v50 = vld [vmem:[%s13247_s1 + $0x1460] sm:$0xff]  ;;  %v10834_v51 = vrot.slane %v10613_v8, %v9850_v53 }
 0x12d   :  { %v680_v8 = vld [vmem:[%s13247_s1 + $0x1480] sm:$0xff]  ;;  %v8996_v63 = vcombine.low %v672_v49, %v676_v50 }
 0x12e   :  { %6511 = vmatpush1.bf16.msra.mxu0 %v8940_v57  ;;  %v8997_v57 = vcombine.high %v672_v49, %v676_v50  ;;  %v721_v49 = vld [vmem:[%s13247_s1 + $0x15c8] sm:$0xff] }
 0x12f   :  { %6839 = vmatpush1.bf16.msra.mxu1 %v8942_v60  ;;  %6512 = vmatprep.subr.bf16.mxu0 %v8949_v61  ;;  %v8999_v60 = vcombine.high %v673_v52, %v677_v54  ;;  %v684_v61 = vld [vmem:[%s13247_s1 + $0x14a0] sm:$0xff]  ;;  %v725_v50 = vld [vmem:[%s13247_s1 + $0x15e8] sm:$0xff]  ;;  %v9038_v54 = vcombine.low %v713_v38, %v717_v39 }
 0x130   :  { %6840 = vmatprep.subr.bf16.mxu1 %v8951_v62  ;;  %v10850_v62 = vcombine.high %v10646_v59, %v10646_v59  ;;  %v9004_v13 = vcombine.low %v680_v8, %v684_v61 }
 0x132   :  { %6513 = vmatpush1.bf16.msra.mxu0 %v8948_v5  ;;  %v9005_v5 = vcombine.high %v680_v8, %v684_v61  ;;  %v729_v8 = vld [vmem:[%s13247_s1 + $0x1608] sm:$0xff] }
 0x133   :  { %6841 = vmatpush1.bf16.msra.mxu1 %v8950_v6  ;;  %6514 = vmatprep.subr.bf16.mxu0 %v8957_v7  ;;  %v9007_v6 = vcombine.high %v681_v0, %v685_v2  ;;  %v688_v7 = vld [vmem:[%s13247_s1 + $0x14c0] sm:$0xff]  ;;  %v733_v61 = vld [vmem:[%s13247_s1 + $0x1628] sm:$0xff]  ;;  %v9046_v2 = vcombine.low %v721_v49, %v725_v50 }
 0x134   :  { %6842 = vmatprep.subr.bf16.mxu1 %v8959_v10  ;;  %v692_v10 = vld [vmem:[%s13247_s1 + $0x14e0] sm:$0xff] }
 0x135   :  { %v9012_v22 = vcombine.low %v688_v7, %v692_v10 }
 0x136   :  { %6515 = vmatpush1.bf16.msra.mxu0 %v8956_v15  ;;  %v9013_v15 = vcombine.high %v688_v7, %v692_v10  ;;  %v737_v7 = vld [vmem:[%s13247_s1 + $0x1648] sm:$0xff] }
 0x137   :  { %6843 = vmatpush1.bf16.msra.mxu1 %v8958_v16  ;;  %6516 = vmatprep.subr.bf16.mxu0 %v8965_v17  ;;  %v9015_v16 = vcombine.high %v689_v11, %v693_v12  ;;  %v696_v17 = vld [vmem:[%s13247_s1 + $0x1500] sm:$0xff]  ;;  %v741_v10 = vld [vmem:[%s13247_s1 + $0x1668] sm:$0xff]  ;;  %v9054_v12 = vcombine.low %v729_v8, %v733_v61 }
 0x138   :  { %6844 = vmatprep.subr.bf16.mxu1 %v8967_v18  ;;  %v700_v18 = vld [vmem:[%s13247_s1 + $0x1520] sm:$0xff] }
 0x139   :  { %v9020_v31 = vcombine.low %v696_v17, %v700_v18 }
 0x13a   :  { %6517 = vmatpush1.bf16.msra.mxu0 %v8964_v25  ;;  %v9021_v25 = vcombine.high %v696_v17, %v700_v18  ;;  %v745_v17 = vld [vmem:[%s13247_s1 + $0x1688] sm:$0xff] }
 0x13b   :  { %6845 = vmatpush1.bf16.msra.mxu1 %v8966_v26  ;;  %6518 = vmatprep.subr.bf16.mxu0 %v8973_v27  ;;  %v9023_v26 = vcombine.high %v697_v20, %v701_v21  ;;  %v704_v27 = vld [vmem:[%s13247_s1 + $0x1540] sm:$0xff]  ;;  %v749_v18 = vld [vmem:[%s13247_s1 + $0x16a8] sm:$0xff]  ;;  %v9062_v21 = vcombine.low %v737_v7, %v741_v10 }
 0x13c   :  { %6846 = vmatprep.subr.bf16.mxu1 %v8975_v28  ;;  %v708_v28 = vld [vmem:[%s13247_s1 + $0x1560] sm:$0xff] }
 0x13d   :  { %v9028_v41 = vcombine.low %v704_v27, %v708_v28 }
 0x13e   :  { %6519 = vmatpush1.bf16.msra.mxu0 %v8972_v34  ;;  %v9029_v34 = vcombine.high %v704_v27, %v708_v28  ;;  %v753_v27 = vld [vmem:[%s13247_s1 + $0x16c8] sm:$0xff] }
 0x13f   :  { %6847 = vmatpush1.bf16.msra.mxu1 %v8974_v35  ;;  %6520 = vmatprep.subr.bf16.mxu0 %v8981_v36  ;;  %v9031_v35 = vcombine.high %v705_v29, %v709_v30  ;;  %v712_v36 = vld [vmem:[%s13247_s1 + $0x1580] sm:$0xff]  ;;  %v757_v28 = vld [vmem:[%s13247_s1 + $0x16e8] sm:$0xff]  ;;  %v9070_v30 = vcombine.low %v745_v17, %v749_v18 }
 0x140   :  { %6848 = vmatprep.subr.bf16.mxu1 %v8983_v37  ;;  %v716_v37 = vld [vmem:[%s13247_s1 + $0x15a0] sm:$0xff] }
 0x141   :  { %v9036_v52 = vcombine.low %v712_v36, %v716_v37 }
 0x142   :  { %6521 = vmatpush1.bf16.msra.mxu0 %v8980_v44  ;;  %v9037_v44 = vcombine.high %v712_v36, %v716_v37  ;;  %v761_v36 = vld [vmem:[%s13247_s1 + $0x1708] sm:$0xff] }
 0x143   :  { %6849 = vmatpush1.bf16.msra.mxu1 %v8982_v45  ;;  %6531 = vmatprep.subr.bf16.mxu0 %v8989_v46  ;;  %v9039_v45 = vcombine.high %v713_v38, %v717_v39  ;;  %v720_v46 = vld [vmem:[%s13247_s1 + $0x15c0] sm:$0xff]  ;;  %v765_v37 = vld [vmem:[%s13247_s1 + $0x1728] sm:$0xff]  ;;  %v9078_v39 = vcombine.low %v753_v27, %v757_v28 }
 0x144   :  { %6859 = vmatprep.subr.bf16.mxu1 %v8991_v47  ;;  %v724_v47 = vld [vmem:[%s13247_s1 + $0x15e0] sm:$0xff] }
 0x145   :  { %6523 = vmatmul.mubr.bf16.vlgmr.msra.gmra.mrb[0].mxu0 %v10834_v51  ;;  %v9044_v0 = vcombine.low %v720_v46, %v724_v47 }
 0x146   :  { %6532 = vmatpush1.bf16.msra.mxu0 %v8988_v55  ;;  %6851 = vmatmul.mubr.bf16.vlgmr.msra.gmra.mrb[0].mxu1 %v10834_v51  ;;  %v9045_v55 = vcombine.high %v720_v46, %v724_v47  ;;  %v769_v46 = vld [vmem:[%s13247_s1 + $0x1748] sm:$0xff] }
 0x147   :  { %6860 = vmatpush1.bf16.msra.mxu1 %v8990_v56  ;;  %6533 = vmatprep.subr.bf16.mxu0 %v8997_v57  ;;  %v9047_v56 = vcombine.high %v721_v49, %v725_v50  ;;  %v728_v57 = vld [vmem:[%s13247_s1 + $0x1600] sm:$0xff]  ;;  %v773_v47 = vld [vmem:[%s13247_s1 + $0x1768] sm:$0xff]  ;;  %v9086_v50 = vcombine.low %v761_v36, %v765_v37 }
 0x148   :  { %6861 = vmatprep.subr.bf16.mxu1 %v8999_v60  ;;  %6563 = vmatprep.mubr.bf16.mxu0 %v10850_v62  ;;  %v732_v60 = vld [vmem:[%s13247_s1 + $0x1620] sm:$0xff] }
 0x149   :  { %6891 = vmatprep.mubr.bf16.mxu1 %v10850_v62  ;;  %v9052_v11 = vcombine.low %v728_v57, %v732_v60 }
 0x14a   :  { %6534 = vmatpush1.bf16.msra.mxu0 %v8996_v63  ;;  %v9053_v63 = vcombine.high %v728_v57, %v732_v60  ;;  %v777_v57 = vld [vmem:[%s13247_s1 + $0x1788] sm:$0xff] }
 0x14b   :  { %6862 = vmatpush1.bf16.msra.mxu1 %v8998_v3  ;;  %6535 = vmatprep.subr.bf16.mxu0 %v9005_v5  ;;  %v9055_v3 = vcombine.high %v729_v8, %v733_v61  ;;  %v736_v5 = vld [vmem:[%s13247_s1 + $0x1640] sm:$0xff]  ;;  %v781_v60 = vld [vmem:[%s13247_s1 + $0x17a8] sm:$0xff]  ;;  %v9094_v61 = vcombine.low %v769_v46, %v773_v47 }
 0x14c   :  { %6863 = vmatprep.subr.bf16.mxu1 %v9007_v6  ;;  %v740_v6 = vld [vmem:[%s13247_s1 + $0x1660] sm:$0xff] }
 0x14d   :  { %v9060_v20 = vcombine.low %v736_v5, %v740_v6 }
 0x14e   :  { %6536 = vmatpush1.bf16.msra.mxu0 %v9004_v13  ;;  %v9061_v13 = vcombine.high %v736_v5, %v740_v6  ;;  %v1141_v5 = vcombine.high %v10603_v1, %v10603_v1  ;;  %v785_v6 = vld [vmem:[%s13247_s1 + $0x17c8] sm:$0xff]  ;;  %v792_v1 = vld [vmem:[%s13247_s1 + $0x1800] sm:$0xff] }
 0x14f   :  { %6864 = vmatpush1.bf16.msra.mxu1 %v9006_v14  ;;  %6537 = vmatprep.subr.bf16.mxu0 %v9013_v15  ;;  %v9063_v14 = vcombine.high %v737_v7, %v741_v10  ;;  %v744_v15 = vld [vmem:[%s13247_s1 + $0x1680] sm:$0xff]  ;;  %v789_v7 = vld [vmem:[%s13247_s1 + $0x17e8] sm:$0xff] }
 0x150   :  { %6865 = vmatprep.subr.bf16.mxu1 %v9015_v16  ;;  %v748_v16 = vld [vmem:[%s13247_s1 + $0x16a0] sm:$0xff] }
 0x151   :  { %v9068_v29 = vcombine.low %v744_v15, %v748_v16 }
 0x152   :  { %6538 = vmatpush1.bf16.msra.mxu0 %v9012_v22  ;;  %v9069_v22 = vcombine.high %v744_v15, %v748_v16  ;;  %v11027_v15 = vrot.slane %v1141_v5, %v9850_v53  ;;  %v793_v16 = vld [vmem:[%s13247_s1 + $0x1808] sm:$0xff]  ;;  %v832_v5 = vld [vmem:[%s13247_s1 + $0x1940] sm:$0xff] }
 0x153   :  { %6866 = vmatpush1.bf16.msra.mxu1 %v9014_v24  ;;  %6539 = vmatprep.subr.bf16.mxu0 %v9021_v25  ;;  %v9071_v24 = vcombine.high %v745_v17, %v749_v18  ;;  %v752_v25 = vld [vmem:[%s13247_s1 + $0x16c0] sm:$0xff]  ;;  %v797_v17 = vld [vmem:[%s13247_s1 + $0x1828] sm:$0xff] }
 0x154   :  { %6867 = vmatprep.subr.bf16.mxu1 %v9023_v26  ;;  %v756_v26 = vld [vmem:[%s13247_s1 + $0x16e0] sm:$0xff] }
 0x155   :  { %v9076_v38 = vcombine.low %v752_v25, %v756_v26 }
 0x156   :  { %6540 = vmatpush1.bf16.msra.mxu0 %v9020_v31  ;;  %v9077_v31 = vcombine.high %v752_v25, %v756_v26  ;;  %v804_v25 = vld [vmem:[%s13247_s1 + $0x1860] sm:$0xff]  ;;  %v1157_v26 = vcombine.high %v11027_v15, %v11027_v15 }
 0x157   :  { %6868 = vmatpush1.bf16.msra.mxu1 %v9022_v32  ;;  %6541 = vmatprep.subr.bf16.mxu0 %v9029_v34  ;;  %v9079_v32 = vcombine.high %v753_v27, %v757_v28  ;;  %v760_v34 = vld [vmem:[%s13247_s1 + $0x1700] sm:$0xff]  ;;  %v11045_v27 = vcombine.high %v10834_v51, %v10834_v51  ;;  %v801_v28 = vld [vmem:[%s13247_s1 + $0x1848] sm:$0xff] }
 0x158   :  { %6869 = vmatprep.subr.bf16.mxu1 %v9031_v35  ;;  %v764_v35 = vld [vmem:[%s13247_s1 + $0x1720] sm:$0xff] }
 0x159   :  { %v9084_v49 = vcombine.low %v760_v34, %v764_v35 }
 0x15a   :  { %6542 = vmatpush1.bf16.msra.mxu0 %v9028_v41  ;;  %v9085_v41 = vcombine.high %v760_v34, %v764_v35  ;;  %v808_v35 = vld [vmem:[%s13247_s1 + $0x1880] sm:$0xff] }
 0x15b   :  { %6870 = vmatpush1.bf16.msra.mxu1 %v9030_v42  ;;  %6543 = vmatprep.subr.bf16.mxu0 %v9037_v44  ;;  %v9087_v42 = vcombine.high %v761_v36, %v765_v37  ;;  %v768_v44 = vld [vmem:[%s13247_s1 + $0x1740] sm:$0xff]  ;;  %v11060_v37 = vrot.slane %v1157_v26, %v9850_v53 }
 0x15c   :  { %6871 = vmatprep.subr.bf16.mxu1 %v9039_v45  ;;  %v772_v45 = vld [vmem:[%s13247_s1 + $0x1760] sm:$0xff] }
 0x15d   :  { %v9092_v8 = vcombine.low %v768_v44, %v772_v45  ;;  %v812_v36 = vld [vmem:[%s13247_s1 + $0x18a0] sm:$0xff] }
 0x15e   :  { %6544 = vmatpush1.bf16.msra.mxu0 %v9036_v52  ;;  %v9093_v52 = vcombine.high %v768_v44, %v772_v45  ;;  %v9133_v44 = vcombine.high %v808_v35, %v812_v36  ;;  %v852_v26 = vld [vmem:[%s13247_s1 + $0x19e0] sm:$0xff] }
 0x15f   :  { %6872 = vmatpush1.bf16.msra.mxu1 %v9038_v54  ;;  %6545 = vmatprep.subr.bf16.mxu0 %v9045_v55  ;;  %v9095_v54 = vcombine.high %v769_v46, %v773_v47  ;;  %v776_v55 = vld [vmem:[%s13247_s1 + $0x1780] sm:$0xff] }
 0x160   :  { %6873 = vmatprep.subr.bf16.mxu1 %v9047_v56  ;;  %v780_v56 = vld [vmem:[%s13247_s1 + $0x17a0] sm:$0xff] }
 0x161   :  { %v9100_v10 = vcombine.low %v776_v55, %v780_v56  ;;  %v816_v46 = vld [vmem:[%s13247_s1 + $0x18c0] sm:$0xff] }
 0x162   :  { %6546 = vmatpush1.bf16.msra.mxu0 %v9044_v0  ;;  %v9101_v0 = vcombine.high %v776_v55, %v780_v56  ;;  %v820_v47 = vld [vmem:[%s13247_s1 + $0x18e0] sm:$0xff] }
 0x163   :  { %6874 = vmatpush1.bf16.msra.mxu1 %v9046_v2  ;;  %6547 = vmatprep.subr.bf16.mxu0 %v9053_v63  ;;  %v9103_v2 = vcombine.high %v777_v57, %v781_v60  ;;  %v784_v63 = vld [vmem:[%s13247_s1 + $0x17c0] sm:$0xff]  ;;  %v9141_v55 = vcombine.high %v816_v46, %v820_v47 }
 0x164   :  { %6875 = vmatprep.subr.bf16.mxu1 %v9055_v3  ;;  %v788_v3 = vld [vmem:[%s13247_s1 + $0x17e0] sm:$0xff] }
 0x165   :  { %v9108_v18 = vcombine.low %v784_v63, %v788_v3 }
 0x166   :  { %6548 = vmatpush1.bf16.msra.mxu0 %v9052_v11  ;;  %v9102_v11 = vcombine.low %v777_v57, %v781_v60  ;;  %v824_v57 = vld [vmem:[%s13247_s1 + $0x1900] sm:$0xff] }
 0x167   :  { %6876 = vmatpush1.bf16.msra.mxu1 %v9054_v12  ;;  %6549 = vmatprep.subr.bf16.mxu0 %v9061_v13  ;;  %v9109_v12 = vcombine.high %v784_v63, %v788_v3  ;;  %v9111_v13 = vcombine.high %v785_v6, %v789_v7  ;;  %v828_v60 = vld [vmem:[%s13247_s1 + $0x1920] sm:$0xff] }
 0x168   :  { %6877 = vmatprep.subr.bf16.mxu1 %v9063_v14  ;;  %v796_v14 = vld [vmem:[%s13247_s1 + $0x1820] sm:$0xff]  ;;  %v9149_v63 = vcombine.high %v824_v57, %v828_v60 }
 0x16a   :  { %6550 = vmatpush1.bf16.msra.mxu0 %v9060_v20  ;;  %v9110_v20 = vcombine.low %v785_v6, %v789_v7  ;;  %v836_v6 = vld [vmem:[%s13247_s1 + $0x1960] sm:$0xff]  ;;  %v833_v7 = vld [vmem:[%s13247_s1 + $0x1948] sm:$0xff] }
 0x16b   :  { %6878 = vmatpush1.bf16.msra.mxu1 %v9062_v21  ;;  %6551 = vmatprep.subr.bf16.mxu0 %v9069_v22  ;;  %v9117_v21 = vcombine.high %v792_v1, %v796_v14  ;;  %v9119_v22 = vcombine.high %v793_v16, %v797_v17 }
 0x16c   :  { %6879 = vmatprep.subr.bf16.mxu1 %v9071_v24  ;;  %v800_v24 = vld [vmem:[%s13247_s1 + $0x1840] sm:$0xff] }
 0x16e   :  { %6552 = vmatpush1.bf16.msra.mxu0 %v9068_v29  ;;  %v805_v29 = vld [vmem:[%s13247_s1 + $0x1868] sm:$0xff] }
 0x16f   :  { %6880 = vmatpush1.bf16.msra.mxu1 %v9070_v30  ;;  %6553 = vmatprep.subr.bf16.mxu0 %v9077_v31  ;;  %v9116_v30 = vcombine.low %v792_v1, %v796_v14  ;;  %v9118_v31 = vcombine.low %v793_v16, %v797_v17  ;;  %v9127_v34 = vcombine.high %v801_v28, %v805_v29  ;;  %v840_v14 = vld [vmem:[%s13247_s1 + $0x1980] sm:$0xff]  ;;  %v841_v17 = vld [vmem:[%s13247_s1 + $0x1988] sm:$0xff] }
 0x170   :  { %6881 = vmatprep.subr.bf16.mxu1 %v9079_v32  ;;  %v9125_v32 = vcombine.high %v800_v24, %v804_v25  ;;  %v844_v16 = vld [vmem:[%s13247_s1 + $0x19a0] sm:$0xff] }
 0x172   :  { %6554 = vmatpush1.bf16.msra.mxu0 %v9076_v38  ;;  %v809_v38 = vld [vmem:[%s13247_s1 + $0x1888] sm:$0xff] }
 0x173   :  { %6882 = vmatpush1.bf16.msra.mxu1 %v9078_v39  ;;  %6555 = vmatprep.subr.bf16.mxu0 %v9085_v41  ;;  %v813_v39 = vld [vmem:[%s13247_s1 + $0x18a8] sm:$0xff]  ;;  %v9124_v41 = vcombine.low %v800_v24, %v804_v25  ;;  %v848_v25 = vld [vmem:[%s13247_s1 + $0x19c0] sm:$0xff] }
 0x174   :  { %6883 = vmatprep.subr.bf16.mxu1 %v9087_v42  ;;  %v9126_v42 = vcombine.low %v801_v28, %v805_v29  ;;  %v9135_v45 = vcombine.high %v809_v38, %v813_v39  ;;  %v849_v28 = vld [vmem:[%s13247_s1 + $0x19c8] sm:$0xff] }
 0x175   :  { %v853_v29 = vld [vmem:[%s13247_s1 + $0x19e8] sm:$0xff] }
 0x176   :  { %6556 = vmatpush1.bf16.msra.mxu0 %v9084_v49  ;;  %v817_v49 = vld [vmem:[%s13247_s1 + $0x18c8] sm:$0xff] }
 0x177   :  { %6884 = vmatpush1.bf16.msra.mxu1 %v9086_v50  ;;  %6557 = vmatprep.subr.bf16.mxu0 %v9093_v52  ;;  %v821_v50 = vld [vmem:[%s13247_s1 + $0x18e8] sm:$0xff]  ;;  %v9132_v52 = vcombine.low %v808_v35, %v812_v36  ;;  %v856_v35 = vld [vmem:[%s13247_s1 + $0x1a00] sm:$0xff] }
 0x178   :  { %6885 = vmatprep.subr.bf16.mxu1 %v9095_v54  ;;  %v9134_v54 = vcombine.low %v809_v38, %v813_v39  ;;  %v9143_v56 = vcombine.high %v817_v49, %v821_v50  ;;  %v860_v36 = vld [vmem:[%s13247_s1 + $0x1a20] sm:$0xff]  ;;  %v857_v38 = vld [vmem:[%s13247_s1 + $0x1a08] sm:$0xff] }
 0x179   :  { %v861_v39 = vld [vmem:[%s13247_s1 + $0x1a28] sm:$0xff] }
 0x17a   :  { %6558 = vmatpush1.bf16.msra.mxu0 %v9092_v8  ;;  %v825_v8 = vld [vmem:[%s13247_s1 + $0x1908] sm:$0xff] }
 0x17b   :  { %6886 = vmatpush1.bf16.msra.mxu1 %v9094_v61  ;;  %6559 = vmatprep.subr.bf16.mxu0 %v9101_v0  ;;  %v829_v61 = vld [vmem:[%s13247_s1 + $0x1928] sm:$0xff]  ;;  %v9140_v0 = vcombine.low %v816_v46, %v820_v47  ;;  %v864_v46 = vld [vmem:[%s13247_s1 + $0x1a40] sm:$0xff] }
 0x17c   :  { %6887 = vmatprep.subr.bf16.mxu1 %v9103_v2  ;;  %v9142_v2 = vcombine.low %v817_v49, %v821_v50  ;;  %v9151_v3 = vcombine.high %v825_v8, %v829_v61  ;;  %v868_v47 = vld [vmem:[%s13247_s1 + $0x1a60] sm:$0xff]  ;;  %v865_v49 = vld [vmem:[%s13247_s1 + $0x1a48] sm:$0xff] }
 0x17d   :  { %v869_v50 = vld [vmem:[%s13247_s1 + $0x1a68] sm:$0xff] }
 0x17e   :  { %6560 = vmatpush1.bf16.msra.mxu0 %v9100_v10  ;;  %v837_v10 = vld [vmem:[%s13247_s1 + $0x1968] sm:$0xff] }
 0x17f   :  { %6888 = vmatpush1.bf16.msra.mxu1 %v9102_v11  ;;  %6561 = vmatprep.subr.bf16.mxu0 %v9109_v12  ;;  %v9148_v11 = vcombine.low %v824_v57, %v828_v60  ;;  %v9150_v12 = vcombine.low %v825_v8, %v829_v61  ;;  %v9159_v1 = vcombine.high %v833_v7, %v837_v10  ;;  %v872_v57 = vld [vmem:[%s13247_s1 + $0x1a80] sm:$0xff]  ;;  %v873_v8 = vld [vmem:[%s13247_s1 + $0x1a88] sm:$0xff] }
 0x180   :  { %6889 = vmatprep.subr.bf16.mxu1 %v9111_v13  ;;  %v9157_v13 = vcombine.high %v832_v5, %v836_v6  ;;  %v876_v60 = vld [vmem:[%s13247_s1 + $0x1aa0] sm:$0xff]  ;;  %v877_v61 = vld [vmem:[%s13247_s1 + $0x1aa8] sm:$0xff] }
 0x182   :  { %6562 = vmatpush1.bf16.msra.mxu0 %v9108_v18  ;;  %v845_v18 = vld [vmem:[%s13247_s1 + $0x19a8] sm:$0xff] }
 0x183   :  { %6890 = vmatpush1.bf16.msra.mxu1 %v9110_v20  ;;  %6572 = vmatprep.subr.bf16.mxu0 %v9117_v21  ;;  %v9156_v20 = vcombine.low %v832_v5, %v836_v6  ;;  %v9158_v21 = vcombine.low %v833_v7, %v837_v10  ;;  %v9167_v24 = vcombine.high %v841_v17, %v845_v18  ;;  %v880_v5 = vld [vmem:[%s13247_s1 + $0x1ac0] sm:$0xff]  ;;  %v881_v7 = vld [vmem:[%s13247_s1 + $0x1ac8] sm:$0xff] }
 0x184   :  { %6900 = vmatprep.subr.bf16.mxu1 %v9119_v22  ;;  %v9165_v22 = vcombine.high %v840_v14, %v844_v16  ;;  %v884_v6 = vld [vmem:[%s13247_s1 + $0x1ae0] sm:$0xff]  ;;  %v885_v10 = vld [vmem:[%s13247_s1 + $0x1ae8] sm:$0xff] }
 0x185   :  { %6564 = vmatmul.mubr.bf16.vlgmr.msra.gmra.mrb[0].mxu0 %v11045_v27 }
 0x186   :  { %6573 = vmatpush1.bf16.msra.mxu0 %v9116_v30  ;;  %6892 = vmatmul.mubr.bf16.vlgmr.msra.gmra.mrb[0].mxu1 %v11045_v27  ;;  %v9164_v30 = vcombine.low %v840_v14, %v844_v16  ;;  %v888_v14 = vld [vmem:[%s13247_s1 + $0x1b00] sm:$0xff] }
 0x187   :  { %6901 = vmatpush1.bf16.msra.mxu1 %v9118_v31  ;;  %6574 = vmatprep.subr.bf16.mxu0 %v9125_v32  ;;  %v9166_v31 = vcombine.low %v841_v17, %v845_v18  ;;  %v9173_v32 = vcombine.high %v848_v25, %v852_v26  ;;  %v892_v16 = vld [vmem:[%s13247_s1 + $0x1b20] sm:$0xff]  ;;  %v889_v17 = vld [vmem:[%s13247_s1 + $0x1b08] sm:$0xff] }
 0x188   :  { %6902 = vmatprep.subr.bf16.mxu1 %v9127_v34  ;;  %6604 = vmatprep.mubr.bf16.mxu0 %v11060_v37  ;;  %v9175_v34 = vcombine.high %v849_v28, %v853_v29  ;;  %v893_v18 = vld [vmem:[%s13247_s1 + $0x1b28] sm:$0xff] }
 0x189   :  { %6932 = vmatprep.mubr.bf16.mxu1 %v11060_v37 }
 0x18a   :  { %6575 = vmatpush1.bf16.msra.mxu0 %v9124_v41  ;;  %v9172_v41 = vcombine.low %v848_v25, %v852_v26  ;;  %v896_v25 = vld [vmem:[%s13247_s1 + $0x1b40] sm:$0xff] }
 0x18b   :  { %6903 = vmatpush1.bf16.msra.mxu1 %v9126_v42  ;;  %6576 = vmatprep.subr.bf16.mxu0 %v9133_v44  ;;  %v9174_v42 = vcombine.low %v849_v28, %v853_v29  ;;  %v9181_v44 = vcombine.high %v856_v35, %v860_v36  ;;  %v900_v26 = vld [vmem:[%s13247_s1 + $0x1b60] sm:$0xff]  ;;  %v897_v28 = vld [vmem:[%s13247_s1 + $0x1b48] sm:$0xff] }
 0x18c   :  { %6904 = vmatprep.subr.bf16.mxu1 %v9135_v45  ;;  %v9183_v45 = vcombine.high %v857_v38, %v861_v39  ;;  %v901_v29 = vld [vmem:[%s13247_s1 + $0x1b68] sm:$0xff] }
 0x18e   :  { %6577 = vmatpush1.bf16.msra.mxu0 %v9132_v52  ;;  %v9180_v52 = vcombine.low %v856_v35, %v860_v36  ;;  %v904_v35 = vld [vmem:[%s13247_s1 + $0x1b80] sm:$0xff] }
 0x18f   :  { %6905 = vmatpush1.bf16.msra.mxu1 %v9134_v54  ;;  %6578 = vmatprep.subr.bf16.mxu0 %v9141_v55  ;;  %v9182_v54 = vcombine.low %v857_v38, %v861_v39  ;;  %v9189_v55 = vcombine.high %v864_v46, %v868_v47  ;;  %v908_v36 = vld [vmem:[%s13247_s1 + $0x1ba0] sm:$0xff]  ;;  %v905_v38 = vld [vmem:[%s13247_s1 + $0x1b88] sm:$0xff] }
 0x190   :  { %6906 = vmatprep.subr.bf16.mxu1 %v9143_v56  ;;  %v9191_v56 = vcombine.high %v865_v49, %v869_v50  ;;  %v909_v39 = vld [vmem:[%s13247_s1 + $0x1ba8] sm:$0xff] }
 0x192   :  { %6579 = vmatpush1.bf16.msra.mxu0 %v9140_v0  ;;  %v9188_v0 = vcombine.low %v864_v46, %v868_v47  ;;  %v912_v46 = vld [vmem:[%s13247_s1 + $0x1bc0] sm:$0xff] }
 0x193   :  { %6907 = vmatpush1.bf16.msra.mxu1 %v9142_v2  ;;  %6580 = vmatprep.subr.bf16.mxu0 %v9149_v63  ;;  %v9190_v2 = vcombine.low %v865_v49, %v869_v50  ;;  %v9197_v63 = vcombine.high %v872_v57, %v876_v60  ;;  %v916_v47 = vld [vmem:[%s13247_s1 + $0x1be0] sm:$0xff]  ;;  %v913_v49 = vld [vmem:[%s13247_s1 + $0x1bc8] sm:$0xff] }
 0x194   :  { %6908 = vmatprep.subr.bf16.mxu1 %v9151_v3  ;;  %v9199_v3 = vcombine.high %v873_v8, %v877_v61  ;;  %v917_v50 = vld [vmem:[%s13247_s1 + $0x1be8] sm:$0xff] }
 0x196   :  { %6581 = vmatpush1.bf16.msra.mxu0 %v9148_v11  ;;  %v9196_v11 = vcombine.low %v872_v57, %v876_v60  ;;  %v920_v57 = vld [vmem:[%s13247_s1 + $0x1c00] sm:$0xff] }
 0x197   :  { %6909 = vmatpush1.bf16.msra.mxu1 %v9150_v12  ;;  %6582 = vmatprep.subr.bf16.mxu0 %v9157_v13  ;;  %v9198_v12 = vcombine.low %v873_v8, %v877_v61  ;;  %v9205_v13 = vcombine.high %v880_v5, %v884_v6  ;;  %v924_v60 = vld [vmem:[%s13247_s1 + $0x1c20] sm:$0xff]  ;;  %v921_v8 = vld [vmem:[%s13247_s1 + $0x1c08] sm:$0xff] }
 0x198   :  { %6910 = vmatprep.subr.bf16.mxu1 %v9159_v1  ;;  %v9207_v1 = vcombine.high %v881_v7, %v885_v10  ;;  %v925_v61 = vld [vmem:[%s13247_s1 + $0x1c28] sm:$0xff] }
 0x19a   :  { %6583 = vmatpush1.bf16.msra.mxu0 %v9156_v20  ;;  %v9204_v20 = vcombine.low %v880_v5, %v884_v6  ;;  %v928_v5 = vld [vmem:[%s13247_s1 + $0x1c40] sm:$0xff] }
 0x19b   :  { %6911 = vmatpush1.bf16.msra.mxu1 %v9158_v21  ;;  %6584 = vmatprep.subr.bf16.mxu0 %v9165_v22  ;;  %v9206_v21 = vcombine.low %v881_v7, %v885_v10  ;;  %v9213_v22 = vcombine.high %v888_v14, %v892_v16  ;;  %v932_v6 = vld [vmem:[%s13247_s1 + $0x1c60] sm:$0xff]  ;;  %v11248_v7 = vrot.slane %v11027_v15, %v9850_v53  ;;  %v929_v10 = vld [vmem:[%s13247_s1 + $0x1c48] sm:$0xff] }
 0x19c   :  { %6912 = vmatprep.subr.bf16.mxu1 %v9167_v24  ;;  %v9215_v24 = vcombine.high %v889_v17, %v893_v18  ;;  %v936_v53 = vld [vmem:[%s13247_s1 + $0x1c80] sm:$0xff] }
 0x19d   :  { %v940_v15 = vld [vmem:[%s13247_s1 + $0x1ca0] sm:$0xff] }
 0x19e   :  { %6585 = vmatpush1.bf16.msra.mxu0 %v9164_v30  ;;  %v9212_v30 = vcombine.low %v888_v14, %v892_v16  ;;  %v11264_v16 = vcombine.high %v11060_v37, %v11060_v37 }
 0x19f   :  { %6913 = vmatpush1.bf16.msra.mxu1 %v9166_v31  ;;  %6586 = vmatprep.subr.bf16.mxu0 %v9173_v32  ;;  %v9214_v31 = vcombine.low %v889_v17, %v893_v18  ;;  %v9221_v32 = vcombine.high %v896_v25, %v900_v26  ;;  %v937_v17 = vld [vmem:[%s13247_s1 + $0x1c88] sm:$0xff] }
 0x1a0   :  { %6914 = vmatprep.subr.bf16.mxu1 %v9175_v34  ;;  %v9223_v34 = vcombine.high %v897_v28, %v901_v29  ;;  %v941_v18 = vld [vmem:[%s13247_s1 + $0x1ca8] sm:$0xff] }
 0x1a2   :  { %6587 = vmatpush1.bf16.msra.mxu0 %v9172_v41  ;;  %v9220_v41 = vcombine.low %v896_v25, %v900_v26  ;;  %v944_v25 = vld [vmem:[%s13247_s1 + $0x1cc0] sm:$0xff] }
 0x1a3   :  { %6915 = vmatpush1.bf16.msra.mxu1 %v9174_v42  ;;  %6588 = vmatprep.subr.bf16.mxu0 %v9181_v44  ;;  %v9222_v42 = vcombine.low %v897_v28, %v901_v29  ;;  %v9229_v44 = vcombine.high %v904_v35, %v908_v36  ;;  %v948_v26 = vld [vmem:[%s13247_s1 + $0x1ce0] sm:$0xff]  ;;  %v945_v28 = vld [vmem:[%s13247_s1 + $0x1cc8] sm:$0xff] }
 0x1a4   :  { %6916 = vmatprep.subr.bf16.mxu1 %v9183_v45  ;;  %v9231_v45 = vcombine.high %v905_v38, %v909_v39  ;;  %v949_v29 = vld [vmem:[%s13247_s1 + $0x1ce8] sm:$0xff] }
 0x1a6   :  { %6589 = vmatpush1.bf16.msra.mxu0 %v9180_v52  ;;  %v9228_v52 = vcombine.low %v904_v35, %v908_v36  ;;  %v952_v35 = vld [vmem:[%s13247_s1 + $0x1d00] sm:$0xff] }
 0x1a7   :  { %6917 = vmatpush1.bf16.msra.mxu1 %v9182_v54  ;;  %6590 = vmatprep.subr.bf16.mxu0 %v9189_v55  ;;  %v9230_v54 = vcombine.low %v905_v38, %v909_v39  ;;  %v9237_v55 = vcombine.high %v912_v46, %v916_v47  ;;  %v956_v36 = vld [vmem:[%s13247_s1 + $0x1d20] sm:$0xff]  ;;  %v953_v38 = vld [vmem:[%s13247_s1 + $0x1d08] sm:$0xff] }
 0x1a8   :  { %6918 = vmatprep.subr.bf16.mxu1 %v9191_v56  ;;  %v9239_v56 = vcombine.high %v913_v49, %v917_v50  ;;  %v957_v39 = vld [vmem:[%s13247_s1 + $0x1d28] sm:$0xff] }
 0x1aa   :  { %6591 = vmatpush1.bf16.msra.mxu0 %v9188_v0  ;;  %v9236_v0 = vcombine.low %v912_v46, %v916_v47  ;;  %v960_v46 = vld [vmem:[%s13247_s1 + $0x1d40] sm:$0xff] }
 0x1ab   :  { %6919 = vmatpush1.bf16.msra.mxu1 %v9190_v2  ;;  %6592 = vmatprep.subr.bf16.mxu0 %v9197_v63  ;;  %v9238_v2 = vcombine.low %v913_v49, %v917_v50  ;;  %v9245_v63 = vcombine.high %v920_v57, %v924_v60  ;;  %v964_v47 = vld [vmem:[%s13247_s1 + $0x1d60] sm:$0xff]  ;;  %v961_v49 = vld [vmem:[%s13247_s1 + $0x1d48] sm:$0xff] }
 0x1ac   :  { %6920 = vmatprep.subr.bf16.mxu1 %v9199_v3  ;;  %v9247_v3 = vcombine.high %v921_v8, %v925_v61  ;;  %v965_v50 = vld [vmem:[%s13247_s1 + $0x1d68] sm:$0xff] }
 0x1ae   :  { %6593 = vmatpush1.bf16.msra.mxu0 %v9196_v11  ;;  %v933_v11 = vld [vmem:[%s13247_s1 + $0x1c68] sm:$0xff] }
 0x1af   :  { %6921 = vmatpush1.bf16.msra.mxu1 %v9198_v12  ;;  %6594 = vmatprep.subr.bf16.mxu0 %v9205_v13  ;;  %v9244_v12 = vcombine.low %v920_v57, %v924_v60  ;;  %v9246_v13 = vcombine.low %v921_v8, %v925_v61  ;;  %v9255_v14 = vcombine.high %v929_v10, %v933_v11  ;;  %v968_v57 = vld [vmem:[%s13247_s1 + $0x1d80] sm:$0xff]  ;;  %v969_v8 = vld [vmem:[%s13247_s1 + $0x1d88] sm:$0xff] }
 0x1b0   :  { %6922 = vmatprep.subr.bf16.mxu1 %v9207_v1  ;;  %v9253_v1 = vcombine.high %v928_v5, %v932_v6  ;;  %v972_v60 = vld [vmem:[%s13247_s1 + $0x1da0] sm:$0xff]  ;;  %v973_v61 = vld [vmem:[%s13247_s1 + $0x1da8] sm:$0xff] }
 0x1b2   :  { %6595 = vmatpush1.bf16.msra.mxu0 %v9204_v20  ;;  %v9252_v20 = vcombine.low %v928_v5, %v932_v6  ;;  %v976_v5 = vld [vmem:[%s13247_s1 + $0x1dc0] sm:$0xff] }
 0x1b3   :  { %6923 = vmatpush1.bf16.msra.mxu1 %v9206_v21  ;;  %6596 = vmatprep.subr.bf16.mxu0 %v9213_v22  ;;  %v9254_v21 = vcombine.low %v929_v10, %v933_v11  ;;  %v9261_v22 = vcombine.high %v936_v53, %v940_v15  ;;  %v980_v6 = vld [vmem:[%s13247_s1 + $0x1de0] sm:$0xff]  ;;  %v977_v10 = vld [vmem:[%s13247_s1 + $0x1dc8] sm:$0xff] }
 0x1b4   :  { %6924 = vmatprep.subr.bf16.mxu1 %v9215_v24  ;;  %v9263_v24 = vcombine.high %v937_v17, %v941_v18  ;;  %v981_v11 = vld [vmem:[%s13247_s1 + $0x1de8] sm:$0xff] }
 0x1b6   :  { %6597 = vmatpush1.bf16.msra.mxu0 %v9212_v30  ;;  %v9260_v30 = vcombine.low %v936_v53, %v940_v15  ;;  %v984_v53 = vld [vmem:[%s13247_s1 + $0x1e00] sm:$0xff] }
 0x1b7   :  { %6925 = vmatpush1.bf16.msra.mxu1 %v9214_v31  ;;  %6598 = vmatprep.subr.bf16.mxu0 %v9221_v32  ;;  %v9262_v31 = vcombine.low %v937_v17, %v941_v18  ;;  %v9269_v32 = vcombine.high %v944_v25, %v948_v26  ;;  %v988_v15 = vld [vmem:[%s13247_s1 + $0x1e20] sm:$0xff]  ;;  %v985_v17 = vld [vmem:[%s13247_s1 + $0x1e08] sm:$0xff] }
 0x1b8   :  { %6926 = vmatprep.subr.bf16.mxu1 %v9223_v34  ;;  %v9271_v34 = vcombine.high %v945_v28, %v949_v29  ;;  %v989_v18 = vld [vmem:[%s13247_s1 + $0x1e28] sm:$0xff] }
 0x1ba   :  { %6599 = vmatpush1.bf16.msra.mxu0 %v9220_v41  ;;  %v9268_v41 = vcombine.low %v944_v25, %v948_v26  ;;  %v992_v25 = vld [vmem:[%s13247_s1 + $0x1e40] sm:$0xff] }
 0x1bb   :  { %6927 = vmatpush1.bf16.msra.mxu1 %v9222_v42  ;;  %6600 = vmatprep.subr.bf16.mxu0 %v9229_v44  ;;  %v9270_v42 = vcombine.low %v945_v28, %v949_v29  ;;  %v9277_v44 = vcombine.high %v952_v35, %v956_v36  ;;  %v996_v26 = vld [vmem:[%s13247_s1 + $0x1e60] sm:$0xff]  ;;  %v993_v28 = vld [vmem:[%s13247_s1 + $0x1e48] sm:$0xff] }
 0x1bc   :  { %6928 = vmatprep.subr.bf16.mxu1 %v9231_v45  ;;  %v9279_v45 = vcombine.high %v953_v38, %v957_v39  ;;  %v997_v29 = vld [vmem:[%s13247_s1 + $0x1e68] sm:$0xff] }
 0x1be   :  { %6601 = vmatpush1.bf16.msra.mxu0 %v9228_v52  ;;  %v9276_v52 = vcombine.low %v952_v35, %v956_v36  ;;  %v1000_v35 = vld [vmem:[%s13247_s1 + $0x1e80] sm:$0xff] }
 0x1bf   :  { %6929 = vmatpush1.bf16.msra.mxu1 %v9230_v54  ;;  %6602 = vmatprep.subr.bf16.mxu0 %v9237_v55  ;;  %v9278_v54 = vcombine.low %v953_v38, %v957_v39  ;;  %v9285_v55 = vcombine.high %v960_v46, %v964_v47  ;;  %v1004_v36 = vld [vmem:[%s13247_s1 + $0x1ea0] sm:$0xff]  ;;  %v1001_v38 = vld [vmem:[%s13247_s1 + $0x1e88] sm:$0xff] }
 0x1c0   :  { %6930 = vmatprep.subr.bf16.mxu1 %v9239_v56  ;;  %v9287_v56 = vcombine.high %v961_v49, %v965_v50  ;;  %v1005_v39 = vld [vmem:[%s13247_s1 + $0x1ea8] sm:$0xff] }
 0x1c2   :  { %6603 = vmatpush1.bf16.msra.mxu0 %v9236_v0  ;;  %v9284_v0 = vcombine.low %v960_v46, %v964_v47  ;;  %v1008_v46 = vld [vmem:[%s13247_s1 + $0x1ec0] sm:$0xff] }
 0x1c3   :  { %6931 = vmatpush1.bf16.msra.mxu1 %v9238_v2  ;;  %6613 = vmatprep.subr.bf16.mxu0 %v9245_v63  ;;  %v9286_v2 = vcombine.low %v961_v49, %v965_v50  ;;  %v9293_v63 = vcombine.high %v968_v57, %v972_v60  ;;  %v1012_v47 = vld [vmem:[%s13247_s1 + $0x1ee0] sm:$0xff]  ;;  %v1009_v49 = vld [vmem:[%s13247_s1 + $0x1ec8] sm:$0xff] }
 0x1c4   :  { %6941 = vmatprep.subr.bf16.mxu1 %v9247_v3  ;;  %v9295_v3 = vcombine.high %v969_v8, %v973_v61  ;;  %v1013_v50 = vld [vmem:[%s13247_s1 + $0x1ee8] sm:$0xff] }
 0x1c5   :  { %6605 = vmatmul.mubr.bf16.vlgmr.msra.gmra.mrb[0].mxu0 %v11248_v7 }
 0x1c6   :  { %6614 = vmatpush1.bf16.msra.mxu0 %v9244_v12  ;;  %6933 = vmatmul.mubr.bf16.vlgmr.msra.gmra.mrb[0].mxu1 %v11248_v7  ;;  %v9292_v12 = vcombine.low %v968_v57, %v972_v60  ;;  %v1016_v57 = vld [vmem:[%s13247_s1 + $0x1f00] sm:$0xff] }
 0x1c7   :  { %6942 = vmatpush1.bf16.msra.mxu1 %v9246_v13  ;;  %6615 = vmatprep.subr.bf16.mxu0 %v9253_v1  ;;  %v9294_v13 = vcombine.low %v969_v8, %v973_v61  ;;  %v9301_v1 = vcombine.high %v976_v5, %v980_v6  ;;  %v1020_v60 = vld [vmem:[%s13247_s1 + $0x1f20] sm:$0xff]  ;;  %v1017_v8 = vld [vmem:[%s13247_s1 + $0x1f08] sm:$0xff] }
 0x1c8   :  { %6943 = vmatprep.subr.bf16.mxu1 %v9255_v14  ;;  %6645 = vmatprep.mubr.bf16.mxu0 %v11264_v16  ;;  %v9303_v14 = vcombine.high %v977_v10, %v981_v11  ;;  %v1021_v61 = vld [vmem:[%s13247_s1 + $0x1f28] sm:$0xff] }
 0x1c9   :  { %6973 = vmatprep.mubr.bf16.mxu1 %v11264_v16 }
 0x1ca   :  { %6616 = vmatpush1.bf16.msra.mxu0 %v9252_v20  ;;  %v9300_v20 = vcombine.low %v976_v5, %v980_v6  ;;  %v1024_v5 = vld [vmem:[%s13247_s1 + $0x1f40] sm:$0xff] }
 0x1cb   :  { %6944 = vmatpush1.bf16.msra.mxu1 %v9254_v21  ;;  %6617 = vmatprep.subr.bf16.mxu0 %v9261_v22  ;;  %v9302_v21 = vcombine.low %v977_v10, %v981_v11  ;;  %v9309_v22 = vcombine.high %v984_v53, %v988_v15  ;;  %v1028_v6 = vld [vmem:[%s13247_s1 + $0x1f60] sm:$0xff]  ;;  %v1025_v10 = vld [vmem:[%s13247_s1 + $0x1f48] sm:$0xff] }
 0x1cc   :  { %6945 = vmatprep.subr.bf16.mxu1 %v9263_v24  ;;  %v9311_v24 = vcombine.high %v985_v17, %v989_v18  ;;  %v1029_v11 = vld [vmem:[%s13247_s1 + $0x1f68] sm:$0xff] }
 0x1ce   :  { %6618 = vmatpush1.bf16.msra.mxu0 %v9260_v30  ;;  %v9308_v30 = vcombine.low %v984_v53, %v988_v15  ;;  %v1032_v53 = vld [vmem:[%s13247_s1 + $0x1f80] sm:$0xff] }
 0x1cf   :  { %6946 = vmatpush1.bf16.msra.mxu1 %v9262_v31  ;;  %6619 = vmatprep.subr.bf16.mxu0 %v9269_v32  ;;  %v9310_v31 = vcombine.low %v985_v17, %v989_v18  ;;  %v9317_v32 = vcombine.high %v992_v25, %v996_v26  ;;  %v1036_v15 = vld [vmem:[%s13247_s1 + $0x1fa0] sm:$0xff]  ;;  %v1033_v17 = vld [vmem:[%s13247_s1 + $0x1f88] sm:$0xff] }
 0x1d0   :  { %6947 = vmatprep.subr.bf16.mxu1 %v9271_v34  ;;  %v9319_v34 = vcombine.high %v993_v28, %v997_v29  ;;  %v1037_v18 = vld [vmem:[%s13247_s1 + $0x1fa8] sm:$0xff] }
 0x1d2   :  { %6620 = vmatpush1.bf16.msra.mxu0 %v9268_v41  ;;  %v9316_v41 = vcombine.low %v992_v25, %v996_v26  ;;  %v1040_v25 = vld [vmem:[%s13247_s1 + $0x1fc0] sm:$0xff] }
 0x1d3   :  { %6948 = vmatpush1.bf16.msra.mxu1 %v9270_v42  ;;  %6621 = vmatprep.subr.bf16.mxu0 %v9277_v44  ;;  %v9318_v42 = vcombine.low %v993_v28, %v997_v29  ;;  %v9325_v44 = vcombine.high %v1000_v35, %v1004_v36  ;;  %v1044_v26 = vld [vmem:[%s13247_s1 + $0x1fe0] sm:$0xff]  ;;  %v1041_v28 = vld [vmem:[%s13247_s1 + $0x1fc8] sm:$0xff] }
 0x1d4   :  { %6949 = vmatprep.subr.bf16.mxu1 %v9279_v45  ;;  %v9327_v45 = vcombine.high %v1001_v38, %v1005_v39  ;;  %v1045_v29 = vld [vmem:[%s13247_s1 + $0x1fe8] sm:$0xff] }
 0x1d6   :  { %6622 = vmatpush1.bf16.msra.mxu0 %v9276_v52  ;;  %v9324_v52 = vcombine.low %v1000_v35, %v1004_v36  ;;  %v26_v35 = vld [vmem:[%s13247_s1 + $0x10] sm:$0xff] }
 0x1d7   :  { %6950 = vmatpush1.bf16.msra.mxu1 %v9278_v54  ;;  %6623 = vmatprep.subr.bf16.mxu0 %v9285_v55  ;;  %v9326_v54 = vcombine.low %v1001_v38, %v1005_v39  ;;  %v9333_v55 = vcombine.high %v1008_v46, %v1012_v47  ;;  %v30_v36 = vld [vmem:[%s13247_s1 + $0x30] sm:$0xff]  ;;  %v27_v38 = vld [vmem:[%s13247_s1 + $0x18] sm:$0xff] }
 0x1d8   :  { %6951 = vmatprep.subr.bf16.mxu1 %v9287_v56  ;;  %v9335_v56 = vcombine.high %v1009_v49, %v1013_v50  ;;  %v31_v39 = vld [vmem:[%s13247_s1 + $0x38] sm:$0xff] }
 0x1da   :  { %6624 = vmatpush1.bf16.msra.mxu0 %v9284_v0  ;;  %v9332_v0 = vcombine.low %v1008_v46, %v1012_v47  ;;  %v34_v46 = vld [vmem:[%s13247_s1 + $0x50] sm:$0xff] }
 0x1db   :  { %6952 = vmatpush1.bf16.msra.mxu1 %v9286_v2  ;;  %6625 = vmatprep.subr.bf16.mxu0 %v9293_v63  ;;  %v9334_v2 = vcombine.low %v1009_v49, %v1013_v50  ;;  %v9341_v63 = vcombine.high %v1016_v57, %v1020_v60  ;;  %v38_v47 = vld [vmem:[%s13247_s1 + $0x70] sm:$0xff]  ;;  %v11452_v49 = vcombine.high %v11248_v7, %v11248_v7  ;;  %v35_v50 = vld [vmem:[%s13247_s1 + $0x58] sm:$0xff] }
 0x1dc   :  { %6953 = vmatprep.subr.bf16.mxu1 %v9295_v3  ;;  %v9343_v3 = vcombine.high %v1017_v8, %v1021_v61 }
 0x1de   :  { %6626 = vmatpush1.bf16.msra.mxu0 %v9292_v12  ;;  %v9340_v12 = vcombine.low %v1016_v57, %v1020_v60  ;;  %v42_v60 = vld [vmem:[%s13247_s1 + $0x90] sm:$0xff] }
 0x1df   :  { %6954 = vmatpush1.bf16.msra.mxu1 %v9294_v13  ;;  %6627 = vmatprep.subr.bf16.mxu0 %v9301_v1  ;;  %v9342_v13 = vcombine.low %v1017_v8, %v1021_v61  ;;  %v9349_v1 = vcombine.high %v1024_v5, %v1028_v6  ;;  %v46_v8 = vld [vmem:[%s13247_s1 + $0xb0] sm:$0xff]  ;;  %v43_v61 = vld [vmem:[%s13247_s1 + $0x98] sm:$0xff] }
 0x1e0   :  { %6955 = vmatprep.subr.bf16.mxu1 %v9303_v14  ;;  %v9351_v14 = vcombine.high %v1025_v10, %v1029_v11 }
 0x1e2   :  { %6628 = vmatpush1.bf16.msra.mxu0 %v9300_v20  ;;  %v9348_v20 = vcombine.low %v1024_v5, %v1028_v6  ;;  %v50_v6 = vld [vmem:[%s13247_s1 + $0xd0] sm:$0xff] }
 0x1e3   :  { %6956 = vmatpush1.bf16.msra.mxu1 %v9302_v21  ;;  %6629 = vmatprep.subr.bf16.mxu0 %v9309_v22  ;;  %v9350_v21 = vcombine.low %v1025_v10, %v1029_v11  ;;  %v9357_v22 = vcombine.high %v1032_v53, %v1036_v15  ;;  %v54_v10 = vld [vmem:[%s13247_s1 + $0xf0] sm:$0xff]  ;;  %v51_v11 = vld [vmem:[%s13247_s1 + $0xd8] sm:$0xff] }
 0x1e4   :  { %6957 = vmatprep.subr.bf16.mxu1 %v9311_v24  ;;  %v9359_v24 = vcombine.high %v1033_v17, %v1037_v18 }
 0x1e6   :  { %6630 = vmatpush1.bf16.msra.mxu0 %v9308_v30  ;;  %v9356_v30 = vcombine.low %v1032_v53, %v1036_v15  ;;  %v58_v15 = vld [vmem:[%s13247_s1 + $0x110] sm:$0xff] }
 0x1e7   :  { %6958 = vmatpush1.bf16.msra.mxu1 %v9310_v31  ;;  %6631 = vmatprep.subr.bf16.mxu0 %v9317_v32  ;;  %v9358_v31 = vcombine.low %v1033_v17, %v1037_v18  ;;  %v9365_v32 = vcombine.high %v1040_v25, %v1044_v26  ;;  %v62_v17 = vld [vmem:[%s13247_s1 + $0x130] sm:$0xff]  ;;  %v63_v18 = vld [vmem:[%s13247_s1 + $0x138] sm:$0xff] }
 0x1e8   :  { %6959 = vmatprep.subr.bf16.mxu1 %v9319_v34  ;;  %v9367_v34 = vcombine.high %v1041_v28, %v1045_v29 }
 0x1ea   :  { %6632 = vmatpush1.bf16.msra.mxu0 %v9316_v41  ;;  %v9364_v41 = vcombine.low %v1040_v25, %v1044_v26  ;;  %v66_v25 = vld [vmem:[%s13247_s1 + $0x150] sm:$0xff] }
 0x1eb   :  { %6960 = vmatpush1.bf16.msra.mxu1 %v9318_v42  ;;  %6633 = vmatprep.subr.bf16.mxu0 %v9325_v44  ;;  %v9366_v42 = vcombine.low %v1041_v28, %v1045_v29  ;;  %v8353_v44 = vcombine.high %v26_v35, %v30_v36  ;;  %v70_v26 = vld [vmem:[%s13247_s1 + $0x170] sm:$0xff]  ;;  %v67_v28 = vld [vmem:[%s13247_s1 + $0x158] sm:$0xff] }
 0x1ec   :  { %6961 = vmatprep.subr.bf16.mxu1 %v9327_v45  ;;  %v8355_v45 = vcombine.high %v27_v38, %v31_v39  ;;  %v71_v29 = vld [vmem:[%s13247_s1 + $0x178] sm:$0xff] }
 0x1ee   :  { %6634 = vmatpush1.bf16.msra.mxu0 %v9324_v52  ;;  %v39_v52 = vld [vmem:[%s13247_s1 + $0x78] sm:$0xff] }
 0x1ef   :  { %6962 = vmatpush1.bf16.msra.mxu1 %v9326_v54  ;;  %6635 = vmatprep.subr.bf16.mxu0 %v9333_v55  ;;  %v8352_v54 = vcombine.low %v26_v35, %v30_v36  ;;  %v8354_v55 = vcombine.low %v27_v38, %v31_v39  ;;  %v8363_v57 = vcombine.high %v35_v50, %v39_v52  ;;  %v74_v35 = vld [vmem:[%s13247_s1 + $0x190] sm:$0xff]  ;;  %v75_v38 = vld [vmem:[%s13247_s1 + $0x198] sm:$0xff] }
 0x1f0   :  { %6963 = vmatprep.subr.bf16.mxu1 %v9335_v56  ;;  %v8361_v56 = vcombine.high %v34_v46, %v38_v47  ;;  %v78_v36 = vld [vmem:[%s13247_s1 + $0x1b0] sm:$0xff]  ;;  %v79_v39 = vld [vmem:[%s13247_s1 + $0x1b8] sm:$0xff] }
 0x1f2   :  { %6636 = vmatpush1.bf16.msra.mxu0 %v9332_v0  ;;  %v47_v0 = vld [vmem:[%s13247_s1 + $0xb8] sm:$0xff] }
 0x1f3   :  { %6964 = vmatpush1.bf16.msra.mxu1 %v9334_v2  ;;  %6637 = vmatprep.subr.bf16.mxu0 %v9341_v63  ;;  %v8360_v2 = vcombine.low %v34_v46, %v38_v47  ;;  %v8362_v63 = vcombine.low %v35_v50, %v39_v52  ;;  %v8371_v5 = vcombine.high %v43_v61, %v47_v0  ;;  %v82_v46 = vld [vmem:[%s13247_s1 + $0x1d0] sm:$0xff]  ;;  %v83_v50 = vld [vmem:[%s13247_s1 + $0x1d8] sm:$0xff] }
 0x1f4   :  { %6965 = vmatprep.subr.bf16.mxu1 %v9343_v3  ;;  %v8369_v3 = vcombine.high %v42_v60, %v46_v8  ;;  %v86_v47 = vld [vmem:[%s13247_s1 + $0x1f0] sm:$0xff]  ;;  %v87_v52 = vld [vmem:[%s13247_s1 + $0x1f8] sm:$0xff] }
 0x1f6   :  { %6638 = vmatpush1.bf16.msra.mxu0 %v9340_v12  ;;  %v55_v12 = vld [vmem:[%s13247_s1 + $0xf8] sm:$0xff] }
 0x1f7   :  { %6966 = vmatpush1.bf16.msra.mxu1 %v9342_v13  ;;  %6639 = vmatprep.subr.bf16.mxu0 %v9349_v1  ;;  %v8368_v13 = vcombine.low %v42_v60, %v46_v8  ;;  %v8370_v1 = vcombine.low %v43_v61, %v47_v0  ;;  %v8379_v53 = vcombine.high %v51_v11, %v55_v12  ;;  %v90_v60 = vld [vmem:[%s13247_s1 + $0x210] sm:$0xff]  ;;  %v91_v61 = vld [vmem:[%s13247_s1 + $0x218] sm:$0xff] }
 0x1f8   :  { %6967 = vmatprep.subr.bf16.mxu1 %v9351_v14  ;;  %v8377_v14 = vcombine.high %v50_v6, %v54_v10  ;;  %v94_v8 = vld [vmem:[%s13247_s1 + $0x230] sm:$0xff]  ;;  %v95_v0 = vld [vmem:[%s13247_s1 + $0x238] sm:$0xff] }
 0x1fa   :  { %6640 = vmatpush1.bf16.msra.mxu0 %v9348_v20  ;;  %v8376_v20 = vcombine.low %v50_v6, %v54_v10  ;;  %v98_v6 = vld [vmem:[%s13247_s1 + $0x250] sm:$0xff] }
 0x1fb   :  { %6968 = vmatpush1.bf16.msra.mxu1 %v9350_v21  ;;  %6641 = vmatprep.subr.bf16.mxu0 %v9357_v22  ;;  %v8378_v21 = vcombine.low %v51_v11, %v55_v12  ;;  %v8385_v22 = vcombine.high %v58_v15, %v62_v17  ;;  %v102_v10 = vld [vmem:[%s13247_s1 + $0x270] sm:$0xff]  ;;  %v99_v11 = vld [vmem:[%s13247_s1 + $0x258] sm:$0xff] }
 0x1fc   :  { %6969 = vmatprep.subr.bf16.mxu1 %v9359_v24  ;;  %v103_v12 = vld [vmem:[%s13247_s1 + $0x278] sm:$0xff] }
 0x1fe   :  { %6642 = vmatpush1.bf16.msra.mxu0 %v9356_v30  ;;  %v8384_v30 = vcombine.low %v58_v15, %v62_v17  ;;  %v106_v15 = vld [vmem:[%s13247_s1 + $0x290] sm:$0xff] }
 0x1ff   :  { %6970 = vmatpush1.bf16.msra.mxu1 %v9358_v31  ;;  %6643 = vmatprep.subr.bf16.mxu0 %v9365_v32  ;;  %v8393_v32 = vcombine.high %v66_v25, %v70_v26  ;;  %v110_v17 = vld [vmem:[%s13247_s1 + $0x2b0] sm:$0xff] }
 0x200   :  { %6971 = vmatprep.subr.bf16.mxu1 %v9367_v34  ;;  %v8395_v34 = vcombine.high %v67_v28, %v71_v29 }
 0x202   :  { %6644 = vmatpush1.bf16.msra.mxu0 %v9364_v41  ;;  %v8392_v41 = vcombine.low %v66_v25, %v70_v26  ;;  %v114_v25 = vld [vmem:[%s13247_s1 + $0x2d0] sm:$0xff] }
 0x203   :  { %6972 = vmatpush1.bf16.msra.mxu1 %v9366_v42  ;;  %6982 = vmatprep.subr.bf16.mxu0 %v8353_v44  ;;  %v8394_v42 = vcombine.low %v67_v28, %v71_v29  ;;  %v8401_v44 = vcombine.high %v74_v35, %v78_v36  ;;  %v118_v26 = vld [vmem:[%s13247_s1 + $0x2f0] sm:$0xff]  ;;  %v115_v28 = vld [vmem:[%s13247_s1 + $0x2d8] sm:$0xff] }
 0x204   :  { %7310 = vmatprep.subr.bf16.mxu1 %v8355_v45  ;;  %v8403_v45 = vcombine.high %v75_v38, %v79_v39  ;;  %v119_v29 = vld [vmem:[%s13247_s1 + $0x2f8] sm:$0xff] }
 0x205   :  { %6646 = vmatmul.mubr.bf16.vlgmr.msra.gmra.mrb[0].mxu0 %v11452_v49 }
 0x206   :  { %6974 = vmatmul.mubr.bf16.vlgmr.msra.gmra.mrb[0].mxu1 %v11452_v49  ;;  %6983 = vmatpush1.bf16.msra.mxu0 %v8352_v54  ;;  %v8400_v54 = vcombine.low %v74_v35, %v78_v36  ;;  %v122_v35 = vld [vmem:[%s13247_s1 + $0x310] sm:$0xff] }
 0x207   :  { %7311 = vmatpush1.bf16.msra.mxu1 %v8354_v55  ;;  %6984 = vmatprep.subr.bf16.mxu0 %v8361_v56  ;;  %v8402_v55 = vcombine.low %v75_v38, %v79_v39  ;;  %v8409_v56 = vcombine.high %v82_v46, %v86_v47  ;;  %v126_v36 = vld [vmem:[%s13247_s1 + $0x330] sm:$0xff]  ;;  %v123_v38 = vld [vmem:[%s13247_s1 + $0x318] sm:$0xff] }
 0x208   :  { %7312 = vmatprep.subr.bf16.mxu1 %v8363_v57  ;;  %7014 = vmatprep.mubr.bf16.mxu0 %v9888_v9  ;;  %v8411_v57 = vcombine.high %v83_v50, %v87_v52  ;;  %v127_v39 = vld [vmem:[%s13247_s1 + $0x338] sm:$0xff] }
 0x209   :  { %7342 = vmatprep.mubr.bf16.mxu1 %v9888_v9  ;;  %v59_v9 = vld [vmem:[%s13247_s1 + $0x118] sm:$0xff] }
 0x20a   :  { %6985 = vmatpush1.bf16.msra.mxu0 %v8360_v2  ;;  %v8387_v24 = vcombine.high %v59_v9, %v63_v18  ;;  %v8386_v31 = vcombine.low %v59_v9, %v63_v18  ;;  %v8408_v2 = vcombine.low %v82_v46, %v86_v47  ;;  %v107_v9 = vld [vmem:[%s13247_s1 + $0x298] sm:$0xff]  ;;  %v130_v46 = vld [vmem:[%s13247_s1 + $0x350] sm:$0xff] }
 0x20b   :  { %7313 = vmatpush1.bf16.msra.mxu1 %v8362_v63  ;;  %6986 = vmatprep.subr.bf16.mxu0 %v8369_v3  ;;  %v8410_v63 = vcombine.low %v83_v50, %v87_v52  ;;  %v8417_v3 = vcombine.high %v90_v60, %v94_v8  ;;  %v111_v18 = vld [vmem:[%s13247_s1 + $0x2b8] sm:$0xff]  ;;  %v134_v47 = vld [vmem:[%s13247_s1 + $0x370] sm:$0xff] }
 0x20c   :  { %7314 = vmatprep.subr.bf16.mxu1 %v8371_v5  ;;  %v8419_v5 = vcombine.high %v91_v61, %v95_v0  ;;  %v131_v50 = vld [vmem:[%s13247_s1 + $0x358] sm:$0xff] }
 0x20d   :  { %v135_v52 = vld [vmem:[%s13247_s1 + $0x378] sm:$0xff] }
 0x20e   :  { %6987 = vmatpush1.bf16.msra.mxu0 %v8368_v13  ;;  %v8416_v13 = vcombine.low %v90_v60, %v94_v8  ;;  %v138_v60 = vld [vmem:[%s13247_s1 + $0x390] sm:$0xff] }
 0x20f   :  { %7315 = vmatpush1.bf16.msra.mxu1 %v8370_v1  ;;  %6988 = vmatprep.subr.bf16.mxu0 %v8377_v14  ;;  %v8418_v1 = vcombine.low %v91_v61, %v95_v0  ;;  %v8425_v14 = vcombine.high %v98_v6, %v102_v10  ;;  %v142_v8 = vld [vmem:[%s13247_s1 + $0x3b0] sm:$0xff]  ;;  %v139_v61 = vld [vmem:[%s13247_s1 + $0x398] sm:$0xff] }
 0x210   :  { %7316 = vmatprep.subr.bf16.mxu1 %v8379_v53  ;;  %v8427_v53 = vcombine.high %v99_v11, %v103_v12  ;;  %v143_v0 = vld [vmem:[%s13247_s1 + $0x3b8] sm:$0xff] }
 0x212   :  { %6989 = vmatpush1.bf16.msra.mxu0 %v8376_v20  ;;  %v8424_v20 = vcombine.low %v98_v6, %v102_v10  ;;  %v146_v6 = vld [vmem:[%s13247_s1 + $0x3d0] sm:$0xff] }
 0x213   :  { %7317 = vmatpush1.bf16.msra.mxu1 %v8378_v21  ;;  %6990 = vmatprep.subr.bf16.mxu0 %v8385_v22  ;;  %v8426_v21 = vcombine.low %v99_v11, %v103_v12  ;;  %v8433_v22 = vcombine.high %v106_v15, %v110_v17  ;;  %v150_v10 = vld [vmem:[%s13247_s1 + $0x3f0] sm:$0xff]  ;;  %v147_v11 = vld [vmem:[%s13247_s1 + $0x3d8] sm:$0xff] }
 0x214   :  { %7318 = vmatprep.subr.bf16.mxu1 %v8387_v24  ;;  %v8435_v24 = vcombine.high %v107_v9, %v111_v18  ;;  %v151_v12 = vld [vmem:[%s13247_s1 + $0x3f8] sm:$0xff] }
 0x216   :  { %6991 = vmatpush1.bf16.msra.mxu0 %v8384_v30  ;;  %v8432_v30 = vcombine.low %v106_v15, %v110_v17  ;;  %v154_v15 = vld [vmem:[%s13247_s1 + $0x410] sm:$0xff] }
 0x217   :  { %7319 = vmatpush1.bf16.msra.mxu1 %v8386_v31  ;;  %6992 = vmatprep.subr.bf16.mxu0 %v8393_v32  ;;  %v8434_v31 = vcombine.low %v107_v9, %v111_v18  ;;  %v8441_v32 = vcombine.high %v114_v25, %v118_v26  ;;  %v158_v17 = vld [vmem:[%s13247_s1 + $0x430] sm:$0xff]  ;;  %v155_v9 = vld [vmem:[%s13247_s1 + $0x418] sm:$0xff] }
 0x218   :  { %7320 = vmatprep.subr.bf16.mxu1 %v8395_v34  ;;  %v8443_v34 = vcombine.high %v115_v28, %v119_v29  ;;  %v159_v18 = vld [vmem:[%s13247_s1 + $0x438] sm:$0xff] }
 0x21a   :  { %6993 = vmatpush1.bf16.msra.mxu0 %v8392_v41  ;;  %v8440_v41 = vcombine.low %v114_v25, %v118_v26  ;;  %v162_v25 = vld [vmem:[%s13247_s1 + $0x450] sm:$0xff] }
 0x21b   :  { %7321 = vmatpush1.bf16.msra.mxu1 %v8394_v42  ;;  %6994 = vmatprep.subr.bf16.mxu0 %v8401_v44  ;;  %v8442_v42 = vcombine.low %v115_v28, %v119_v29  ;;  %v8449_v44 = vcombine.high %v122_v35, %v126_v36  ;;  %v166_v26 = vld [vmem:[%s13247_s1 + $0x470] sm:$0xff]  ;;  %v163_v28 = vld [vmem:[%s13247_s1 + $0x458] sm:$0xff] }
 0x21c   :  { %7322 = vmatprep.subr.bf16.mxu1 %v8403_v45  ;;  %v8451_v45 = vcombine.high %v123_v38, %v127_v39  ;;  %v167_v29 = vld [vmem:[%s13247_s1 + $0x478] sm:$0xff] }
 0x21e   :  { %6995 = vmatpush1.bf16.msra.mxu0 %v8400_v54  ;;  %v8448_v54 = vcombine.low %v122_v35, %v126_v36  ;;  %v170_v35 = vld [vmem:[%s13247_s1 + $0x490] sm:$0xff] }
 0x21f   :  { %7323 = vmatpush1.bf16.msra.mxu1 %v8402_v55  ;;  %6996 = vmatprep.subr.bf16.mxu0 %v8409_v56  ;;  %v8450_v55 = vcombine.low %v123_v38, %v127_v39  ;;  %v8457_v56 = vcombine.high %v130_v46, %v134_v47  ;;  %v174_v36 = vld [vmem:[%s13247_s1 + $0x4b0] sm:$0xff]  ;;  %v171_v38 = vld [vmem:[%s13247_s1 + $0x498] sm:$0xff] }
 0x220   :  { %7324 = vmatprep.subr.bf16.mxu1 %v8411_v57  ;;  %v8459_v57 = vcombine.high %v131_v50, %v135_v52  ;;  %v175_v39 = vld [vmem:[%s13247_s1 + $0x4b8] sm:$0xff] }
 0x222   :  { %6997 = vmatpush1.bf16.msra.mxu0 %v8408_v2  ;;  %v8456_v2 = vcombine.low %v130_v46, %v134_v47  ;;  %v178_v46 = vld [vmem:[%s13247_s1 + $0x4d0] sm:$0xff] }
 0x223   :  { %7325 = vmatpush1.bf16.msra.mxu1 %v8410_v63  ;;  %6998 = vmatprep.subr.bf16.mxu0 %v8417_v3  ;;  %v8458_v63 = vcombine.low %v131_v50, %v135_v52  ;;  %v8465_v3 = vcombine.high %v138_v60, %v142_v8  ;;  %v182_v47 = vld [vmem:[%s13247_s1 + $0x4f0] sm:$0xff]  ;;  %v183_v50 = vld [vmem:[%s13247_s1 + $0x4f8] sm:$0xff]  ;;  %v8496_v52 = vcombine.low %v170_v35, %v174_v36 }
 0x224   :  { %7326 = vmatprep.subr.bf16.mxu1 %v8419_v5  ;;  %v8467_v5 = vcombine.high %v139_v61, %v143_v0 }
 0x226   :  { %6999 = vmatpush1.bf16.msra.mxu0 %v8416_v13  ;;  %v8464_v13 = vcombine.low %v138_v60, %v142_v8  ;;  %v190_v60 = vld [vmem:[%s13247_s1 + $0x530] sm:$0xff]  ;;  %v191_v8 = vld [vmem:[%s13247_s1 + $0x538] sm:$0xff] }
 0x227   :  { %7327 = vmatpush1.bf16.msra.mxu1 %v8418_v1  ;;  %7000 = vmatprep.subr.bf16.mxu0 %v8425_v14  ;;  %v8466_v1 = vcombine.low %v139_v61, %v143_v0  ;;  %v8473_v14 = vcombine.high %v146_v6, %v150_v10  ;;  %v8504_v61 = vcombine.low %v178_v46, %v182_v47 }
 0x228   :  { %7328 = vmatprep.subr.bf16.mxu1 %v8427_v53  ;;  %v8475_v53 = vcombine.high %v147_v11, %v151_v12 }
 0x22a   :  { %7001 = vmatpush1.bf16.msra.mxu0 %v8424_v20  ;;  %v8472_v20 = vcombine.low %v146_v6, %v150_v10  ;;  %v195_v6 = vld [vmem:[%s13247_s1 + $0x558] sm:$0xff] }
 0x22b   :  { %7329 = vmatpush1.bf16.msra.mxu1 %v8426_v21  ;;  %7002 = vmatprep.subr.bf16.mxu0 %v8433_v22  ;;  %v8474_v21 = vcombine.low %v147_v11, %v151_v12  ;;  %v8481_v22 = vcombine.high %v154_v15, %v158_v17  ;;  %v199_v10 = vld [vmem:[%s13247_s1 + $0x578] sm:$0xff] }
 0x22c   :  { %7330 = vmatprep.subr.bf16.mxu1 %v8435_v24  ;;  %v8483_v24 = vcombine.high %v155_v9, %v159_v18 }
 0x22e   :  { %7003 = vmatpush1.bf16.msra.mxu0 %v8432_v30  ;;  %v8480_v30 = vcombine.low %v154_v15, %v158_v17  ;;  %v203_v15 = vld [vmem:[%s13247_s1 + $0x598] sm:$0xff] }
 0x22f   :  { %7331 = vmatpush1.bf16.msra.mxu1 %v8434_v31  ;;  %7004 = vmatprep.subr.bf16.mxu0 %v8441_v32  ;;  %v8482_v31 = vcombine.low %v155_v9, %v159_v18  ;;  %v8489_v32 = vcombine.high %v162_v25, %v166_v26  ;;  %v207_v17 = vld [vmem:[%s13247_s1 + $0x5b8] sm:$0xff]  ;;  %v8522_v18 = vcombine.low %v195_v6, %v199_v10 }
 0x230   :  { %7332 = vmatprep.subr.bf16.mxu1 %v8443_v34  ;;  %v8491_v34 = vcombine.high %v163_v28, %v167_v29 }
 0x232   :  { %7005 = vmatpush1.bf16.msra.mxu0 %v8440_v41  ;;  %v8488_v41 = vcombine.low %v162_v25, %v166_v26  ;;  %v211_v25 = vld [vmem:[%s13247_s1 + $0x5d8] sm:$0xff] }
 0x233   :  { %7333 = vmatpush1.bf16.msra.mxu1 %v8442_v42  ;;  %7006 = vmatprep.subr.bf16.mxu0 %v8449_v44  ;;  %v8490_v42 = vcombine.low %v163_v28, %v167_v29  ;;  %v8497_v44 = vcombine.high %v170_v35, %v174_v36  ;;  %v215_v26 = vld [vmem:[%s13247_s1 + $0x5f8] sm:$0xff]  ;;  %v8530_v29 = vcombine.low %v203_v15, %v207_v17 }
 0x234   :  { %7334 = vmatprep.subr.bf16.mxu1 %v8451_v45  ;;  %v8499_v45 = vcombine.high %v171_v38, %v175_v39  ;;  %v219_v35 = vld [vmem:[%s13247_s1 + $0x618] sm:$0xff] }
 0x235   :  { %v223_v36 = vld [vmem:[%s13247_s1 + $0x638] sm:$0xff] }
 0x236   :  { %7007 = vmatpush1.bf16.msra.mxu0 %v8448_v54  ;;  %v8498_v54 = vcombine.low %v171_v38, %v175_v39  ;;  %v8538_v39 = vcombine.low %v211_v25, %v215_v26 }
 0x237   :  { %7335 = vmatpush1.bf16.msra.mxu1 %v8450_v55  ;;  %7008 = vmatprep.subr.bf16.mxu0 %v8457_v56  ;;  %v8505_v55 = vcombine.high %v178_v46, %v182_v47  ;;  %v227_v46 = vld [vmem:[%s13247_s1 + $0x658] sm:$0xff] }
 0x238   :  { %7336 = vmatprep.subr.bf16.mxu1 %v8459_v57  ;;  %v186_v57 = vld [vmem:[%s13247_s1 + $0x510] sm:$0xff]  ;;  %v231_v47 = vld [vmem:[%s13247_s1 + $0x678] sm:$0xff] }
 0x239   :  { %v8512_v11 = vcombine.low %v186_v57, %v190_v60 }
 0x23a   :  { %7009 = vmatpush1.bf16.msra.mxu0 %v8456_v2  ;;  %v8513_v2 = vcombine.high %v186_v57, %v190_v60  ;;  %v235_v57 = vld [vmem:[%s13247_s1 + $0x698] sm:$0xff] }
 0x23b   :  { %7337 = vmatpush1.bf16.msra.mxu1 %v8458_v63  ;;  %7010 = vmatprep.subr.bf16.mxu0 %v8465_v3  ;;  %v194_v3 = vld [vmem:[%s13247_s1 + $0x550] sm:$0xff]  ;;  %v239_v60 = vld [vmem:[%s13247_s1 + $0x6b8] sm:$0xff] }
 0x23c   :  { %7338 = vmatprep.subr.bf16.mxu1 %v8467_v5  ;;  %v198_v5 = vld [vmem:[%s13247_s1 + $0x570] sm:$0xff] }
 0x23d   :  { %v8520_v9 = vcombine.low %v194_v3, %v198_v5 }
 0x23e   :  { %7011 = vmatpush1.bf16.msra.mxu0 %v8464_v13  ;;  %v8521_v13 = vcombine.high %v194_v3, %v198_v5  ;;  %v243_v3 = vld [vmem:[%s13247_s1 + $0x6d8] sm:$0xff] }
 0x23f   :  { %7339 = vmatpush1.bf16.msra.mxu1 %v8466_v1  ;;  %7012 = vmatprep.subr.bf16.mxu0 %v8473_v14  ;;  %v8523_v1 = vcombine.high %v195_v6, %v199_v10  ;;  %v202_v14 = vld [vmem:[%s13247_s1 + $0x590] sm:$0xff]  ;;  %v247_v5 = vld [vmem:[%s13247_s1 + $0x6f8] sm:$0xff]  ;;  %v8562_v10 = vcombine.low %v235_v57, %v239_v60 }
 0x240   :  { %7340 = vmatprep.subr.bf16.mxu1 %v8475_v53  ;;  %v206_v53 = vld [vmem:[%s13247_s1 + $0x5b0] sm:$0xff] }
 0x241   :  { %v8528_v28 = vcombine.low %v202_v14, %v206_v53 }
 0x242   :  { %7013 = vmatpush1.bf16.msra.mxu0 %v8472_v20  ;;  %v8529_v20 = vcombine.high %v202_v14, %v206_v53  ;;  %v251_v14 = vld [vmem:[%s13247_s1 + $0x718] sm:$0xff] }
 0x243   :  { %7341 = vmatpush1.bf16.msra.mxu1 %v8474_v21  ;;  %7023 = vmatprep.subr.bf16.mxu0 %v8481_v22  ;;  %v8531_v21 = vcombine.high %v203_v15, %v207_v17  ;;  %v210_v22 = vld [vmem:[%s13247_s1 + $0x5d0] sm:$0xff]  ;;  %v255_v53 = vld [vmem:[%s13247_s1 + $0x738] sm:$0xff]  ;;  %v8570_v17 = vcombine.low %v243_v3, %v247_v5 }
 0x244   :  { %7351 = vmatprep.subr.bf16.mxu1 %v8483_v24  ;;  %v214_v24 = vld [vmem:[%s13247_s1 + $0x5f0] sm:$0xff] }
 0x245   :  { %7015 = vmatmul.mubr.bf16.vlgmr.msra.gmra.mrb[4].mxu0 %v10002_v23  ;;  %v8536_v38 = vcombine.low %v210_v22, %v214_v24 }
 0x246   :  { %7024 = vmatpush1.bf16.msra.mxu0 %v8480_v30  ;;  %7343 = vmatmul.mubr.bf16.vlgmr.msra.gmra.mrb[4].mxu1 %v10002_v23  ;;  %v179_v23 = vld [vmem:[%s13247_s1 + $0x4d8] sm:$0xff]  ;;  %v8537_v30 = vcombine.high %v210_v22, %v214_v24 }
 0x247   :  { %7352 = vmatpush1.bf16.msra.mxu1 %v8482_v31  ;;  %7025 = vmatprep.subr.bf16.mxu0 %v8489_v32  ;;  %v8507_v56 = vcombine.high %v179_v23, %v183_v50  ;;  %v8506_v0 = vcombine.low %v179_v23, %v183_v50  ;;  %v8539_v31 = vcombine.high %v211_v25, %v215_v26  ;;  %v218_v32 = vld [vmem:[%s13247_s1 + $0x610] sm:$0xff]  ;;  %v259_v22 = vld [vmem:[%s13247_s1 + $0x758] sm:$0xff] }
 0x248   :  { %7353 = vmatprep.subr.bf16.mxu1 %v8491_v34  ;;  %7055 = vmatprep.mubr.bf16.mxu0 %v10024_v33  ;;  %v222_v34 = vld [vmem:[%s13247_s1 + $0x630] sm:$0xff]  ;;  %v8546_v50 = vcombine.low %v219_v35, %v223_v36  ;;  %v263_v24 = vld [vmem:[%s13247_s1 + $0x778] sm:$0xff]  ;;  %v8578_v26 = vcombine.low %v251_v14, %v255_v53 }
 0x249   :  { %7383 = vmatprep.mubr.bf16.mxu1 %v10024_v33  ;;  %v187_v33 = vld [vmem:[%s13247_s1 + $0x518] sm:$0xff]  ;;  %v8544_v23 = vcombine.low %v218_v32, %v222_v34 }
 0x24a   :  { %7026 = vmatpush1.bf16.msra.mxu0 %v8488_v41  ;;  %v8515_v63 = vcombine.high %v187_v33, %v191_v8  ;;  %v8514_v12 = vcombine.low %v187_v33, %v191_v8  ;;  %v8545_v41 = vcombine.high %v218_v32, %v222_v34  ;;  %v8554_v8 = vcombine.low %v227_v46, %v231_v47  ;;  %v267_v32 = vld [vmem:[%s13247_s1 + $0x798] sm:$0xff] }
 0x24b   :  { %7354 = vmatpush1.bf16.msra.mxu1 %v8490_v42  ;;  %7027 = vmatprep.subr.bf16.mxu0 %v8497_v44  ;;  %v8547_v42 = vcombine.high %v219_v35, %v223_v36  ;;  %v226_v44 = vld [vmem:[%s13247_s1 + $0x650] sm:$0xff]  ;;  %v271_v34 = vld [vmem:[%s13247_s1 + $0x7b8] sm:$0xff]  ;;  %v8586_v36 = vcombine.low %v259_v22, %v263_v24 }
 0x24c   :  { %7355 = vmatprep.subr.bf16.mxu1 %v8499_v45  ;;  %v230_v45 = vld [vmem:[%s13247_s1 + $0x670] sm:$0xff] }
 0x24d   :  { %v8552_v33 = vcombine.low %v226_v44, %v230_v45 }
 0x24e   :  { %7028 = vmatpush1.bf16.msra.mxu0 %v8496_v52  ;;  %v8553_v52 = vcombine.high %v226_v44, %v230_v45  ;;  %v275_v44 = vld [vmem:[%s13247_s1 + $0x7d8] sm:$0xff] }
 0x24f   :  { %7356 = vmatpush1.bf16.msra.mxu1 %v8498_v54  ;;  %7029 = vmatprep.subr.bf16.mxu0 %v8505_v55  ;;  %v8555_v54 = vcombine.high %v227_v46, %v231_v47  ;;  %v234_v55 = vld [vmem:[%s13247_s1 + $0x690] sm:$0xff]  ;;  %v279_v45 = vld [vmem:[%s13247_s1 + $0x7f8] sm:$0xff]  ;;  %v8594_v47 = vcombine.low %v267_v32, %v271_v34 }
 0x250   :  { %7357 = vmatprep.subr.bf16.mxu1 %v8507_v56  ;;  %v238_v56 = vld [vmem:[%s13247_s1 + $0x6b0] sm:$0xff] }
 0x251   :  { %v8560_v6 = vcombine.low %v234_v55, %v238_v56 }
 0x252   :  { %7030 = vmatpush1.bf16.msra.mxu0 %v8504_v61  ;;  %v8561_v61 = vcombine.high %v234_v55, %v238_v56  ;;  %v283_v55 = vld [vmem:[%s13247_s1 + $0x818] sm:$0xff] }
 0x253   :  { %7358 = vmatpush1.bf16.msra.mxu1 %v8506_v0  ;;  %7031 = vmatprep.subr.bf16.mxu0 %v8513_v2  ;;  %v8563_v0 = vcombine.high %v235_v57, %v239_v60  ;;  %v242_v2 = vld [vmem:[%s13247_s1 + $0x6d0] sm:$0xff]  ;;  %v287_v56 = vld [vmem:[%s13247_s1 + $0x838] sm:$0xff]  ;;  %v8602_v60 = vcombine.low %v275_v44, %v279_v45 }
 0x254   :  { %7359 = vmatprep.subr.bf16.mxu1 %v8515_v63  ;;  %v246_v63 = vld [vmem:[%s13247_s1 + $0x6f0] sm:$0xff] }
 0x255   :  { %v8568_v15 = vcombine.low %v242_v2, %v246_v63 }
 0x256   :  { %7032 = vmatpush1.bf16.msra.mxu0 %v8512_v11  ;;  %v8569_v11 = vcombine.high %v242_v2, %v246_v63  ;;  %v291_v2 = vld [vmem:[%s13247_s1 + $0x858] sm:$0xff] }
 0x257   :  { %7360 = vmatpush1.bf16.msra.mxu1 %v8514_v12  ;;  %7033 = vmatprep.subr.bf16.mxu0 %v8521_v13  ;;  %v8571_v12 = vcombine.high %v243_v3, %v247_v5  ;;  %v250_v13 = vld [vmem:[%s13247_s1 + $0x710] sm:$0xff]  ;;  %v295_v63 = vld [vmem:[%s13247_s1 + $0x878] sm:$0xff]  ;;  %v8610_v5 = vcombine.low %v283_v55, %v287_v56 }
 0x258   :  { %7361 = vmatprep.subr.bf16.mxu1 %v8523_v1  ;;  %v254_v1 = vld [vmem:[%s13247_s1 + $0x730] sm:$0xff] }
 0x259   :  { %v8576_v25 = vcombine.low %v250_v13, %v254_v1 }
 0x25a   :  { %7034 = vmatpush1.bf16.msra.mxu0 %v8520_v9  ;;  %v8577_v9 = vcombine.high %v250_v13, %v254_v1  ;;  %v299_v13 = vld [vmem:[%s13247_s1 + $0x898] sm:$0xff] }
 0x25b   :  { %7362 = vmatpush1.bf16.msra.mxu1 %v8522_v18  ;;  %7035 = vmatprep.subr.bf16.mxu0 %v8529_v20  ;;  %v8579_v18 = vcombine.high %v251_v14, %v255_v53  ;;  %v258_v20 = vld [vmem:[%s13247_s1 + $0x750] sm:$0xff]  ;;  %v303_v1 = vld [vmem:[%s13247_s1 + $0x8b8] sm:$0xff]  ;;  %v8618_v53 = vcombine.low %v291_v2, %v295_v63 }
 0x25c   :  { %7363 = vmatprep.subr.bf16.mxu1 %v8531_v21  ;;  %v262_v21 = vld [vmem:[%s13247_s1 + $0x770] sm:$0xff] }
 0x25d   :  { %v8584_v35 = vcombine.low %v258_v20, %v262_v21 }
 0x25e   :  { %7036 = vmatpush1.bf16.msra.mxu0 %v8528_v28  ;;  %v8585_v28 = vcombine.high %v258_v20, %v262_v21  ;;  %v311_v20 = vld [vmem:[%s13247_s1 + $0x8f8] sm:$0xff] }
 0x25f   :  { %7364 = vmatpush1.bf16.msra.mxu1 %v8530_v29  ;;  %7037 = vmatprep.subr.bf16.mxu0 %v8537_v30  ;;  %v8587_v29 = vcombine.high %v259_v22, %v263_v24  ;;  %v266_v30 = vld [vmem:[%s13247_s1 + $0x790] sm:$0xff]  ;;  %v8626_v22 = vcombine.low %v299_v13, %v303_v1 }
 0x260   :  { %7365 = vmatprep.subr.bf16.mxu1 %v8539_v31  ;;  %v270_v31 = vld [vmem:[%s13247_s1 + $0x7b0] sm:$0xff] }
 0x261   :  { %v8592_v46 = vcombine.low %v266_v30, %v270_v31 }
 0x262   :  { %7038 = vmatpush1.bf16.msra.mxu0 %v8536_v38  ;;  %v8593_v38 = vcombine.high %v266_v30, %v270_v31 }
 0x263   :  { %7366 = vmatpush1.bf16.msra.mxu1 %v8538_v39  ;;  %7039 = vmatprep.subr.bf16.mxu0 %v8545_v41  ;;  %v8595_v39 = vcombine.high %v267_v32, %v271_v34  ;;  %v274_v41 = vld [vmem:[%s13247_s1 + $0x7d0] sm:$0xff] }
 0x264   :  { %7367 = vmatprep.subr.bf16.mxu1 %v8547_v42  ;;  %v278_v42 = vld [vmem:[%s13247_s1 + $0x7f0] sm:$0xff] }
 0x265   :  { %v8600_v57 = vcombine.low %v274_v41, %v278_v42 }
 0x266   :  { %7040 = vmatpush1.bf16.msra.mxu0 %v8544_v23  ;;  %v8601_v23 = vcombine.high %v274_v41, %v278_v42 }
 0x267   :  { %7368 = vmatpush1.bf16.msra.mxu1 %v8546_v50  ;;  %7041 = vmatprep.subr.bf16.mxu0 %v8553_v52  ;;  %v8603_v50 = vcombine.high %v275_v44, %v279_v45  ;;  %v282_v52 = vld [vmem:[%s13247_s1 + $0x810] sm:$0xff] }
 0x268   :  { %7369 = vmatprep.subr.bf16.mxu1 %v8555_v54  ;;  %v286_v54 = vld [vmem:[%s13247_s1 + $0x830] sm:$0xff] }
 0x269   :  { %v8608_v3 = vcombine.low %v282_v52, %v286_v54 }
 0x26a   :  { %7042 = vmatpush1.bf16.msra.mxu0 %v8552_v33  ;;  %v8609_v33 = vcombine.high %v282_v52, %v286_v54 }
 0x26b   :  { %7370 = vmatpush1.bf16.msra.mxu1 %v8554_v8  ;;  %7043 = vmatprep.subr.bf16.mxu0 %v8561_v61  ;;  %v8611_v8 = vcombine.high %v283_v55, %v287_v56  ;;  %v290_v61 = vld [vmem:[%s13247_s1 + $0x850] sm:$0xff] }
 0x26c   :  { %7371 = vmatprep.subr.bf16.mxu1 %v8563_v0  ;;  %v294_v0 = vld [vmem:[%s13247_s1 + $0x870] sm:$0xff] }
 0x26d   :  { %v8616_v14 = vcombine.low %v290_v61, %v294_v0 }
 0x26e   :  { %7044 = vmatpush1.bf16.msra.mxu0 %v8560_v6  ;;  %v8617_v6 = vcombine.high %v290_v61, %v294_v0 }
 0x26f   :  { %7372 = vmatpush1.bf16.msra.mxu1 %v8562_v10  ;;  %7045 = vmatprep.subr.bf16.mxu0 %v8569_v11  ;;  %v8619_v10 = vcombine.high %v291_v2, %v295_v63  ;;  %v298_v11 = vld [vmem:[%s13247_s1 + $0x890] sm:$0xff] }
 0x270   :  { %7373 = vmatprep.subr.bf16.mxu1 %v8571_v12  ;;  %v302_v12 = vld [vmem:[%s13247_s1 + $0x8b0] sm:$0xff] }
 0x271   :  { %v8624_v21 = vcombine.low %v298_v11, %v302_v12 }
 0x272   :  { %7046 = vmatpush1.bf16.msra.mxu0 %v8568_v15  ;;  %v8625_v15 = vcombine.high %v298_v11, %v302_v12 }
 0x273   :  { %7374 = vmatpush1.bf16.msra.mxu1 %v8570_v17  ;;  %7047 = vmatprep.subr.bf16.mxu0 %v8577_v9  ;;  %v8627_v17 = vcombine.high %v299_v13, %v303_v1  ;;  %v306_v9 = vld [vmem:[%s13247_s1 + $0x8d0] sm:$0xff] }
 0x274   :  { %7375 = vmatprep.subr.bf16.mxu1 %v8579_v18  ;;  %v310_v18 = vld [vmem:[%s13247_s1 + $0x8f0] sm:$0xff] }
 0x275   :  { %v8633_v24 = vcombine.high %v306_v9, %v310_v18  ;;  %v8632_v30 = vcombine.low %v306_v9, %v310_v18 }
 0x276   :  { %7048 = vmatpush1.bf16.msra.mxu0 %v8576_v25 }
 0x277   :  { %7376 = vmatpush1.bf16.msra.mxu1 %v8578_v26  ;;  %7049 = vmatprep.subr.bf16.mxu0 %v8585_v28  ;;  %v314_v26 = vld [vmem:[%s13247_s1 + $0x910] sm:$0xff] }
 0x278   :  { %7377 = vmatprep.subr.bf16.mxu1 %v8587_v29  ;;  %v318_v28 = vld [vmem:[%s13247_s1 + $0x930] sm:$0xff]  ;;  %v319_v29 = vld [vmem:[%s13247_s1 + $0x938] sm:$0xff] }
 0x279   :  { %v8641_v32 = vcombine.high %v314_v26, %v318_v28  ;;  %v8640_v41 = vcombine.low %v314_v26, %v318_v28 }
 0x27a   :  { %7050 = vmatpush1.bf16.msra.mxu0 %v8584_v35  ;;  %v322_v35 = vld [vmem:[%s13247_s1 + $0x950] sm:$0xff] }
 0x27b   :  { %7378 = vmatpush1.bf16.msra.mxu1 %v8586_v36  ;;  %7051 = vmatprep.subr.bf16.mxu0 %v8593_v38  ;;  %v326_v36 = vld [vmem:[%s13247_s1 + $0x970] sm:$0xff]  ;;  %v323_v38 = vld [vmem:[%s13247_s1 + $0x958] sm:$0xff] }
 0x27c   :  { %7379 = vmatprep.subr.bf16.mxu1 %v8595_v39  ;;  %v327_v39 = vld [vmem:[%s13247_s1 + $0x978] sm:$0xff]  ;;  %v8649_v44 = vcombine.high %v322_v35, %v326_v36  ;;  %v8648_v52 = vcombine.low %v322_v35, %v326_v36 }
 0x27d   :  { %v8651_v45 = vcombine.high %v323_v38, %v327_v39  ;;  %v8650_v54 = vcombine.low %v323_v38, %v327_v39 }
 0x27e   :  { %7052 = vmatpush1.bf16.msra.mxu0 %v8592_v46  ;;  %v330_v46 = vld [vmem:[%s13247_s1 + $0x990] sm:$0xff] }
 0x27f   :  { %7380 = vmatpush1.bf16.msra.mxu1 %v8594_v47  ;;  %7053 = vmatprep.subr.bf16.mxu0 %v8601_v23  ;;  %v334_v47 = vld [vmem:[%s13247_s1 + $0x9b0] sm:$0xff]  ;;  %v331_v23 = vld [vmem:[%s13247_s1 + $0x998] sm:$0xff] }
 0x280   :  { %7381 = vmatprep.subr.bf16.mxu1 %v8603_v50  ;;  %v335_v50 = vld [vmem:[%s13247_s1 + $0x9b8] sm:$0xff]  ;;  %v8657_v55 = vcombine.high %v330_v46, %v334_v47  ;;  %v8656_v61 = vcombine.low %v330_v46, %v334_v47 }
 0x281   :  { %v8659_v56 = vcombine.high %v331_v23, %v335_v50  ;;  %v8658_v0 = vcombine.low %v331_v23, %v335_v50 }
 0x282   :  { %7054 = vmatpush1.bf16.msra.mxu0 %v8600_v57  ;;  %v338_v57 = vld [vmem:[%s13247_s1 + $0x9d0] sm:$0xff] }
 0x283   :  { %7382 = vmatpush1.bf16.msra.mxu1 %v8602_v60  ;;  %7064 = vmatprep.subr.bf16.mxu0 %v8609_v33  ;;  %v342_v60 = vld [vmem:[%s13247_s1 + $0x9f0] sm:$0xff]  ;;  %v339_v33 = vld [vmem:[%s13247_s1 + $0x9d8] sm:$0xff] }
 0x284   :  { %7392 = vmatprep.subr.bf16.mxu1 %v8611_v8  ;;  %v343_v8 = vld [vmem:[%s13247_s1 + $0x9f8] sm:$0xff]  ;;  %v8665_v2 = vcombine.high %v338_v57, %v342_v60  ;;  %v8664_v11 = vcombine.low %v338_v57, %v342_v60 }
 0x285   :  { %7056 = vmatmul.mubr.bf16.vlgmr.msra.gmra.mrb[4].mxu0 %v10219_v40  ;;  %v8667_v63 = vcombine.high %v339_v33, %v343_v8  ;;  %v8666_v12 = vcombine.low %v339_v33, %v343_v8 }
 0x286   :  { %7065 = vmatpush1.bf16.msra.mxu0 %v8608_v3  ;;  %7384 = vmatmul.mubr.bf16.vlgmr.msra.gmra.mrb[4].mxu1 %v10219_v40  ;;  %v307_v40 = vld [vmem:[%s13247_s1 + $0x8d8] sm:$0xff]  ;;  %v346_v3 = vld [vmem:[%s13247_s1 + $0xa10] sm:$0xff] }
 0x287   :  { %7393 = vmatpush1.bf16.msra.mxu1 %v8610_v5  ;;  %7066 = vmatprep.subr.bf16.mxu0 %v8617_v6  ;;  %v8635_v25 = vcombine.high %v307_v40, %v311_v20  ;;  %v8634_v31 = vcombine.low %v307_v40, %v311_v20  ;;  %v350_v5 = vld [vmem:[%s13247_s1 + $0xa30] sm:$0xff]  ;;  %v347_v6 = vld [vmem:[%s13247_s1 + $0xa18] sm:$0xff] }
 0x288   :  { %7394 = vmatprep.subr.bf16.mxu1 %v8619_v10  ;;  %7096 = vmatprep.mubr.bf16.mxu0 %v10228_v48  ;;  %v351_v10 = vld [vmem:[%s13247_s1 + $0xa38] sm:$0xff]  ;;  %v8673_v13 = vcombine.high %v346_v3, %v350_v5  ;;  %v8672_v9 = vcombine.low %v346_v3, %v350_v5 }
 0x289   :  { %7424 = vmatprep.mubr.bf16.mxu1 %v10228_v48  ;;  %v315_v48 = vld [vmem:[%s13247_s1 + $0x918] sm:$0xff]  ;;  %v8675_v1 = vcombine.high %v347_v6, %v351_v10  ;;  %v8674_v18 = vcombine.low %v347_v6, %v351_v10 }
 0x28a   :  { %7067 = vmatpush1.bf16.msra.mxu0 %v8616_v14  ;;  %v8643_v34 = vcombine.high %v315_v48, %v319_v29  ;;  %v8642_v42 = vcombine.low %v315_v48, %v319_v29  ;;  %v354_v14 = vld [vmem:[%s13247_s1 + $0xa50] sm:$0xff] }
 0x28b   :  { %7395 = vmatpush1.bf16.msra.mxu1 %v8618_v53  ;;  %7068 = vmatprep.subr.bf16.mxu0 %v8625_v15  ;;  %v358_v53 = vld [vmem:[%s13247_s1 + $0xa70] sm:$0xff]  ;;  %v355_v15 = vld [vmem:[%s13247_s1 + $0xa58] sm:$0xff] }
 0x28c   :  { %7396 = vmatprep.subr.bf16.mxu1 %v8627_v17  ;;  %v359_v17 = vld [vmem:[%s13247_s1 + $0xa78] sm:$0xff]  ;;  %v8681_v40 = vcombine.high %v354_v14, %v358_v53  ;;  %v8680_v26 = vcombine.low %v354_v14, %v358_v53 }
 0x28d   :  { %v8683_v20 = vcombine.high %v355_v15, %v359_v17  ;;  %v8682_v28 = vcombine.low %v355_v15, %v359_v17 }
 0x28e   :  { %7069 = vmatpush1.bf16.msra.mxu0 %v8624_v21  ;;  %v362_v21 = vld [vmem:[%s13247_s1 + $0xa90] sm:$0xff] }
 0x28f   :  { %7397 = vmatpush1.bf16.msra.mxu1 %v8626_v22  ;;  %7070 = vmatprep.subr.bf16.mxu0 %v8633_v24  ;;  %v366_v22 = vld [vmem:[%s13247_s1 + $0xab0] sm:$0xff]  ;;  %v363_v24 = vld [vmem:[%s13247_s1 + $0xa98] sm:$0xff] }
 0x290   :  { %7398 = vmatprep.subr.bf16.mxu1 %v8635_v25  ;;  %v367_v25 = vld [vmem:[%s13247_s1 + $0xab8] sm:$0xff]  ;;  %v8689_v48 = vcombine.high %v362_v21, %v366_v22  ;;  %v8688_v35 = vcombine.low %v362_v21, %v366_v22 }
 0x291   :  { %v8691_v29 = vcombine.high %v363_v24, %v367_v25  ;;  %v8690_v36 = vcombine.low %v363_v24, %v367_v25 }
 0x292   :  { %7071 = vmatpush1.bf16.msra.mxu0 %v8632_v30  ;;  %v370_v30 = vld [vmem:[%s13247_s1 + $0xad0] sm:$0xff] }
 0x293   :  { %7399 = vmatpush1.bf16.msra.mxu1 %v8634_v31  ;;  %7072 = vmatprep.subr.bf16.mxu0 %v8641_v32  ;;  %v374_v31 = vld [vmem:[%s13247_s1 + $0xaf0] sm:$0xff]  ;;  %v371_v32 = vld [vmem:[%s13247_s1 + $0xad8] sm:$0xff] }
 0x294   :  { %7400 = vmatprep.subr.bf16.mxu1 %v8643_v34  ;;  %v375_v34 = vld [vmem:[%s13247_s1 + $0xaf8] sm:$0xff]  ;;  %v8697_v38 = vcombine.high %v370_v30, %v374_v31  ;;  %v8696_v46 = vcombine.low %v370_v30, %v374_v31 }
 0x295   :  { %v8699_v39 = vcombine.high %v371_v32, %v375_v34  ;;  %v8698_v47 = vcombine.low %v371_v32, %v375_v34 }
 0x296   :  { %7073 = vmatpush1.bf16.msra.mxu0 %v8640_v41  ;;  %v378_v41 = vld [vmem:[%s13247_s1 + $0xb10] sm:$0xff] }
 0x297   :  { %7401 = vmatpush1.bf16.msra.mxu1 %v8642_v42  ;;  %7074 = vmatprep.subr.bf16.mxu0 %v8649_v44  ;;  %v382_v42 = vld [vmem:[%s13247_s1 + $0xb30] sm:$0xff]  ;;  %v379_v44 = vld [vmem:[%s13247_s1 + $0xb18] sm:$0xff] }
 0x298   :  { %7402 = vmatprep.subr.bf16.mxu1 %v8651_v45  ;;  %v383_v45 = vld [vmem:[%s13247_s1 + $0xb38] sm:$0xff]  ;;  %v8705_v23 = vcombine.high %v378_v41, %v382_v42  ;;  %v8704_v57 = vcombine.low %v378_v41, %v382_v42 }
 0x299   :  { %v8707_v50 = vcombine.high %v379_v44, %v383_v45  ;;  %v8706_v60 = vcombine.low %v379_v44, %v383_v45 }
 0x29a   :  { %7075 = vmatpush1.bf16.msra.mxu0 %v8648_v52  ;;  %v386_v52 = vld [vmem:[%s13247_s1 + $0xb50] sm:$0xff] }
 0x29b   :  { %7403 = vmatpush1.bf16.msra.mxu1 %v8650_v54  ;;  %7076 = vmatprep.subr.bf16.mxu0 %v8657_v55  ;;  %v390_v54 = vld [vmem:[%s13247_s1 + $0xb70] sm:$0xff]  ;;  %v387_v55 = vld [vmem:[%s13247_s1 + $0xb58] sm:$0xff] }
 0x29c   :  { %7404 = vmatprep.subr.bf16.mxu1 %v8659_v56  ;;  %v391_v56 = vld [vmem:[%s13247_s1 + $0xb78] sm:$0xff]  ;;  %v8713_v33 = vcombine.high %v386_v52, %v390_v54  ;;  %v8712_v3 = vcombine.low %v386_v52, %v390_v54 }
 0x29d   :  { %v8715_v8 = vcombine.high %v387_v55, %v391_v56  ;;  %v8714_v5 = vcombine.low %v387_v55, %v391_v56  ;;  %v442_v56 = vld [vmem:[%s13247_s1 + $0xd10] sm:$0xff] }
 0x29e   :  { %7077 = vmatpush1.bf16.msra.mxu0 %v8656_v61  ;;  %v394_v61 = vld [vmem:[%s13247_s1 + $0xb90] sm:$0xff] }
 0x29f   :  { %7405 = vmatpush1.bf16.msra.mxu1 %v8658_v0  ;;  %7078 = vmatprep.subr.bf16.mxu0 %v8665_v2  ;;  %v398_v0 = vld [vmem:[%s13247_s1 + $0xbb0] sm:$0xff]  ;;  %v395_v2 = vld [vmem:[%s13247_s1 + $0xb98] sm:$0xff] }
 0x2a0   :  { %7406 = vmatprep.subr.bf16.mxu1 %v8667_v63  ;;  %v399_v63 = vld [vmem:[%s13247_s1 + $0xbb8] sm:$0xff]  ;;  %v8721_v6 = vcombine.high %v394_v61, %v398_v0  ;;  %v8720_v14 = vcombine.low %v394_v61, %v398_v0 }
 0x2a1   :  { %v8723_v10 = vcombine.high %v395_v2, %v399_v63  ;;  %v8722_v53 = vcombine.low %v395_v2, %v399_v63  ;;  %v450_v2 = vld [vmem:[%s13247_s1 + $0xd50] sm:$0xff] }
 0x2a2   :  { %7079 = vmatpush1.bf16.msra.mxu0 %v8664_v11  ;;  %v402_v11 = vld [vmem:[%s13247_s1 + $0xbd0] sm:$0xff] }
 0x2a3   :  { %7407 = vmatpush1.bf16.msra.mxu1 %v8666_v12  ;;  %7080 = vmatprep.subr.bf16.mxu0 %v8673_v13  ;;  %v406_v12 = vld [vmem:[%s13247_s1 + $0xbf0] sm:$0xff]  ;;  %v403_v13 = vld [vmem:[%s13247_s1 + $0xbd8] sm:$0xff] }
 0x2a4   :  { %7408 = vmatprep.subr.bf16.mxu1 %v8675_v1  ;;  %v407_v1 = vld [vmem:[%s13247_s1 + $0xbf8] sm:$0xff]  ;;  %v8729_v15 = vcombine.high %v402_v11, %v406_v12  ;;  %v8728_v21 = vcombine.low %v402_v11, %v406_v12  ;;  %v454_v63 = vld [vmem:[%s13247_s1 + $0xd70] sm:$0xff] }
 0x2a5   :  { %v8731_v17 = vcombine.high %v403_v13, %v407_v1  ;;  %v8730_v22 = vcombine.low %v403_v13, %v407_v1  ;;  %v8777_v11 = vcombine.high %v450_v2, %v454_v63  ;;  %v458_v13 = vld [vmem:[%s13247_s1 + $0xd90] sm:$0xff] }
 0x2a6   :  { %7081 = vmatpush1.bf16.msra.mxu0 %v8672_v9  ;;  %v410_v9 = vld [vmem:[%s13247_s1 + $0xc10] sm:$0xff] }
 0x2a7   :  { %7409 = vmatpush1.bf16.msra.mxu1 %v8674_v18  ;;  %7082 = vmatprep.subr.bf16.mxu0 %v8681_v40  ;;  %v414_v18 = vld [vmem:[%s13247_s1 + $0xc30] sm:$0xff]  ;;  %v411_v40 = vld [vmem:[%s13247_s1 + $0xc18] sm:$0xff] }
 0x2a8   :  { %7410 = vmatprep.subr.bf16.mxu1 %v8683_v20  ;;  %v415_v20 = vld [vmem:[%s13247_s1 + $0xc38] sm:$0xff]  ;;  %v8737_v24 = vcombine.high %v410_v9, %v414_v18  ;;  %v8736_v30 = vcombine.low %v410_v9, %v414_v18  ;;  %v462_v1 = vld [vmem:[%s13247_s1 + $0xdb0] sm:$0xff] }
 0x2a9   :  { %v8739_v25 = vcombine.high %v411_v40, %v415_v20  ;;  %v8738_v31 = vcombine.low %v411_v40, %v415_v20  ;;  %v8785_v9 = vcombine.high %v458_v13, %v462_v1  ;;  %v466_v20 = vld [vmem:[%s13247_s1 + $0xdd0] sm:$0xff] }
 0x2aa   :  { %7083 = vmatpush1.bf16.msra.mxu0 %v8680_v26  ;;  %v418_v26 = vld [vmem:[%s13247_s1 + $0xc50] sm:$0xff] }
 0x2ab   :  { %7411 = vmatpush1.bf16.msra.mxu1 %v8682_v28  ;;  %7084 = vmatprep.subr.bf16.mxu0 %v8689_v48  ;;  %v422_v28 = vld [vmem:[%s13247_s1 + $0xc70] sm:$0xff]  ;;  %v419_v48 = vld [vmem:[%s13247_s1 + $0xc58] sm:$0xff] }
 0x2ac   :  { %7412 = vmatprep.subr.bf16.mxu1 %v8691_v29  ;;  %v423_v29 = vld [vmem:[%s13247_s1 + $0xc78] sm:$0xff]  ;;  %v8745_v32 = vcombine.high %v418_v26, %v422_v28  ;;  %v8744_v41 = vcombine.low %v418_v26, %v422_v28 }
 0x2ad   :  { %v8747_v34 = vcombine.high %v419_v48, %v423_v29  ;;  %v8746_v42 = vcombine.low %v419_v48, %v423_v29  ;;  %v471_v26 = vld [vmem:[%s13247_s1 + $0xdf8] sm:$0xff]  ;;  %v8784_v29 = vcombine.low %v458_v13, %v462_v1 }
 0x2ae   :  { %7085 = vmatpush1.bf16.msra.mxu0 %v8688_v35  ;;  %v426_v35 = vld [vmem:[%s13247_s1 + $0xc90] sm:$0xff] }
 0x2af   :  { %7413 = vmatpush1.bf16.msra.mxu1 %v8690_v36  ;;  %7086 = vmatprep.subr.bf16.mxu0 %v8697_v38  ;;  %v430_v36 = vld [vmem:[%s13247_s1 + $0xcb0] sm:$0xff]  ;;  %v427_v38 = vld [vmem:[%s13247_s1 + $0xc98] sm:$0xff] }
 0x2b0   :  { %7414 = vmatprep.subr.bf16.mxu1 %v8699_v39  ;;  %v431_v39 = vld [vmem:[%s13247_s1 + $0xcb8] sm:$0xff]  ;;  %v8753_v44 = vcombine.high %v426_v35, %v430_v36 }
 0x2b1   :  { %v8755_v45 = vcombine.high %v427_v38, %v431_v39  ;;  %v8754_v52 = vcombine.low %v427_v38, %v431_v39  ;;  %v474_v38 = vld [vmem:[%s13247_s1 + $0xe10] sm:$0xff] }
 0x2b2   :  { %7087 = vmatpush1.bf16.msra.mxu0 %v8696_v46  ;;  %v434_v46 = vld [vmem:[%s13247_s1 + $0xcd0] sm:$0xff] }
 0x2b3   :  { %7415 = vmatpush1.bf16.msra.mxu1 %v8698_v47  ;;  %7088 = vmatprep.subr.bf16.mxu0 %v8705_v23  ;;  %v438_v47 = vld [vmem:[%s13247_s1 + $0xcf0] sm:$0xff]  ;;  %v439_v23 = vld [vmem:[%s13247_s1 + $0xcf8] sm:$0xff] }
 0x2b4   :  { %7416 = vmatprep.subr.bf16.mxu1 %v8707_v50  ;;  %v8752_v50 = vcombine.low %v426_v35, %v430_v36  ;;  %v8761_v54 = vcombine.high %v434_v46, %v438_v47  ;;  %v478_v39 = vld [vmem:[%s13247_s1 + $0xe30] sm:$0xff] }
 0x2b6   :  { %7089 = vmatpush1.bf16.msra.mxu0 %v8704_v57  ;;  %v446_v57 = vld [vmem:[%s13247_s1 + $0xd30] sm:$0xff] }
 0x2b7   :  { %7417 = vmatpush1.bf16.msra.mxu1 %v8706_v60  ;;  %7090 = vmatprep.subr.bf16.mxu0 %v8713_v33  ;;  %v447_v60 = vld [vmem:[%s13247_s1 + $0xd38] sm:$0xff]  ;;  %v8760_v33 = vcombine.low %v434_v46, %v438_v47  ;;  %v8769_v61 = vcombine.high %v442_v56, %v446_v57  ;;  %v8801_v46 = vcombine.high %v474_v38, %v478_v39 }
 0x2b8   :  { %7418 = vmatprep.subr.bf16.mxu1 %v8715_v8 }
 0x2ba   :  { %7091 = vmatpush1.bf16.msra.mxu0 %v8712_v3  ;;  %v451_v3 = vld [vmem:[%s13247_s1 + $0xd58] sm:$0xff] }
 0x2bb   :  { %7419 = vmatpush1.bf16.msra.mxu1 %v8714_v5  ;;  %7092 = vmatprep.subr.bf16.mxu0 %v8721_v6  ;;  %v455_v5 = vld [vmem:[%s13247_s1 + $0xd78] sm:$0xff]  ;;  %v8768_v6 = vcombine.low %v442_v56, %v446_v57 }
 0x2bc   :  { %7420 = vmatprep.subr.bf16.mxu1 %v8723_v10  ;;  %v8779_v12 = vcombine.high %v451_v3, %v455_v5 }
 0x2be   :  { %7093 = vmatpush1.bf16.msra.mxu0 %v8720_v14  ;;  %v459_v14 = vld [vmem:[%s13247_s1 + $0xd98] sm:$0xff] }
 0x2bf   :  { %7421 = vmatpush1.bf16.msra.mxu1 %v8722_v53  ;;  %7094 = vmatprep.subr.bf16.mxu0 %v8729_v15  ;;  %v463_v53 = vld [vmem:[%s13247_s1 + $0xdb8] sm:$0xff]  ;;  %v8776_v15 = vcombine.low %v450_v2, %v454_v63 }
 0x2c0   :  { %7422 = vmatprep.subr.bf16.mxu1 %v8731_v17  ;;  %v8778_v17 = vcombine.low %v451_v3, %v455_v5  ;;  %v8787_v40 = vcombine.high %v459_v14, %v463_v53  ;;  %v498_v3 = vld [vmem:[%s13247_s1 + $0xed0] sm:$0xff] }
 0x2c1   :  { %v502_v5 = vld [vmem:[%s13247_s1 + $0xef0] sm:$0xff] }
 0x2c2   :  { %7095 = vmatpush1.bf16.msra.mxu0 %v8728_v21  ;;  %v470_v21 = vld [vmem:[%s13247_s1 + $0xdf0] sm:$0xff]  ;;  %v8825_v13 = vcombine.high %v498_v3, %v502_v5 }
 0x2c3   :  { %7423 = vmatpush1.bf16.msra.mxu1 %v8730_v22  ;;  %7105 = vmatprep.subr.bf16.mxu0 %v8737_v24 }
 0x2c4   :  { %7433 = vmatprep.subr.bf16.mxu1 %v8739_v25  ;;  %v467_v25 = vld [vmem:[%s13247_s1 + $0xdd8] sm:$0xff] }
 0x2c5   :  { %7097 = vmatmul.mubr.bf16.vlgmr.msra.gmra.mrb[4].mxu0 %v10416_v58  ;;  %v8795_v36 = vcombine.high %v467_v25, %v471_v26 }
 0x2c6   :  { %7106 = vmatpush1.bf16.msra.mxu0 %v8736_v30  ;;  %7425 = vmatmul.mubr.bf16.vlgmr.msra.gmra.mrb[4].mxu1 %v10416_v58  ;;  %v435_v58 = vld [vmem:[%s13247_s1 + $0xcd8] sm:$0xff] }
 0x2c7   :  { %7434 = vmatpush1.bf16.msra.mxu1 %v8738_v31  ;;  %7107 = vmatprep.subr.bf16.mxu0 %v8745_v32  ;;  %v8763_v55 = vcombine.high %v435_v58, %v439_v23  ;;  %v8762_v8 = vcombine.low %v435_v58, %v439_v23  ;;  %v8786_v32 = vcombine.low %v459_v14, %v463_v53  ;;  %v482_v58 = vld [vmem:[%s13247_s1 + $0xe50] sm:$0xff] }
 0x2c8   :  { %7435 = vmatprep.subr.bf16.mxu1 %v8747_v34  ;;  %7137 = vmatprep.mubr.bf16.mxu0 %v10432_v4  ;;  %v8793_v34 = vcombine.high %v466_v20, %v470_v21  ;;  %v486_v23 = vld [vmem:[%s13247_s1 + $0xe70] sm:$0xff] }
 0x2c9   :  { %7465 = vmatprep.mubr.bf16.mxu1 %v10432_v4  ;;  %v443_v4 = vld [vmem:[%s13247_s1 + $0xd18] sm:$0xff]  ;;  %v8809_v56 = vcombine.high %v482_v58, %v486_v23  ;;  %v506_v14 = vld [vmem:[%s13247_s1 + $0xf10] sm:$0xff] }
 0x2ca   :  { %7108 = vmatpush1.bf16.msra.mxu0 %v8744_v41  ;;  %v8771_v0 = vcombine.high %v443_v4, %v447_v60  ;;  %v8770_v10 = vcombine.low %v443_v4, %v447_v60  ;;  %v475_v41 = vld [vmem:[%s13247_s1 + $0xe18] sm:$0xff]  ;;  %v490_v4 = vld [vmem:[%s13247_s1 + $0xe90] sm:$0xff] }
 0x2cb   :  { %7436 = vmatpush1.bf16.msra.mxu1 %v8746_v42  ;;  %7109 = vmatprep.subr.bf16.mxu0 %v8753_v44  ;;  %v479_v42 = vld [vmem:[%s13247_s1 + $0xe38] sm:$0xff]  ;;  %v8792_v44 = vcombine.low %v466_v20, %v470_v21  ;;  %v494_v60 = vld [vmem:[%s13247_s1 + $0xeb0] sm:$0xff] }
 0x2cc   :  { %7437 = vmatprep.subr.bf16.mxu1 %v8755_v45  ;;  %v8794_v45 = vcombine.low %v467_v25, %v471_v26  ;;  %v8803_v47 = vcombine.high %v475_v41, %v479_v42  ;;  %v8817_v2 = vcombine.high %v490_v4, %v494_v60  ;;  %v510_v53 = vld [vmem:[%s13247_s1 + $0xf30] sm:$0xff] }
 0x2cd   :  { %v8833_v20 = vcombine.high %v506_v14, %v510_v53  ;;  %v514_v25 = vld [vmem:[%s13247_s1 + $0xf50] sm:$0xff] }
 0x2ce   :  { %7110 = vmatpush1.bf16.msra.mxu0 %v8752_v50  ;;  %v483_v50 = vld [vmem:[%s13247_s1 + $0xe58] sm:$0xff]  ;;  %v518_v26 = vld [vmem:[%s13247_s1 + $0xf70] sm:$0xff] }
 0x2cf   :  { %7438 = vmatpush1.bf16.msra.mxu1 %v8754_v52  ;;  %7111 = vmatprep.subr.bf16.mxu0 %v8761_v54  ;;  %v487_v52 = vld [vmem:[%s13247_s1 + $0xe78] sm:$0xff]  ;;  %v8800_v54 = vcombine.low %v474_v38, %v478_v39 }
 0x2d0   :  { %7439 = vmatprep.subr.bf16.mxu1 %v8763_v55  ;;  %v8802_v55 = vcombine.low %v475_v41, %v479_v42  ;;  %v8811_v57 = vcombine.high %v483_v50, %v487_v52  ;;  %v523_v38 = vld [vmem:[%s13247_s1 + $0xf98] sm:$0xff]  ;;  %v8840_v41 = vcombine.low %v514_v25, %v518_v26 }
 0x2d1   :  { %v527_v39 = vld [vmem:[%s13247_s1 + $0xfb8] sm:$0xff] }
 0x2d2   :  { %7112 = vmatpush1.bf16.msra.mxu0 %v8760_v33  ;;  %v491_v33 = vld [vmem:[%s13247_s1 + $0xe98] sm:$0xff] }
 0x2d3   :  { %7440 = vmatpush1.bf16.msra.mxu1 %v8762_v8  ;;  %7113 = vmatprep.subr.bf16.mxu0 %v8769_v61  ;;  %v495_v8 = vld [vmem:[%s13247_s1 + $0xeb8] sm:$0xff]  ;;  %v8808_v61 = vcombine.low %v482_v58, %v486_v23 }
 0x2d4   :  { %7441 = vmatprep.subr.bf16.mxu1 %v8771_v0  ;;  %v8810_v0 = vcombine.low %v483_v50, %v487_v52  ;;  %v8819_v63 = vcombine.high %v491_v33, %v495_v8  ;;  %v531_v58 = vld [vmem:[%s13247_s1 + $0xfd8] sm:$0xff]  ;;  %v8850_v52 = vcombine.low %v523_v38, %v527_v39 }
 0x2d5   :  { %v535_v23 = vld [vmem:[%s13247_s1 + $0xff8] sm:$0xff] }
 0x2d6   :  { %7114 = vmatpush1.bf16.msra.mxu0 %v8768_v6  ;;  %v499_v6 = vld [vmem:[%s13247_s1 + $0xed8] sm:$0xff] }
 0x2d7   :  { %7442 = vmatpush1.bf16.msra.mxu1 %v8770_v10  ;;  %7115 = vmatprep.subr.bf16.mxu0 %v8777_v11  ;;  %v503_v10 = vld [vmem:[%s13247_s1 + $0xef8] sm:$0xff]  ;;  %v8816_v11 = vcombine.low %v490_v4, %v494_v60 }
 0x2d8   :  { %v12112_v18 = vpop.f32.mrb[0].mxu0  ;;  %7443 = vmatprep.subr.bf16.mxu1 %v8779_v12  ;;  %v8818_v12 = vcombine.low %v491_v33, %v495_v8  ;;  %v8827_v1 = vcombine.high %v499_v6, %v503_v10  ;;  %v539_v4 = vld [vmem:[%s13247_s1 + $0x1018] sm:$0xff]  ;;  %v8858_v8 = vcombine.low %v531_v58, %v535_v23 }
 0x2d9   :  { %v12120_v22 = vpop.f32.mrb[0].mxu1  ;;  %v12122_v24 = vpop.f32.mrb[1].mxu0  ;;  %v543_v60 = vld [vmem:[%s13247_s1 + $0x1038] sm:$0xff] }
 0x2da   :  { %v12130_v28 = vpop.f32.mrb[1].mxu1  ;;  %v6651_v48 = vpop.f32.mrb[2].mxu0  ;;  %7116 = vmatpush1.bf16.msra.mxu0 %v8776_v15  ;;  %v507_v15 = vld [vmem:[%s13247_s1 + $0xf18] sm:$0xff] }
 0x2db   :  { %v6979_v30 = vpop.f32.mrb[2].mxu1  ;;  %7444 = vmatpush1.bf16.msra.mxu1 %v8778_v17  ;;  %v6652_v31 = vpop.f32.mrb[3].mxu0  ;;  %7117 = vmatprep.subr.bf16.mxu0 %v8785_v9  ;;  %v511_v17 = vld [vmem:[%s13247_s1 + $0xf38] sm:$0xff]  ;;  %v8824_v9 = vcombine.low %v498_v3, %v502_v5 }
 0x2dc   :  { %v6980_v35 = vpop.f32.mrb[3].mxu1  ;;  %7445 = vmatprep.subr.bf16.mxu1 %v8787_v40  ;;  %v8826_v40 = vcombine.low %v499_v6, %v503_v10  ;;  %v8835_v21 = vcombine.high %v507_v15, %v511_v17  ;;  %v515_v48 = vld [vmem:[%s13247_s1 + $0xf58] sm:$0xff]  ;;  %v8832_v30 = vcombine.low %v506_v14, %v510_v53  ;;  %v8834_v31 = vcombine.low %v507_v15, %v511_v17 }
 0x2dd   :  { %v522_v35 = vld [vmem:[%s13247_s1 + $0xf90] sm:$0xff]  ;;  %v547_v3 = vld [vmem:[%s13247_s1 + $0x1058] sm:$0xff]  ;;  %v8866_v10 = vcombine.low %v539_v4, %v543_v60 }
 0x2de   :  { %7118 = vmatpush1.bf16.msra.mxu0 %v8784_v29  ;;  %v519_v29 = vld [vmem:[%s13247_s1 + $0xf78] sm:$0xff] }
 0x2df   :  { %7446 = vmatpush1.bf16.msra.mxu1 %v8786_v32  ;;  %7119 = vmatprep.subr.bf16.mxu0 %v8793_v34  ;;  %v8841_v32 = vcombine.high %v514_v25, %v518_v26  ;;  %v8843_v34 = vcombine.high %v515_v48, %v519_v29  ;;  %v8842_v42 = vcombine.low %v515_v48, %v519_v29  ;;  %v551_v5 = vld [vmem:[%s13247_s1 + $0x1078] sm:$0xff] }
 0x2e0   :  { %7447 = vmatprep.subr.bf16.mxu1 %v8795_v36  ;;  %v526_v36 = vld [vmem:[%s13247_s1 + $0xfb0] sm:$0xff]  ;;  %v555_v14 = vld [vmem:[%s13247_s1 + $0x1098] sm:$0xff]  ;;  %v8874_v17 = vcombine.low %v547_v3, %v551_v5 }
 0x2e1   :  { %v8848_v50 = vcombine.low %v522_v35, %v526_v36  ;;  %v559_v53 = vld [vmem:[%s13247_s1 + $0x10b8] sm:$0xff] }
 0x2e2   :  { %7120 = vmatpush1.bf16.msra.mxu0 %v8792_v44  ;;  %v8849_v44 = vcombine.high %v522_v35, %v526_v36  ;;  %v567_v25 = vld [vmem:[%s13247_s1 + $0x10f8] sm:$0xff]  ;;  %v8882_v48 = vcombine.low %v555_v14, %v559_v53 }
 0x2e3   :  { %7448 = vmatpush1.bf16.msra.mxu1 %v8794_v45  ;;  %7121 = vmatprep.subr.bf16.mxu0 %v8801_v46  ;;  %v8851_v45 = vcombine.high %v523_v38, %v527_v39  ;;  %v530_v46 = vld [vmem:[%s13247_s1 + $0xfd0] sm:$0xff] }
 0x2e4   :  { %7449 = vmatprep.subr.bf16.mxu1 %v8803_v47  ;;  %v534_v47 = vld [vmem:[%s13247_s1 + $0xff0] sm:$0xff] }
 0x2e5   :  { %v8856_v33 = vcombine.low %v530_v46, %v534_v47 }
 0x2e6   :  { %7122 = vmatpush1.bf16.msra.mxu0 %v8800_v54  ;;  %v8857_v54 = vcombine.high %v530_v46, %v534_v47 }
 0x2e7   :  { %7450 = vmatpush1.bf16.msra.mxu1 %v8802_v55  ;;  %7123 = vmatprep.subr.bf16.mxu0 %v8809_v56  ;;  %v8859_v55 = vcombine.high %v531_v58, %v535_v23  ;;  %v538_v56 = vld [vmem:[%s13247_s1 + $0x1010] sm:$0xff] }
 0x2e8   :  { %7451 = vmatprep.subr.bf16.mxu1 %v8811_v57  ;;  %v542_v57 = vld [vmem:[%s13247_s1 + $0x1030] sm:$0xff] }
 0x2e9   :  { %v8864_v6 = vcombine.low %v538_v56, %v542_v57 }
 0x2ea   :  { %7124 = vmatpush1.bf16.msra.mxu0 %v8808_v61  ;;  %v8865_v61 = vcombine.high %v538_v56, %v542_v57 }
 0x2eb   :  { %7452 = vmatpush1.bf16.msra.mxu1 %v8810_v0  ;;  %7125 = vmatprep.subr.bf16.mxu0 %v8817_v2  ;;  %v8867_v0 = vcombine.high %v539_v4, %v543_v60  ;;  %v546_v2 = vld [vmem:[%s13247_s1 + $0x1050] sm:$0xff] }
 0x2ec   :  { %7453 = vmatprep.subr.bf16.mxu1 %v8819_v63  ;;  %v550_v63 = vld [vmem:[%s13247_s1 + $0x1070] sm:$0xff] }
 0x2ed   :  { %v8872_v15 = vcombine.low %v546_v2, %v550_v63 }
 0x2ee   :  { %7126 = vmatpush1.bf16.msra.mxu0 %v8816_v11  ;;  %v8873_v11 = vcombine.high %v546_v2, %v550_v63 }
 0x2ef   :  { %7454 = vmatpush1.bf16.msra.mxu1 %v8818_v12  ;;  %7127 = vmatprep.subr.bf16.mxu0 %v8825_v13  ;;  %v8875_v12 = vcombine.high %v547_v3, %v551_v5  ;;  %v554_v13 = vld [vmem:[%s13247_s1 + $0x1090] sm:$0xff] }
 0x2f0   :  { %7455 = vmatprep.subr.bf16.mxu1 %v8827_v1  ;;  %v558_v1 = vld [vmem:[%s13247_s1 + $0x10b0] sm:$0xff] }
 0x2f1   :  { %v8880_v26 = vcombine.low %v554_v13, %v558_v1 }
 0x2f2   :  { %7128 = vmatpush1.bf16.msra.mxu0 %v8824_v9  ;;  %v8881_v9 = vcombine.high %v554_v13, %v558_v1 }
 0x2f3   :  { %7456 = vmatpush1.bf16.msra.mxu1 %v8826_v40  ;;  %7129 = vmatprep.subr.bf16.mxu0 %v8833_v20  ;;  %v8883_v40 = vcombine.high %v555_v14, %v559_v53  ;;  %v562_v20 = vld [vmem:[%s13247_s1 + $0x10d0] sm:$0xff] }
 0x2f4   :  { %7457 = vmatprep.subr.bf16.mxu1 %v8835_v21  ;;  %v566_v21 = vld [vmem:[%s13247_s1 + $0x10f0] sm:$0xff] }
 0x2f5   :  { %v8889_v29 = vcombine.high %v562_v20, %v566_v21  ;;  %v8888_v35 = vcombine.low %v562_v20, %v566_v21 }
 0x2f6   :  { %7130 = vmatpush1.bf16.msra.mxu0 %v8832_v30 }
 0x2f7   :  { %7458 = vmatpush1.bf16.msra.mxu1 %v8834_v31  ;;  %7131 = vmatprep.subr.bf16.mxu0 %v8841_v32  ;;  %v570_v31 = vld [vmem:[%s13247_s1 + $0x1110] sm:$0xff] }
 0x2f8   :  { %7459 = vmatprep.subr.bf16.mxu1 %v8843_v34  ;;  %v574_v32 = vld [vmem:[%s13247_s1 + $0x1130] sm:$0xff]  ;;  %v575_v34 = vld [vmem:[%s13247_s1 + $0x1138] sm:$0xff] }
 0x2f9   :  { %v8897_v38 = vcombine.high %v570_v31, %v574_v32  ;;  %v8896_v46 = vcombine.low %v570_v31, %v574_v32 }
 0x2fa   :  { %7132 = vmatpush1.bf16.msra.mxu0 %v8840_v41  ;;  %v578_v41 = vld [vmem:[%s13247_s1 + $0x1150] sm:$0xff] }
 0x2fb   :  { %7460 = vmatpush1.bf16.msra.mxu1 %v8842_v42  ;;  %7133 = vmatprep.subr.bf16.mxu0 %v8849_v44  ;;  %v582_v42 = vld [vmem:[%s13247_s1 + $0x1170] sm:$0xff]  ;;  %v579_v44 = vld [vmem:[%s13247_s1 + $0x1158] sm:$0xff] }
 0x2fc   :  { %7461 = vmatprep.subr.bf16.mxu1 %v8851_v45  ;;  %v583_v45 = vld [vmem:[%s13247_s1 + $0x1178] sm:$0xff]  ;;  %v8905_v58 = vcombine.high %v578_v41, %v582_v42  ;;  %v8904_v56 = vcombine.low %v578_v41, %v582_v42 }
 0x2fd   :  { %v8907_v23 = vcombine.high %v579_v44, %v583_v45  ;;  %v8906_v57 = vcombine.low %v579_v44, %v583_v45 }
 0x2fe   :  { %7134 = vmatpush1.bf16.msra.mxu0 %v8848_v50  ;;  %v586_v50 = vld [vmem:[%s13247_s1 + $0x1190] sm:$0xff] }
 0x2ff   :  { %7462 = vmatpush1.bf16.msra.mxu1 %v8850_v52  ;;  %7135 = vmatprep.subr.bf16.mxu0 %v8857_v54  ;;  %v590_v52 = vld [vmem:[%s13247_s1 + $0x11b0] sm:$0xff]  ;;  %v587_v54 = vld [vmem:[%s13247_s1 + $0x1198] sm:$0xff] }
 0x300   :  { %7463 = vmatprep.subr.bf16.mxu1 %v8859_v55  ;;  %v591_v55 = vld [vmem:[%s13247_s1 + $0x11b8] sm:$0xff]  ;;  %v8913_v4 = vcombine.high %v586_v50, %v590_v52  ;;  %v8912_v2 = vcombine.low %v586_v50, %v590_v52 }
 0x301   :  { %v8915_v60 = vcombine.high %v587_v54, %v591_v55  ;;  %v8914_v63 = vcombine.low %v587_v54, %v591_v55 }
 0x302   :  { %7136 = vmatpush1.bf16.msra.mxu0 %v8856_v33  ;;  %v594_v33 = vld [vmem:[%s13247_s1 + $0x11d0] sm:$0xff] }
 0x303   :  { %7464 = vmatpush1.bf16.msra.mxu1 %v8858_v8  ;;  %7146 = vmatprep.subr.bf16.mxu0 %v8865_v61  ;;  %v598_v8 = vld [vmem:[%s13247_s1 + $0x11f0] sm:$0xff]  ;;  %v595_v61 = vld [vmem:[%s13247_s1 + $0x11d8] sm:$0xff] }
 0x304   :  { %7474 = vmatprep.subr.bf16.mxu1 %v8867_v0  ;;  %v599_v0 = vld [vmem:[%s13247_s1 + $0x11f8] sm:$0xff]  ;;  %v8921_v3 = vcombine.high %v594_v33, %v598_v8  ;;  %v8920_v13 = vcombine.low %v594_v33, %v598_v8 }
 0x305   :  { %7138 = vmatmul.mubr.bf16.vlgmr.msra.gmra.mrb[4].mxu0 %v10631_v19  ;;  %v8923_v5 = vcombine.high %v595_v61, %v599_v0  ;;  %v8922_v1 = vcombine.low %v595_v61, %v599_v0 }
 0x306   :  { %7147 = vmatpush1.bf16.msra.mxu0 %v8864_v6  ;;  %7466 = vmatmul.mubr.bf16.vlgmr.msra.gmra.mrb[4].mxu1 %v10631_v19  ;;  %v563_v19 = vld [vmem:[%s13247_s1 + $0x10d8] sm:$0xff]  ;;  %v602_v6 = vld [vmem:[%s13247_s1 + $0x1210] sm:$0xff] }
 0x307   :  { %7475 = vmatpush1.bf16.msra.mxu1 %v8866_v10  ;;  %7148 = vmatprep.subr.bf16.mxu0 %v8873_v11  ;;  %v8891_v30 = vcombine.high %v563_v19, %v567_v25  ;;  %v8890_v36 = vcombine.low %v563_v19, %v567_v25  ;;  %v606_v10 = vld [vmem:[%s13247_s1 + $0x1230] sm:$0xff]  ;;  %v603_v11 = vld [vmem:[%s13247_s1 + $0x1218] sm:$0xff] }
 0x308   :  { %7476 = vmatprep.subr.bf16.mxu1 %v8875_v12  ;;  %7178 = vmatprep.mubr.bf16.mxu0 %v10646_v59  ;;  %v607_v12 = vld [vmem:[%s13247_s1 + $0x1238] sm:$0xff]  ;;  %v8929_v14 = vcombine.high %v602_v6, %v606_v10  ;;  %v8928_v20 = vcombine.low %v602_v6, %v606_v10 }
 0x309   :  { %7506 = vmatprep.mubr.bf16.mxu1 %v10646_v59  ;;  %v571_v59 = vld [vmem:[%s13247_s1 + $0x1118] sm:$0xff]  ;;  %v8931_v53 = vcombine.high %v603_v11, %v607_v12  ;;  %v8930_v21 = vcombine.low %v603_v11, %v607_v12 }
 0x30a   :  { %7149 = vmatpush1.bf16.msra.mxu0 %v8872_v15  ;;  %v8899_v39 = vcombine.high %v571_v59, %v575_v34  ;;  %v8898_v47 = vcombine.low %v571_v59, %v575_v34  ;;  %v610_v15 = vld [vmem:[%s13247_s1 + $0x1250] sm:$0xff] }
 0x30b   :  { %7477 = vmatpush1.bf16.msra.mxu1 %v8874_v17  ;;  %7150 = vmatprep.subr.bf16.mxu0 %v8881_v9  ;;  %v614_v17 = vld [vmem:[%s13247_s1 + $0x1270] sm:$0xff]  ;;  %v611_v9 = vld [vmem:[%s13247_s1 + $0x1258] sm:$0xff] }
 0x30c   :  { %7478 = vmatprep.subr.bf16.mxu1 %v8883_v40  ;;  %v615_v40 = vld [vmem:[%s13247_s1 + $0x1278] sm:$0xff]  ;;  %v8937_v19 = vcombine.high %v610_v15, %v614_v17  ;;  %v8936_v31 = vcombine.low %v610_v15, %v614_v17 }
 0x30d   :  { %v8939_v25 = vcombine.high %v611_v9, %v615_v40  ;;  %v8938_v32 = vcombine.low %v611_v9, %v615_v40 }
 0x30e   :  { %7151 = vmatpush1.bf16.msra.mxu0 %v8880_v26  ;;  %v618_v26 = vld [vmem:[%s13247_s1 + $0x1290] sm:$0xff] }
 0x30f   :  { %7479 = vmatpush1.bf16.msra.mxu1 %v8882_v48  ;;  %7152 = vmatprep.subr.bf16.mxu0 %v8889_v29  ;;  %v622_v48 = vld [vmem:[%s13247_s1 + $0x12b0] sm:$0xff]  ;;  %v619_v29 = vld [vmem:[%s13247_s1 + $0x1298] sm:$0xff] }
 0x310   :  { %7480 = vmatprep.subr.bf16.mxu1 %v8891_v30  ;;  %v623_v30 = vld [vmem:[%s13247_s1 + $0x12b8] sm:$0xff]  ;;  %v8945_v59 = vcombine.high %v618_v26, %v622_v48  ;;  %v8944_v41 = vcombine.low %v618_v26, %v622_v48 }
 0x311   :  { %v8947_v34 = vcombine.high %v619_v29, %v623_v30  ;;  %v8946_v42 = vcombine.low %v619_v29, %v623_v30 }
 0x312   :  { %7153 = vmatpush1.bf16.msra.mxu0 %v8888_v35  ;;  %v626_v35 = vld [vmem:[%s13247_s1 + $0x12d0] sm:$0xff] }
 0x313   :  { %7481 = vmatpush1.bf16.msra.mxu1 %v8890_v36  ;;  %7154 = vmatprep.subr.bf16.mxu0 %v8897_v38  ;;  %v630_v36 = vld [vmem:[%s13247_s1 + $0x12f0] sm:$0xff]  ;;  %v627_v38 = vld [vmem:[%s13247_s1 + $0x12d8] sm:$0xff] }
 0x314   :  { %7482 = vmatprep.subr.bf16.mxu1 %v8899_v39  ;;  %v631_v39 = vld [vmem:[%s13247_s1 + $0x12f8] sm:$0xff]  ;;  %v8953_v44 = vcombine.high %v626_v35, %v630_v36  ;;  %v8952_v50 = vcombine.low %v626_v35, %v630_v36 }
 0x315   :  { %v8955_v45 = vcombine.high %v627_v38, %v631_v39  ;;  %v8954_v52 = vcombine.low %v627_v38, %v631_v39 }
 0x316   :  { %7155 = vmatpush1.bf16.msra.mxu0 %v8896_v46  ;;  %v634_v46 = vld [vmem:[%s13247_s1 + $0x1310] sm:$0xff] }
 0x317   :  { %7483 = vmatpush1.bf16.msra.mxu1 %v8898_v47  ;;  %7156 = vmatprep.subr.bf16.mxu0 %v8905_v58  ;;  %v638_v47 = vld [vmem:[%s13247_s1 + $0x1330] sm:$0xff]  ;;  %v635_v58 = vld [vmem:[%s13247_s1 + $0x1318] sm:$0xff] }
 0x318   :  { %7484 = vmatprep.subr.bf16.mxu1 %v8907_v23  ;;  %v639_v23 = vld [vmem:[%s13247_s1 + $0x1338] sm:$0xff]  ;;  %v8961_v54 = vcombine.high %v634_v46, %v638_v47  ;;  %v8960_v33 = vcombine.low %v634_v46, %v638_v47 }
 0x319   :  { %v8963_v55 = vcombine.high %v635_v58, %v639_v23  ;;  %v8962_v8 = vcombine.low %v635_v58, %v639_v23 }
 0x31a   :  { %7157 = vmatpush1.bf16.msra.mxu0 %v8904_v56  ;;  %v642_v56 = vld [vmem:[%s13247_s1 + $0x1350] sm:$0xff] }
 0x31b   :  { %7485 = vmatpush1.bf16.msra.mxu1 %v8906_v57  ;;  %7158 = vmatprep.subr.bf16.mxu0 %v8913_v4  ;;  %v646_v57 = vld [vmem:[%s13247_s1 + $0x1370] sm:$0xff]  ;;  %v643_v4 = vld [vmem:[%s13247_s1 + $0x1358] sm:$0xff] }
 0x31c   :  { %7486 = vmatprep.subr.bf16.mxu1 %v8915_v60  ;;  %v647_v60 = vld [vmem:[%s13247_s1 + $0x1378] sm:$0xff]  ;;  %v8969_v61 = vcombine.high %v642_v56, %v646_v57  ;;  %v8968_v6 = vcombine.low %v642_v56, %v646_v57 }
 0x31d   :  { %v8971_v0 = vcombine.high %v643_v4, %v647_v60  ;;  %v8970_v10 = vcombine.low %v643_v4, %v647_v60  ;;  %v698_v60 = vld [vmem:[%s13247_s1 + $0x1510] sm:$0xff] }
 0x31e   :  { %7159 = vmatpush1.bf16.msra.mxu0 %v8912_v2  ;;  %v650_v2 = vld [vmem:[%s13247_s1 + $0x1390] sm:$0xff] }
 0x31f   :  { %7487 = vmatpush1.bf16.msra.mxu1 %v8914_v63  ;;  %7160 = vmatprep.subr.bf16.mxu0 %v8921_v3  ;;  %v654_v63 = vld [vmem:[%s13247_s1 + $0x13b0] sm:$0xff]  ;;  %v651_v3 = vld [vmem:[%s13247_s1 + $0x1398] sm:$0xff] }
 0x320   :  { %7488 = vmatprep.subr.bf16.mxu1 %v8923_v5  ;;  %v655_v5 = vld [vmem:[%s13247_s1 + $0x13b8] sm:$0xff]  ;;  %v8977_v11 = vcombine.high %v650_v2, %v654_v63  ;;  %v8976_v15 = vcombine.low %v650_v2, %v654_v63 }
 0x321   :  { %v8979_v12 = vcombine.high %v651_v3, %v655_v5  ;;  %v8978_v17 = vcombine.low %v651_v3, %v655_v5  ;;  %v706_v3 = vld [vmem:[%s13247_s1 + $0x1550] sm:$0xff] }
 0x322   :  { %7161 = vmatpush1.bf16.msra.mxu0 %v8920_v13  ;;  %v658_v13 = vld [vmem:[%s13247_s1 + $0x13d0] sm:$0xff] }
 0x323   :  { %7489 = vmatpush1.bf16.msra.mxu1 %v8922_v1  ;;  %7162 = vmatprep.subr.bf16.mxu0 %v8929_v14  ;;  %v662_v1 = vld [vmem:[%s13247_s1 + $0x13f0] sm:$0xff]  ;;  %v659_v14 = vld [vmem:[%s13247_s1 + $0x13d8] sm:$0xff] }
 0x324   :  { %7490 = vmatprep.subr.bf16.mxu1 %v8931_v53  ;;  %v663_v53 = vld [vmem:[%s13247_s1 + $0x13f8] sm:$0xff]  ;;  %v8985_v9 = vcombine.high %v658_v13, %v662_v1  ;;  %v8984_v26 = vcombine.low %v658_v13, %v662_v1  ;;  %v710_v5 = vld [vmem:[%s13247_s1 + $0x1570] sm:$0xff] }
 0x325   :  { %v8987_v40 = vcombine.high %v659_v14, %v663_v53  ;;  %v8986_v48 = vcombine.low %v659_v14, %v663_v53  ;;  %v9033_v13 = vcombine.high %v706_v3, %v710_v5  ;;  %v714_v14 = vld [vmem:[%s13247_s1 + $0x1590] sm:$0xff] }
 0x326   :  { %7163 = vmatpush1.bf16.msra.mxu0 %v8928_v20  ;;  %v666_v20 = vld [vmem:[%s13247_s1 + $0x1410] sm:$0xff] }
 0x327   :  { %7491 = vmatpush1.bf16.msra.mxu1 %v8930_v21  ;;  %7164 = vmatprep.subr.bf16.mxu0 %v8937_v19  ;;  %v670_v21 = vld [vmem:[%s13247_s1 + $0x1430] sm:$0xff]  ;;  %v667_v19 = vld [vmem:[%s13247_s1 + $0x1418] sm:$0xff] }
 0x328   :  { %7492 = vmatprep.subr.bf16.mxu1 %v8939_v25  ;;  %v671_v25 = vld [vmem:[%s13247_s1 + $0x1438] sm:$0xff]  ;;  %v8993_v29 = vcombine.high %v666_v20, %v670_v21  ;;  %v8992_v35 = vcombine.low %v666_v20, %v670_v21  ;;  %v718_v53 = vld [vmem:[%s13247_s1 + $0x15b0] sm:$0xff] }
 0x329   :  { %v8995_v30 = vcombine.high %v667_v19, %v671_v25  ;;  %v8994_v36 = vcombine.low %v667_v19, %v671_v25  ;;  %v9041_v20 = vcombine.high %v714_v14, %v718_v53  ;;  %v722_v19 = vld [vmem:[%s13247_s1 + $0x15d0] sm:$0xff] }
 0x32a   :  { %7165 = vmatpush1.bf16.msra.mxu0 %v8936_v31  ;;  %v674_v31 = vld [vmem:[%s13247_s1 + $0x1450] sm:$0xff] }
 0x32b   :  { %7493 = vmatpush1.bf16.msra.mxu1 %v8938_v32  ;;  %7166 = vmatprep.subr.bf16.mxu0 %v8945_v59  ;;  %v678_v32 = vld [vmem:[%s13247_s1 + $0x1470] sm:$0xff]  ;;  %v675_v59 = vld [vmem:[%s13247_s1 + $0x1458] sm:$0xff] }
 0x32c   :  { %7494 = vmatprep.subr.bf16.mxu1 %v8947_v34  ;;  %v679_v34 = vld [vmem:[%s13247_s1 + $0x1478] sm:$0xff]  ;;  %v9001_v38 = vcombine.high %v674_v31, %v678_v32  ;;  %v9000_v46 = vcombine.low %v674_v31, %v678_v32  ;;  %v726_v25 = vld [vmem:[%s13247_s1 + $0x15f0] sm:$0xff] }
 0x32d   :  { %v9003_v39 = vcombine.high %v675_v59, %v679_v34  ;;  %v9002_v47 = vcombine.low %v675_v59, %v679_v34  ;;  %v9049_v31 = vcombine.high %v722_v19, %v726_v25  ;;  %v730_v59 = vld [vmem:[%s13247_s1 + $0x1610] sm:$0xff] }
 0x32e   :  { %7167 = vmatpush1.bf16.msra.mxu0 %v8944_v41  ;;  %v682_v41 = vld [vmem:[%s13247_s1 + $0x1490] sm:$0xff] }
 0x32f   :  { %7495 = vmatpush1.bf16.msra.mxu1 %v8946_v42  ;;  %7168 = vmatprep.subr.bf16.mxu0 %v8953_v44  ;;  %v686_v42 = vld [vmem:[%s13247_s1 + $0x14b0] sm:$0xff]  ;;  %v683_v44 = vld [vmem:[%s13247_s1 + $0x1498] sm:$0xff] }
 0x330   :  { %7496 = vmatprep.subr.bf16.mxu1 %v8955_v45  ;;  %v687_v45 = vld [vmem:[%s13247_s1 + $0x14b8] sm:$0xff]  ;;  %v9009_v58 = vcombine.high %v682_v41, %v686_v42  ;;  %v734_v34 = vld [vmem:[%s13247_s1 + $0x1630] sm:$0xff] }
 0x331   :  { %v9011_v23 = vcombine.high %v683_v44, %v687_v45  ;;  %v9010_v56 = vcombine.low %v683_v44, %v687_v45  ;;  %v738_v44 = vld [vmem:[%s13247_s1 + $0x1650] sm:$0xff] }
 0x332   :  { %7169 = vmatpush1.bf16.msra.mxu0 %v8952_v50  ;;  %v690_v50 = vld [vmem:[%s13247_s1 + $0x14d0] sm:$0xff] }
 0x333   :  { %7497 = vmatpush1.bf16.msra.mxu1 %v8954_v52  ;;  %7170 = vmatprep.subr.bf16.mxu0 %v8961_v54  ;;  %v694_v52 = vld [vmem:[%s13247_s1 + $0x14f0] sm:$0xff]  ;;  %v695_v54 = vld [vmem:[%s13247_s1 + $0x14f8] sm:$0xff] }
 0x334   :  { %7498 = vmatprep.subr.bf16.mxu1 %v8963_v55  ;;  %v9008_v55 = vcombine.low %v682_v41, %v686_v42  ;;  %v9017_v57 = vcombine.high %v690_v50, %v694_v52  ;;  %v9057_v41 = vcombine.high %v730_v59, %v734_v34  ;;  %v742_v45 = vld [vmem:[%s13247_s1 + $0x1670] sm:$0xff] }
 0x336   :  { %7171 = vmatpush1.bf16.msra.mxu0 %v8960_v33  ;;  %v702_v33 = vld [vmem:[%s13247_s1 + $0x1530] sm:$0xff] }
 0x337   :  { %7499 = vmatpush1.bf16.msra.mxu1 %v8962_v8  ;;  %7172 = vmatprep.subr.bf16.mxu0 %v8969_v61  ;;  %v703_v8 = vld [vmem:[%s13247_s1 + $0x1538] sm:$0xff]  ;;  %v9016_v61 = vcombine.low %v690_v50, %v694_v52  ;;  %v9025_v2 = vcombine.high %v698_v60, %v702_v33  ;;  %v9065_v50 = vcombine.high %v738_v44, %v742_v45 }
 0x338   :  { %7500 = vmatprep.subr.bf16.mxu1 %v8971_v0 }
 0x33a   :  { %7173 = vmatpush1.bf16.msra.mxu0 %v8968_v6  ;;  %v707_v6 = vld [vmem:[%s13247_s1 + $0x1558] sm:$0xff] }
 0x33b   :  { %7501 = vmatpush1.bf16.msra.mxu1 %v8970_v10  ;;  %7174 = vmatprep.subr.bf16.mxu0 %v8977_v11  ;;  %v711_v10 = vld [vmem:[%s13247_s1 + $0x1578] sm:$0xff]  ;;  %v9024_v11 = vcombine.low %v698_v60, %v702_v33 }
 0x33c   :  { %7502 = vmatprep.subr.bf16.mxu1 %v8979_v12  ;;  %v9035_v1 = vcombine.high %v707_v6, %v711_v10 }
 0x33e   :  { %7175 = vmatpush1.bf16.msra.mxu0 %v8976_v15  ;;  %v715_v15 = vld [vmem:[%s13247_s1 + $0x1598] sm:$0xff] }
 0x33f   :  { %7503 = vmatpush1.bf16.msra.mxu1 %v8978_v17  ;;  %7176 = vmatprep.subr.bf16.mxu0 %v8985_v9  ;;  %v719_v17 = vld [vmem:[%s13247_s1 + $0x15b8] sm:$0xff]  ;;  %v9032_v9 = vcombine.low %v706_v3, %v710_v5 }
 0x340   :  { %7504 = vmatprep.subr.bf16.mxu1 %v8987_v40  ;;  %v9034_v40 = vcombine.low %v707_v6, %v711_v10  ;;  %v9043_v21 = vcombine.high %v715_v15, %v719_v17  ;;  %v762_v6 = vld [vmem:[%s13247_s1 + $0x1710] sm:$0xff] }
 0x341   :  { %v766_v10 = vld [vmem:[%s13247_s1 + $0x1730] sm:$0xff] }
 0x342   :  { %7177 = vmatpush1.bf16.msra.mxu0 %v8984_v26  ;;  %v723_v26 = vld [vmem:[%s13247_s1 + $0x15d8] sm:$0xff] }
 0x343   :  { %7505 = vmatpush1.bf16.msra.mxu1 %v8986_v48  ;;  %7187 = vmatprep.subr.bf16.mxu0 %v8993_v29  ;;  %v727_v48 = vld [vmem:[%s13247_s1 + $0x15f8] sm:$0xff]  ;;  %v9040_v29 = vcombine.low %v714_v14, %v718_v53  ;;  %v9089_v14 = vcombine.high %v762_v6, %v766_v10 }
 0x344   :  { %7515 = vmatprep.subr.bf16.mxu1 %v8995_v30  ;;  %v9042_v30 = vcombine.low %v715_v15, %v719_v17  ;;  %v9051_v32 = vcombine.high %v723_v26, %v727_v48  ;;  %v770_v15 = vld [vmem:[%s13247_s1 + $0x1750] sm:$0xff] }
 0x345   :  { %7179 = vmatmul.mubr.bf16.vlgmr.msra.gmra.mrb[4].mxu0 %v10834_v51  ;;  %v774_v17 = vld [vmem:[%s13247_s1 + $0x1770] sm:$0xff] }
 0x346   :  { %7188 = vmatpush1.bf16.msra.mxu0 %v8992_v35  ;;  %7507 = vmatmul.mubr.bf16.vlgmr.msra.gmra.mrb[4].mxu1 %v10834_v51  ;;  %v691_v51 = vld [vmem:[%s13247_s1 + $0x14d8] sm:$0xff] }
 0x347   :  { %7516 = vmatpush1.bf16.msra.mxu1 %v8994_v36  ;;  %7189 = vmatprep.subr.bf16.mxu0 %v9001_v38  ;;  %v9019_v4 = vcombine.high %v691_v51, %v695_v54  ;;  %v9018_v0 = vcombine.low %v691_v51, %v695_v54  ;;  %v731_v35 = vld [vmem:[%s13247_s1 + $0x1618] sm:$0xff]  ;;  %v9048_v38 = vcombine.low %v722_v19, %v726_v25  ;;  %v746_v51 = vld [vmem:[%s13247_s1 + $0x1690] sm:$0xff] }
 0x348   :  { %7517 = vmatprep.subr.bf16.mxu1 %v9003_v39  ;;  %7219 = vmatprep.mubr.bf16.mxu0 %v10850_v62  ;;  %v735_v36 = vld [vmem:[%s13247_s1 + $0x1638] sm:$0xff]  ;;  %v9050_v39 = vcombine.low %v723_v26, %v727_v48  ;;  %v750_v54 = vld [vmem:[%s13247_s1 + $0x16b0] sm:$0xff]  ;;  %v9097_v19 = vcombine.high %v770_v15, %v774_v17 }
 0x349   :  { %7547 = vmatprep.mubr.bf16.mxu1 %v10850_v62  ;;  %v699_v62 = vld [vmem:[%s13247_s1 + $0x1518] sm:$0xff]  ;;  %v9059_v42 = vcombine.high %v731_v35, %v735_v36  ;;  %v9073_v60 = vcombine.high %v746_v51, %v750_v54  ;;  %v778_v26 = vld [vmem:[%s13247_s1 + $0x1790] sm:$0xff] }
 0x34a   :  { %7190 = vmatpush1.bf16.msra.mxu0 %v9000_v46  ;;  %v9027_v63 = vcombine.high %v699_v62, %v703_v8  ;;  %v9026_v12 = vcombine.low %v699_v62, %v703_v8  ;;  %v739_v46 = vld [vmem:[%s13247_s1 + $0x1658] sm:$0xff]  ;;  %v754_v62 = vld [vmem:[%s13247_s1 + $0x16d0] sm:$0xff] }
 0x34b   :  { %7518 = vmatpush1.bf16.msra.mxu1 %v9002_v47  ;;  %7191 = vmatprep.subr.bf16.mxu0 %v9009_v58  ;;  %v743_v47 = vld [vmem:[%s13247_s1 + $0x1678] sm:$0xff]  ;;  %v9056_v58 = vcombine.low %v730_v59, %v734_v34  ;;  %v758_v8 = vld [vmem:[%s13247_s1 + $0x16f0] sm:$0xff] }
 0x34c   :  { %7519 = vmatprep.subr.bf16.mxu1 %v9011_v23  ;;  %v9058_v23 = vcombine.low %v731_v35, %v735_v36  ;;  %v9067_v52 = vcombine.high %v739_v46, %v743_v47  ;;  %v9081_v3 = vcombine.high %v754_v62, %v758_v8  ;;  %v782_v48 = vld [vmem:[%s13247_s1 + $0x17b0] sm:$0xff] }
 0x34d   :  { %v9105_v59 = vcombine.high %v778_v26, %v782_v48  ;;  %v786_v35 = vld [vmem:[%s13247_s1 + $0x17d0] sm:$0xff] }
 0x34e   :  { %7192 = vmatpush1.bf16.msra.mxu0 %v9008_v55  ;;  %v747_v55 = vld [vmem:[%s13247_s1 + $0x1698] sm:$0xff]  ;;  %v790_v36 = vld [vmem:[%s13247_s1 + $0x17f0] sm:$0xff] }
 0x34f   :  { %7520 = vmatpush1.bf16.msra.mxu1 %v9010_v56  ;;  %7193 = vmatprep.subr.bf16.mxu0 %v9017_v57  ;;  %v751_v56 = vld [vmem:[%s13247_s1 + $0x16b8] sm:$0xff]  ;;  %v9064_v57 = vcombine.low %v738_v44, %v742_v45  ;;  %v9113_v44 = vcombine.high %v786_v35, %v790_v36 }
 0x350   :  { %7521 = vmatprep.subr.bf16.mxu1 %v9019_v4  ;;  %v9066_v4 = vcombine.low %v739_v46, %v743_v47  ;;  %v9075_v33 = vcombine.high %v747_v55, %v751_v56  ;;  %v794_v46 = vld [vmem:[%s13247_s1 + $0x1810] sm:$0xff] }
 0x351   :  { %v798_v47 = vld [vmem:[%s13247_s1 + $0x1830] sm:$0xff] }
 0x352   :  { %7194 = vmatpush1.bf16.msra.mxu0 %v9016_v61  ;;  %v755_v61 = vld [vmem:[%s13247_s1 + $0x16d8] sm:$0xff] }
 0x353   :  { %7522 = vmatpush1.bf16.msra.mxu1 %v9018_v0  ;;  %7195 = vmatprep.subr.bf16.mxu0 %v9025_v2  ;;  %v759_v0 = vld [vmem:[%s13247_s1 + $0x16f8] sm:$0xff]  ;;  %v9072_v2 = vcombine.low %v746_v51, %v750_v54  ;;  %v9121_v51 = vcombine.high %v794_v46, %v798_v47 }
 0x354   :  { %7523 = vmatprep.subr.bf16.mxu1 %v9027_v63  ;;  %v9074_v63 = vcombine.low %v747_v55, %v751_v56  ;;  %v9083_v5 = vcombine.high %v755_v61, %v759_v0  ;;  %v802_v55 = vld [vmem:[%s13247_s1 + $0x1850] sm:$0xff] }
 0x355   :  { %v806_v56 = vld [vmem:[%s13247_s1 + $0x1870] sm:$0xff] }
 0x356   :  { %7196 = vmatpush1.bf16.msra.mxu0 %v9024_v11  ;;  %v763_v11 = vld [vmem:[%s13247_s1 + $0x1718] sm:$0xff] }
 0x357   :  { %7524 = vmatpush1.bf16.msra.mxu1 %v9026_v12  ;;  %7197 = vmatprep.subr.bf16.mxu0 %v9033_v13  ;;  %v767_v12 = vld [vmem:[%s13247_s1 + $0x1738] sm:$0xff]  ;;  %v9080_v13 = vcombine.low %v754_v62, %v758_v8  ;;  %v9129_v62 = vcombine.high %v802_v55, %v806_v56 }
 0x358   :  { %7525 = vmatprep.subr.bf16.mxu1 %v9035_v1  ;;  %v9082_v1 = vcombine.low %v755_v61, %v759_v0  ;;  %v9091_v53 = vcombine.high %v763_v11, %v767_v12  ;;  %v810_v61 = vld [vmem:[%s13247_s1 + $0x1890] sm:$0xff] }
 0x359   :  { %v814_v0 = vld [vmem:[%s13247_s1 + $0x18b0] sm:$0xff] }
 0x35a   :  { %7198 = vmatpush1.bf16.msra.mxu0 %v9032_v9  ;;  %v771_v9 = vld [vmem:[%s13247_s1 + $0x1758] sm:$0xff] }
 0x35b   :  { %7526 = vmatpush1.bf16.msra.mxu1 %v9034_v40  ;;  %7199 = vmatprep.subr.bf16.mxu0 %v9041_v20  ;;  %v775_v40 = vld [vmem:[%s13247_s1 + $0x1778] sm:$0xff]  ;;  %v9088_v20 = vcombine.low %v762_v6, %v766_v10  ;;  %v9137_v6 = vcombine.high %v810_v61, %v814_v0 }
 0x35c   :  { %7527 = vmatprep.subr.bf16.mxu1 %v9043_v21  ;;  %v9090_v21 = vcombine.low %v763_v11, %v767_v12  ;;  %v9099_v25 = vcombine.high %v771_v9, %v775_v40  ;;  %v818_v11 = vld [vmem:[%s13247_s1 + $0x18d0] sm:$0xff] }
 0x35d   :  { %v822_v12 = vld [vmem:[%s13247_s1 + $0x18f0] sm:$0xff] }
 0x35e   :  { %7200 = vmatpush1.bf16.msra.mxu0 %v9040_v29  ;;  %v779_v29 = vld [vmem:[%s13247_s1 + $0x1798] sm:$0xff] }
 0x35f   :  { %7528 = vmatpush1.bf16.msra.mxu1 %v9042_v30  ;;  %7201 = vmatprep.subr.bf16.mxu0 %v9049_v31  ;;  %v783_v30 = vld [vmem:[%s13247_s1 + $0x17b8] sm:$0xff]  ;;  %v9096_v31 = vcombine.low %v770_v15, %v774_v17  ;;  %v826_v17 = vld [vmem:[%s13247_s1 + $0x1910] sm:$0xff] }
 0x360   :  { %7529 = vmatprep.subr.bf16.mxu1 %v9051_v32  ;;  %v9098_v32 = vcombine.low %v771_v9, %v775_v40  ;;  %v9107_v34 = vcombine.high %v779_v29, %v783_v30  ;;  %v830_v9 = vld [vmem:[%s13247_s1 + $0x1930] sm:$0xff]  ;;  %v831_v40 = vld [vmem:[%s13247_s1 + $0x1938] sm:$0xff] }
 0x362   :  { %7202 = vmatpush1.bf16.msra.mxu0 %v9048_v38  ;;  %v787_v38 = vld [vmem:[%s13247_s1 + $0x17d8] sm:$0xff] }
 0x363   :  { %7530 = vmatpush1.bf16.msra.mxu1 %v9050_v39  ;;  %7203 = vmatprep.subr.bf16.mxu0 %v9057_v41  ;;  %v791_v39 = vld [vmem:[%s13247_s1 + $0x17f8] sm:$0xff]  ;;  %v9104_v41 = vcombine.low %v778_v26, %v782_v48  ;;  %v834_v26 = vld [vmem:[%s13247_s1 + $0x1950] sm:$0xff] }
 0x364   :  { %7531 = vmatprep.subr.bf16.mxu1 %v9059_v42  ;;  %v9106_v42 = vcombine.low %v779_v29, %v783_v30  ;;  %v9115_v45 = vcombine.high %v787_v38, %v791_v39  ;;  %v838_v48 = vld [vmem:[%s13247_s1 + $0x1970] sm:$0xff]  ;;  %v835_v29 = vld [vmem:[%s13247_s1 + $0x1958] sm:$0xff] }
 0x365   :  { %v839_v30 = vld [vmem:[%s13247_s1 + $0x1978] sm:$0xff] }
 0x366   :  { %7204 = vmatpush1.bf16.msra.mxu0 %v9056_v58  ;;  %v795_v58 = vld [vmem:[%s13247_s1 + $0x1818] sm:$0xff] }
 0x367   :  { %7532 = vmatpush1.bf16.msra.mxu1 %v9058_v23  ;;  %7205 = vmatprep.subr.bf16.mxu0 %v9065_v50  ;;  %v799_v23 = vld [vmem:[%s13247_s1 + $0x1838] sm:$0xff]  ;;  %v9112_v50 = vcombine.low %v786_v35, %v790_v36  ;;  %v842_v35 = vld [vmem:[%s13247_s1 + $0x1990] sm:$0xff] }
 0x368   :  { %7533 = vmatprep.subr.bf16.mxu1 %v9067_v52  ;;  %v9114_v52 = vcombine.low %v787_v38, %v791_v39  ;;  %v9123_v54 = vcombine.high %v795_v58, %v799_v23  ;;  %v846_v36 = vld [vmem:[%s13247_s1 + $0x19b0] sm:$0xff]  ;;  %v843_v38 = vld [vmem:[%s13247_s1 + $0x1998] sm:$0xff] }
 0x369   :  { %v847_v39 = vld [vmem:[%s13247_s1 + $0x19b8] sm:$0xff] }
 0x36a   :  { %7206 = vmatpush1.bf16.msra.mxu0 %v9064_v57  ;;  %v803_v57 = vld [vmem:[%s13247_s1 + $0x1858] sm:$0xff] }
 0x36b   :  { %7534 = vmatpush1.bf16.msra.mxu1 %v9066_v4  ;;  %7207 = vmatprep.subr.bf16.mxu0 %v9073_v60  ;;  %v807_v4 = vld [vmem:[%s13247_s1 + $0x1878] sm:$0xff]  ;;  %v9120_v60 = vcombine.low %v794_v46, %v798_v47  ;;  %v850_v46 = vld [vmem:[%s13247_s1 + $0x19d0] sm:$0xff] }
 0x36c   :  { %7535 = vmatprep.subr.bf16.mxu1 %v9075_v33  ;;  %v9122_v33 = vcombine.low %v795_v58, %v799_v23  ;;  %v9131_v8 = vcombine.high %v803_v57, %v807_v4  ;;  %v854_v47 = vld [vmem:[%s13247_s1 + $0x19f0] sm:$0xff]  ;;  %v851_v58 = vld [vmem:[%s13247_s1 + $0x19d8] sm:$0xff] }
 0x36d   :  { %v855_v23 = vld [vmem:[%s13247_s1 + $0x19f8] sm:$0xff] }
 0x36e   :  { %7208 = vmatpush1.bf16.msra.mxu0 %v9072_v2  ;;  %v811_v2 = vld [vmem:[%s13247_s1 + $0x1898] sm:$0xff] }
 0x36f   :  { %7536 = vmatpush1.bf16.msra.mxu1 %v9074_v63  ;;  %7209 = vmatprep.subr.bf16.mxu0 %v9081_v3  ;;  %v815_v63 = vld [vmem:[%s13247_s1 + $0x18b8] sm:$0xff]  ;;  %v9128_v3 = vcombine.low %v802_v55, %v806_v56  ;;  %v858_v55 = vld [vmem:[%s13247_s1 + $0x1a10] sm:$0xff] }
 0x370   :  { %7537 = vmatprep.subr.bf16.mxu1 %v9083_v5  ;;  %v9130_v5 = vcombine.low %v803_v57, %v807_v4  ;;  %v9139_v10 = vcombine.high %v811_v2, %v815_v63  ;;  %v862_v56 = vld [vmem:[%s13247_s1 + $0x1a30] sm:$0xff]  ;;  %v859_v57 = vld [vmem:[%s13247_s1 + $0x1a18] sm:$0xff] }
 0x371   :  { %v863_v4 = vld [vmem:[%s13247_s1 + $0x1a38] sm:$0xff] }
 0x372   :  { %7210 = vmatpush1.bf16.msra.mxu0 %v9080_v13  ;;  %v823_v13 = vld [vmem:[%s13247_s1 + $0x18f8] sm:$0xff] }
 0x373   :  { %7538 = vmatpush1.bf16.msra.mxu1 %v9082_v1  ;;  %7211 = vmatprep.subr.bf16.mxu0 %v9089_v14  ;;  %v9136_v1 = vcombine.low %v810_v61, %v814_v0  ;;  %v9138_v14 = vcombine.low %v811_v2, %v815_v63  ;;  %v866_v61 = vld [vmem:[%s13247_s1 + $0x1a50] sm:$0xff]  ;;  %v867_v2 = vld [vmem:[%s13247_s1 + $0x1a58] sm:$0xff] }
 0x374   :  { %7539 = vmatprep.subr.bf16.mxu1 %v9091_v53  ;;  %v9145_v53 = vcombine.high %v818_v11, %v822_v12  ;;  %v870_v0 = vld [vmem:[%s13247_s1 + $0x1a70] sm:$0xff]  ;;  %v871_v63 = vld [vmem:[%s13247_s1 + $0x1a78] sm:$0xff] }
 0x376   :  { %7212 = vmatpush1.bf16.msra.mxu0 %v9088_v20  ;;  %v9144_v20 = vcombine.low %v818_v11, %v822_v12  ;;  %v874_v11 = vld [vmem:[%s13247_s1 + $0x1a90] sm:$0xff] }
 0x377   :  { %7540 = vmatpush1.bf16.msra.mxu1 %v9090_v21  ;;  %7213 = vmatprep.subr.bf16.mxu0 %v9097_v19  ;;  %v9153_v19 = vcombine.high %v826_v17, %v830_v9  ;;  %v878_v12 = vld [vmem:[%s13247_s1 + $0x1ab0] sm:$0xff] }
 0x378   :  { %7541 = vmatprep.subr.bf16.mxu1 %v9099_v25 }
 0x37a   :  { %7214 = vmatpush1.bf16.msra.mxu0 %v9096_v31  ;;  %v9152_v31 = vcombine.low %v826_v17, %v830_v9  ;;  %v882_v17 = vld [vmem:[%s13247_s1 + $0x1ad0] sm:$0xff] }
 0x37b   :  { %7542 = vmatpush1.bf16.msra.mxu1 %v9098_v32  ;;  %7215 = vmatprep.subr.bf16.mxu0 %v9105_v59  ;;  %v9161_v59 = vcombine.high %v834_v26, %v838_v48  ;;  %v886_v9 = vld [vmem:[%s13247_s1 + $0x1af0] sm:$0xff] }
 0x37c   :  { %7543 = vmatprep.subr.bf16.mxu1 %v9107_v34  ;;  %v9163_v34 = vcombine.high %v835_v29, %v839_v30 }
 0x37e   :  { %7216 = vmatpush1.bf16.msra.mxu0 %v9104_v41  ;;  %v9160_v41 = vcombine.low %v834_v26, %v838_v48  ;;  %v890_v26 = vld [vmem:[%s13247_s1 + $0x1b10] sm:$0xff] }
 0x37f   :  { %7544 = vmatpush1.bf16.msra.mxu1 %v9106_v42  ;;  %7217 = vmatprep.subr.bf16.mxu0 %v9113_v44  ;;  %v9162_v42 = vcombine.low %v835_v29, %v839_v30  ;;  %v9169_v44 = vcombine.high %v842_v35, %v846_v36  ;;  %v894_v48 = vld [vmem:[%s13247_s1 + $0x1b30] sm:$0xff]  ;;  %v891_v29 = vld [vmem:[%s13247_s1 + $0x1b18] sm:$0xff] }
 0x380   :  { %7545 = vmatprep.subr.bf16.mxu1 %v9115_v45  ;;  %v9171_v45 = vcombine.high %v843_v38, %v847_v39  ;;  %v895_v30 = vld [vmem:[%s13247_s1 + $0x1b38] sm:$0xff] }
 0x382   :  { %7218 = vmatpush1.bf16.msra.mxu0 %v9112_v50  ;;  %v9168_v50 = vcombine.low %v842_v35, %v846_v36  ;;  %v898_v35 = vld [vmem:[%s13247_s1 + $0x1b50] sm:$0xff] }
 0x383   :  { %7546 = vmatpush1.bf16.msra.mxu1 %v9114_v52  ;;  %7228 = vmatprep.subr.bf16.mxu0 %v9121_v51  ;;  %v9170_v52 = vcombine.low %v843_v38, %v847_v39  ;;  %v9177_v51 = vcombine.high %v850_v46, %v854_v47  ;;  %v902_v36 = vld [vmem:[%s13247_s1 + $0x1b70] sm:$0xff]  ;;  %v899_v38 = vld [vmem:[%s13247_s1 + $0x1b58] sm:$0xff] }
 0x384   :  { %7556 = vmatprep.subr.bf16.mxu1 %v9123_v54  ;;  %v9179_v54 = vcombine.high %v851_v58, %v855_v23  ;;  %v903_v39 = vld [vmem:[%s13247_s1 + $0x1b78] sm:$0xff] }
 0x385   :  { %7220 = vmatmul.mubr.bf16.vlgmr.msra.gmra.mrb[4].mxu0 %v11045_v27 }
 0x386   :  { %7229 = vmatpush1.bf16.msra.mxu0 %v9120_v60  ;;  %7548 = vmatmul.mubr.bf16.vlgmr.msra.gmra.mrb[4].mxu1 %v11045_v27  ;;  %v819_v27 = vld [vmem:[%s13247_s1 + $0x18d8] sm:$0xff]  ;;  %v9176_v60 = vcombine.low %v850_v46, %v854_v47  ;;  %v906_v46 = vld [vmem:[%s13247_s1 + $0x1b90] sm:$0xff] }
 0x387   :  { %7557 = vmatpush1.bf16.msra.mxu1 %v9122_v33  ;;  %7230 = vmatprep.subr.bf16.mxu0 %v9129_v62  ;;  %v9147_v15 = vcombine.high %v819_v27, %v823_v13  ;;  %v9146_v21 = vcombine.low %v819_v27, %v823_v13  ;;  %v9178_v33 = vcombine.low %v851_v58, %v855_v23  ;;  %v875_v27 = vld [vmem:[%s13247_s1 + $0x1a98] sm:$0xff]  ;;  %v910_v47 = vld [vmem:[%s13247_s1 + $0x1bb0] sm:$0xff] }
 0x388   :  { %7558 = vmatprep.subr.bf16.mxu1 %v9131_v8  ;;  %7260 = vmatprep.mubr.bf16.mxu0 %v11060_v37  ;;  %v9185_v62 = vcombine.high %v858_v55, %v862_v56  ;;  %v9187_v8 = vcombine.high %v859_v57, %v863_v4  ;;  %v879_v13 = vld [vmem:[%s13247_s1 + $0x1ab8] sm:$0xff] }
 0x389   :  { %7588 = vmatprep.mubr.bf16.mxu1 %v11060_v37  ;;  %v827_v37 = vld [vmem:[%s13247_s1 + $0x1918] sm:$0xff] }
 0x38a   :  { %7231 = vmatpush1.bf16.msra.mxu0 %v9128_v3  ;;  %v9155_v25 = vcombine.high %v827_v37, %v831_v40  ;;  %v9154_v32 = vcombine.low %v827_v37, %v831_v40  ;;  %v9184_v3 = vcombine.low %v858_v55, %v862_v56  ;;  %v883_v37 = vld [vmem:[%s13247_s1 + $0x1ad8] sm:$0xff]  ;;  %v914_v55 = vld [vmem:[%s13247_s1 + $0x1bd0] sm:$0xff] }
 0x38b   :  { %7559 = vmatpush1.bf16.msra.mxu1 %v9130_v5  ;;  %7232 = vmatprep.subr.bf16.mxu0 %v9137_v6  ;;  %v9186_v5 = vcombine.low %v859_v57, %v863_v4  ;;  %v9193_v6 = vcombine.high %v866_v61, %v870_v0  ;;  %v887_v40 = vld [vmem:[%s13247_s1 + $0x1af8] sm:$0xff]  ;;  %v918_v56 = vld [vmem:[%s13247_s1 + $0x1bf0] sm:$0xff] }
 0x38c   :  { %7560 = vmatprep.subr.bf16.mxu1 %v9139_v10  ;;  %v9195_v10 = vcombine.high %v867_v2, %v871_v63  ;;  %v907_v58 = vld [vmem:[%s13247_s1 + $0x1b98] sm:$0xff] }
 0x38d   :  { %v911_v23 = vld [vmem:[%s13247_s1 + $0x1bb8] sm:$0xff] }
 0x38e   :  { %7233 = vmatpush1.bf16.msra.mxu0 %v9136_v1  ;;  %v9192_v1 = vcombine.low %v866_v61, %v870_v0  ;;  %v915_v57 = vld [vmem:[%s13247_s1 + $0x1bd8] sm:$0xff]  ;;  %v922_v61 = vld [vmem:[%s13247_s1 + $0x1c10] sm:$0xff] }
 0x38f   :  { %7561 = vmatpush1.bf16.msra.mxu1 %v9138_v14  ;;  %7234 = vmatprep.subr.bf16.mxu0 %v9145_v53  ;;  %v9194_v14 = vcombine.low %v867_v2, %v871_v63  ;;  %v9201_v53 = vcombine.high %v874_v11, %v878_v12  ;;  %v919_v4 = vld [vmem:[%s13247_s1 + $0x1bf8] sm:$0xff]  ;;  %v926_v0 = vld [vmem:[%s13247_s1 + $0x1c30] sm:$0xff] }
 0x390   :  { %7562 = vmatprep.subr.bf16.mxu1 %v9147_v15  ;;  %v9203_v15 = vcombine.high %v875_v27, %v879_v13  ;;  %v923_v2 = vld [vmem:[%s13247_s1 + $0x1c18] sm:$0xff] }
 0x391   :  { %v927_v63 = vld [vmem:[%s13247_s1 + $0x1c38] sm:$0xff] }
 0x392   :  { %7235 = vmatpush1.bf16.msra.mxu0 %v9144_v20  ;;  %v9200_v20 = vcombine.low %v874_v11, %v878_v12  ;;  %v930_v11 = vld [vmem:[%s13247_s1 + $0x1c50] sm:$0xff] }
 0x393   :  { %7563 = vmatpush1.bf16.msra.mxu1 %v9146_v21  ;;  %7236 = vmatprep.subr.bf16.mxu0 %v9153_v19  ;;  %v9202_v21 = vcombine.low %v875_v27, %v879_v13  ;;  %v9209_v19 = vcombine.high %v882_v17, %v886_v9  ;;  %v934_v12 = vld [vmem:[%s13247_s1 + $0x1c70] sm:$0xff]  ;;  %v931_v27 = vld [vmem:[%s13247_s1 + $0x1c58] sm:$0xff] }
 0x394   :  { %7564 = vmatprep.subr.bf16.mxu1 %v9155_v25  ;;  %v9211_v25 = vcombine.high %v883_v37, %v887_v40  ;;  %v935_v13 = vld [vmem:[%s13247_s1 + $0x1c78] sm:$0xff] }
 0x396   :  { %7237 = vmatpush1.bf16.msra.mxu0 %v9152_v31  ;;  %v9208_v31 = vcombine.low %v882_v17, %v886_v9  ;;  %v938_v17 = vld [vmem:[%s13247_s1 + $0x1c90] sm:$0xff] }
 0x397   :  { %7565 = vmatpush1.bf16.msra.mxu1 %v9154_v32  ;;  %7238 = vmatprep.subr.bf16.mxu0 %v9161_v59  ;;  %v9210_v32 = vcombine.low %v883_v37, %v887_v40  ;;  %v9217_v59 = vcombine.high %v890_v26, %v894_v48  ;;  %v942_v9 = vld [vmem:[%s13247_s1 + $0x1cb0] sm:$0xff]  ;;  %v939_v37 = vld [vmem:[%s13247_s1 + $0x1c98] sm:$0xff] }
 0x398   :  { %7566 = vmatprep.subr.bf16.mxu1 %v9163_v34  ;;  %v9219_v34 = vcombine.high %v891_v29, %v895_v30  ;;  %v943_v40 = vld [vmem:[%s13247_s1 + $0x1cb8] sm:$0xff] }
 0x39a   :  { %7239 = vmatpush1.bf16.msra.mxu0 %v9160_v41  ;;  %v9216_v41 = vcombine.low %v890_v26, %v894_v48  ;;  %v946_v26 = vld [vmem:[%s13247_s1 + $0x1cd0] sm:$0xff] }
 0x39b   :  { %7567 = vmatpush1.bf16.msra.mxu1 %v9162_v42  ;;  %7240 = vmatprep.subr.bf16.mxu0 %v9169_v44  ;;  %v9218_v42 = vcombine.low %v891_v29, %v895_v30  ;;  %v9225_v44 = vcombine.high %v898_v35, %v902_v36  ;;  %v950_v48 = vld [vmem:[%s13247_s1 + $0x1cf0] sm:$0xff]  ;;  %v951_v29 = vld [vmem:[%s13247_s1 + $0x1cf8] sm:$0xff]  ;;  %v9264_v30 = vcombine.low %v938_v17, %v942_v9 }
 0x39c   :  { %7568 = vmatprep.subr.bf16.mxu1 %v9171_v45  ;;  %v9227_v45 = vcombine.high %v899_v38, %v903_v39 }
 0x39e   :  { %7241 = vmatpush1.bf16.msra.mxu0 %v9168_v50  ;;  %v9224_v50 = vcombine.low %v898_v35, %v902_v36  ;;  %v958_v35 = vld [vmem:[%s13247_s1 + $0x1d30] sm:$0xff]  ;;  %v959_v36 = vld [vmem:[%s13247_s1 + $0x1d38] sm:$0xff] }
 0x39f   :  { %7569 = vmatpush1.bf16.msra.mxu1 %v9170_v52  ;;  %7242 = vmatprep.subr.bf16.mxu0 %v9177_v51  ;;  %v9226_v52 = vcombine.low %v899_v38, %v903_v39  ;;  %v9233_v51 = vcombine.high %v906_v46, %v910_v47  ;;  %v9272_v38 = vcombine.low %v946_v26, %v950_v48 }
 0x3a0   :  { %7570 = vmatprep.subr.bf16.mxu1 %v9179_v54  ;;  %v9235_v54 = vcombine.high %v907_v58, %v911_v23 }
 0x3a2   :  { %7243 = vmatpush1.bf16.msra.mxu0 %v9176_v60  ;;  %v9232_v60 = vcombine.low %v906_v46, %v910_v47  ;;  %v963_v46 = vld [vmem:[%s13247_s1 + $0x1d58] sm:$0xff] }
 0x3a3   :  { %7571 = vmatpush1.bf16.msra.mxu1 %v9178_v33  ;;  %7244 = vmatprep.subr.bf16.mxu0 %v9185_v62  ;;  %v9234_v33 = vcombine.low %v907_v58, %v911_v23  ;;  %v9241_v62 = vcombine.high %v914_v55, %v918_v56  ;;  %v967_v47 = vld [vmem:[%s13247_s1 + $0x1d78] sm:$0xff] }
 0x3a4   :  { %7572 = vmatprep.subr.bf16.mxu1 %v9187_v8  ;;  %v9243_v8 = vcombine.high %v915_v57, %v919_v4 }
 0x3a6   :  { %7245 = vmatpush1.bf16.msra.mxu0 %v9184_v3  ;;  %v9240_v3 = vcombine.low %v914_v55, %v918_v56  ;;  %v971_v55 = vld [vmem:[%s13247_s1 + $0x1d98] sm:$0xff] }
 0x3a7   :  { %7573 = vmatpush1.bf16.msra.mxu1 %v9186_v5  ;;  %7246 = vmatprep.subr.bf16.mxu0 %v9193_v6  ;;  %v9242_v5 = vcombine.low %v915_v57, %v919_v4  ;;  %v9249_v6 = vcombine.high %v922_v61, %v926_v0  ;;  %v975_v56 = vld [vmem:[%s13247_s1 + $0x1db8] sm:$0xff]  ;;  %v9290_v4 = vcombine.low %v963_v46, %v967_v47 }
 0x3a8   :  { %7574 = vmatprep.subr.bf16.mxu1 %v9195_v10  ;;  %v9251_v10 = vcombine.high %v923_v2, %v927_v63 }
 0x3aa   :  { %7247 = vmatpush1.bf16.msra.mxu0 %v9192_v1  ;;  %v9248_v1 = vcombine.low %v922_v61, %v926_v0  ;;  %v979_v61 = vld [vmem:[%s13247_s1 + $0x1dd8] sm:$0xff] }
 0x3ab   :  { %7575 = vmatpush1.bf16.msra.mxu1 %v9194_v14  ;;  %7248 = vmatprep.subr.bf16.mxu0 %v9201_v53  ;;  %v9250_v14 = vcombine.low %v923_v2, %v927_v63  ;;  %v9257_v53 = vcombine.high %v930_v11, %v934_v12  ;;  %v983_v0 = vld [vmem:[%s13247_s1 + $0x1df8] sm:$0xff]  ;;  %v9298_v63 = vcombine.low %v971_v55, %v975_v56 }
 0x3ac   :  { %7576 = vmatprep.subr.bf16.mxu1 %v9203_v15  ;;  %v9259_v15 = vcombine.high %v931_v27, %v935_v13 }
 0x3ae   :  { %7249 = vmatpush1.bf16.msra.mxu0 %v9200_v20  ;;  %v9256_v20 = vcombine.low %v930_v11, %v934_v12  ;;  %v987_v11 = vld [vmem:[%s13247_s1 + $0x1e18] sm:$0xff] }
 0x3af   :  { %7577 = vmatpush1.bf16.msra.mxu1 %v9202_v21  ;;  %7250 = vmatprep.subr.bf16.mxu0 %v9209_v19  ;;  %v9258_v21 = vcombine.low %v931_v27, %v935_v13  ;;  %v9265_v19 = vcombine.high %v938_v17, %v942_v9  ;;  %v991_v12 = vld [vmem:[%s13247_s1 + $0x1e38] sm:$0xff]  ;;  %v9306_v13 = vcombine.low %v979_v61, %v983_v0 }
 0x3b0   :  { %7578 = vmatprep.subr.bf16.mxu1 %v9211_v25  ;;  %v9267_v25 = vcombine.high %v939_v37, %v943_v40  ;;  %v995_v17 = vld [vmem:[%s13247_s1 + $0x1e58] sm:$0xff] }
 0x3b1   :  { %v999_v9 = vld [vmem:[%s13247_s1 + $0x1e78] sm:$0xff] }
 0x3b2   :  { %7251 = vmatpush1.bf16.msra.mxu0 %v9208_v31  ;;  %v9266_v31 = vcombine.low %v939_v37, %v943_v40  ;;  %v9314_v40 = vcombine.low %v987_v11, %v991_v12 }
 0x3b3   :  { %7579 = vmatpush1.bf16.msra.mxu1 %v9210_v32  ;;  %7252 = vmatprep.subr.bf16.mxu0 %v9217_v59  ;;  %v9273_v32 = vcombine.high %v946_v26, %v950_v48  ;;  %v1003_v26 = vld [vmem:[%s13247_s1 + $0x1e98] sm:$0xff] }
 0x3b4   :  { %7580 = vmatprep.subr.bf16.mxu1 %v9219_v34  ;;  %v954_v34 = vld [vmem:[%s13247_s1 + $0x1d10] sm:$0xff]  ;;  %v1007_v48 = vld [vmem:[%s13247_s1 + $0x1eb8] sm:$0xff] }
 0x3b5   :  { %v9280_v58 = vcombine.low %v954_v34, %v958_v35 }
 0x3b6   :  { %7253 = vmatpush1.bf16.msra.mxu0 %v9216_v41  ;;  %v9281_v41 = vcombine.high %v954_v34, %v958_v35  ;;  %v1011_v34 = vld [vmem:[%s13247_s1 + $0x1ed8] sm:$0xff] }
 0x3b7   :  { %7581 = vmatpush1.bf16.msra.mxu1 %v9218_v42  ;;  %7254 = vmatprep.subr.bf16.mxu0 %v9225_v44  ;;  %v962_v44 = vld [vmem:[%s13247_s1 + $0x1d50] sm:$0xff]  ;;  %v1015_v35 = vld [vmem:[%s13247_s1 + $0x1ef8] sm:$0xff] }
 0x3b8   :  { %7582 = vmatprep.subr.bf16.mxu1 %v9227_v45  ;;  %v966_v45 = vld [vmem:[%s13247_s1 + $0x1d70] sm:$0xff] }
 0x3b9   :  { %v9288_v57 = vcombine.low %v962_v44, %v966_v45 }
 0x3ba   :  { %7255 = vmatpush1.bf16.msra.mxu0 %v9224_v50  ;;  %v9289_v50 = vcombine.high %v962_v44, %v966_v45  ;;  %v1019_v44 = vld [vmem:[%s13247_s1 + $0x1f18] sm:$0xff] }
 0x3bb   :  { %7583 = vmatpush1.bf16.msra.mxu1 %v9226_v52  ;;  %7256 = vmatprep.subr.bf16.mxu0 %v9233_v51  ;;  %v9291_v52 = vcombine.high %v963_v46, %v967_v47  ;;  %v970_v51 = vld [vmem:[%s13247_s1 + $0x1d90] sm:$0xff]  ;;  %v1023_v45 = vld [vmem:[%s13247_s1 + $0x1f38] sm:$0xff]  ;;  %v9338_v47 = vcombine.low %v1011_v34, %v1015_v35 }
 0x3bc   :  { %7584 = vmatprep.subr.bf16.mxu1 %v9235_v54  ;;  %v974_v54 = vld [vmem:[%s13247_s1 + $0x1db0] sm:$0xff] }
 0x3bd   :  { %v9296_v2 = vcombine.low %v970_v51, %v974_v54 }
 0x3be   :  { %7257 = vmatpush1.bf16.msra.mxu0 %v9232_v60  ;;  %v9297_v60 = vcombine.high %v970_v51, %v974_v54  ;;  %v1027_v51 = vld [vmem:[%s13247_s1 + $0x1f58] sm:$0xff] }
 0x3bf   :  { %7585 = vmatpush1.bf16.msra.mxu1 %v9234_v33  ;;  %7258 = vmatprep.subr.bf16.mxu0 %v9241_v62  ;;  %v9299_v33 = vcombine.high %v971_v55, %v975_v56  ;;  %v978_v62 = vld [vmem:[%s13247_s1 + $0x1dd0] sm:$0xff]  ;;  %v1031_v54 = vld [vmem:[%s13247_s1 + $0x1f78] sm:$0xff]  ;;  %v9346_v56 = vcombine.low %v1019_v44, %v1023_v45 }
 0x3c0   :  { %7586 = vmatprep.subr.bf16.mxu1 %v9243_v8  ;;  %v982_v8 = vld [vmem:[%s13247_s1 + $0x1df0] sm:$0xff] }
 0x3c1   :  { %v9304_v27 = vcombine.low %v978_v62, %v982_v8 }
 0x3c2   :  { %7259 = vmatpush1.bf16.msra.mxu0 %v9240_v3  ;;  %v9305_v3 = vcombine.high %v978_v62, %v982_v8  ;;  %v1056_v62 = vsub.s32 1, %v9835_v43  ;;  %v1035_v8 = vld [vmem:[%s13247_s1 + $0x1f98] sm:$0xff] }
 0x3c3   :  { %7587 = vmatpush1.bf16.msra.mxu1 %v9242_v5  ;;  %7269 = vmatprep.subr.bf16.mxu0 %v9249_v6  ;;  %v9307_v5 = vcombine.high %v979_v61, %v983_v0  ;;  %v986_v6 = vld [vmem:[%s13247_s1 + $0x1e10] sm:$0xff]  ;;  %v1039_v61 = vld [vmem:[%s13247_s1 + $0x1fb8] sm:$0xff]  ;;  %v13004_v0 = vld [vmem:[%s13248_s2] sm:$0xff] }
 0x3c4   :  { %7597 = vmatprep.subr.bf16.mxu1 %v9251_v10  ;;  %v990_v10 = vld [vmem:[%s13247_s1 + $0x1e30] sm:$0xff] }
 0x3c5   :  { %7261 = vmatmul.mubr.bf16.vlgmr.msra.gmra.mrb[4].mxu0 %v11248_v7  ;;  %v9312_v37 = vcombine.low %v986_v6, %v990_v10 }
 0x3c6   :  { %7270 = vmatpush1.bf16.msra.mxu0 %v9248_v1  ;;  %7589 = vmatmul.mubr.bf16.vlgmr.msra.gmra.mrb[4].mxu1 %v11248_v7  ;;  %v947_v7 = vld [vmem:[%s13247_s1 + $0x1cd8] sm:$0xff]  ;;  %v9313_v1 = vcombine.high %v986_v6, %v990_v10  ;;  %v9363_v6 = vcombine.high %v1035_v8, %v1039_v61  ;;  %v1042_v10 = vld [vmem:[%s13247_s1 + $0x1fd0] sm:$0xff] }
 0x3c7   :  { %7598 = vmatpush1.bf16.msra.mxu1 %v9250_v14  ;;  %7271 = vmatprep.subr.bf16.mxu0 %v9257_v53  ;;  %v9275_v59 = vcombine.high %v947_v7, %v951_v29  ;;  %v9274_v39 = vcombine.low %v947_v7, %v951_v29  ;;  %v9315_v14 = vcombine.high %v987_v11, %v991_v12  ;;  %v994_v53 = vld [vmem:[%s13247_s1 + $0x1e50] sm:$0xff] }
 0x3c8   :  { %7599 = vmatprep.subr.bf16.mxu1 %v9259_v15  ;;  %7301 = vmatprep.mubr.bf16.mxu0 %v11264_v16  ;;  %v998_v15 = vld [vmem:[%s13247_s1 + $0x1e70] sm:$0xff]  ;;  %v9322_v29 = vcombine.low %v995_v17, %v999_v9  ;;  %v1057_v12 = vrot.slane %v13004_v0, %v1056_v62 }
 0x3c9   :  { %7629 = vmatprep.mubr.bf16.mxu1 %v11264_v16  ;;  %v955_v16 = vld [vmem:[%s13247_s1 + $0x1d18] sm:$0xff]  ;;  %v9320_v7 = vcombine.low %v994_v53, %v998_v15  ;;  %v1046_v11 = vld [vmem:[%s13247_s1 + $0x1ff0] sm:$0xff] }
 0x3ca   :  { %7272 = vmatpush1.bf16.msra.mxu0 %v9256_v20  ;;  %v9283_v42 = vcombine.high %v955_v16, %v959_v36  ;;  %v9282_v23 = vcombine.low %v955_v16, %v959_v36  ;;  %v9321_v20 = vcombine.high %v994_v53, %v998_v15  ;;  %v9330_v36 = vcombine.low %v1003_v26, %v1007_v48 }
 0x3cb   :  { %7600 = vmatpush1.bf16.msra.mxu1 %v9258_v21  ;;  %7273 = vmatprep.subr.bf16.mxu0 %v9265_v19  ;;  %v9323_v21 = vcombine.high %v995_v17, %v999_v9  ;;  %v1002_v19 = vld [vmem:[%s13247_s1 + $0x1e90] sm:$0xff]  ;;  %v9362_v53 = vcombine.low %v1035_v8, %v1039_v61  ;;  %v9369_v15 = vcombine.high %v1042_v10, %v1046_v11  ;;  %v9678_v8 = vld [vmem:[%s13249_s3 + $0xf8] sm:$0xff]  }
 0x3cc   :  { %7601 = vmatprep.subr.bf16.mxu1 %v9267_v25  ;;  %v1006_v25 = vld [vmem:[%s13247_s1 + $0x1eb0] sm:$0xff]  ;;  %v9526_v9 = vadd.f32 %v12122_v24, %v1057_v12  ;;  %v9651_v24 = vld [vmem:[%s13249_s3] sm:$0xff]  }
 0x3cd   :  { %v9328_v16 = vcombine.low %v1002_v19, %v1006_v25 }
 0x3ce   :  { %7274 = vmatpush1.bf16.msra.mxu0 %v9264_v30  ;;  %v9329_v30 = vcombine.high %v1002_v19, %v1006_v25  ;;  %v9650_v19 = vld [vmem:[%s13249_s3 + $0xc0] sm:$0xff]   ;;  %v7639_v25 = vmax.f32 %v9526_v9, 0.0  ;;  %v9693_v9 = vld [vmem:[%s13249_s3 + $0x158] sm:$0xff]  }
 0x3cf   :  { %7602 = vmatpush1.bf16.msra.mxu1 %v9266_v31  ;;  %7275 = vmatprep.subr.bf16.mxu0 %v9273_v32  ;;  %v9331_v31 = vcombine.high %v1003_v26, %v1007_v48  ;;  %v1010_v32 = vld [vmem:[%s13247_s1 + $0x1ed0] sm:$0xff]  ;;  %v9653_v48 = vld [vmem:[%s13249_s3 + $0x48] sm:$0xff]  }
 0x3d0   :  { %7603 = vmatprep.subr.bf16.mxu1 %v9275_v59  ;;  %v1014_v59 = vld [vmem:[%s13247_s1 + $0x1ef0] sm:$0xff] }
 0x3d1   :  { %v9336_v46 = vcombine.low %v1010_v32, %v1014_v59 }
 0x3d2   :  { %7276 = vmatpush1.bf16.msra.mxu0 %v9272_v38  ;;  %v9337_v38 = vcombine.high %v1010_v32, %v1014_v59  ;;  %v9656_v32 = vld [vmem:[%s13249_s3 + $0x88] sm:$0xff]   ;;  %v9657_v59 = vld [vmem:[%s13249_s3 + $0x50] sm:$0xff]  }
 0x3d3   :  { %7604 = vmatpush1.bf16.msra.mxu1 %v9274_v39  ;;  %7277 = vmatprep.subr.bf16.mxu0 %v9281_v41  ;;  %v9339_v39 = vcombine.high %v1011_v34, %v1015_v35  ;;  %v1018_v41 = vld [vmem:[%s13247_s1 + $0x1f10] sm:$0xff] }
 0x3d4   :  { %7605 = vmatprep.subr.bf16.mxu1 %v9283_v42  ;;  %v1022_v42 = vld [vmem:[%s13247_s1 + $0x1f30] sm:$0xff] }
 0x3d5   :  { %v9344_v55 = vcombine.low %v1018_v41, %v1022_v42  ;;  %v9659_v34 = vld [vmem:[%s13249_s3 + $0x10] sm:$0xff]  }
 0x3d6   :  { %7278 = vmatpush1.bf16.msra.mxu0 %v9280_v58  ;;  %v9345_v58 = vcombine.high %v1018_v41, %v1022_v42  ;;  %v9660_v35 = vld [vmem:[%s13249_s3 + $0x90] sm:$0xff]   ;;  %v9665_v41 = vld [vmem:[%s13249_s3 + $0x60] sm:$0xff]  }
 0x3d7   :  { %7606 = vmatpush1.bf16.msra.mxu1 %v9282_v23  ;;  %7279 = vmatprep.subr.bf16.mxu0 %v9289_v50  ;;  %v9347_v23 = vcombine.high %v1019_v44, %v1023_v45  ;;  %v1026_v50 = vld [vmem:[%s13247_s1 + $0x1f50] sm:$0xff]  ;;  %v9666_v42 = vld [vmem:[%s13249_s3 + $0xe0] sm:$0xff]   ;;  %v1052_v45 = vsub.s32 0, %v9835_v43 }
 0x3d8   :  { %7607 = vmatprep.subr.bf16.mxu1 %v9291_v52  ;;  %v1030_v52 = vld [vmem:[%s13247_s1 + $0x1f70] sm:$0xff]  ;;  %v9667_v44 = vld [vmem:[%s13249_s3 + $0x20] sm:$0xff]  }
 0x3da   :  { %7280 = vmatpush1.bf16.msra.mxu0 %v9288_v57  ;;  %v9353_v57 = vcombine.high %v1026_v50, %v1030_v52 }
 0x3db   :  { %7608 = vmatpush1.bf16.msra.mxu1 %v9290_v4  ;;  %7281 = vmatprep.subr.bf16.mxu0 %v9297_v60  ;;  %v9355_v4 = vcombine.high %v1027_v51, %v1031_v54  ;;  %v1034_v60 = vld [vmem:[%s13247_s1 + $0x1f90] sm:$0xff] }
 0x3dc   :  { %7609 = vmatprep.subr.bf16.mxu1 %v9299_v33  ;;  %v1038_v33 = vld [vmem:[%s13247_s1 + $0x1fb0] sm:$0xff] }
 0x3de   :  { %7282 = vmatpush1.bf16.msra.mxu0 %v9296_v2  ;;  %v1064_v2 = vsub.s32 3, %v9835_v43 }
 0x3df   :  { %7610 = vmatpush1.bf16.msra.mxu1 %v9298_v63  ;;  %7283 = vmatprep.subr.bf16.mxu0 %v9305_v3  ;;  %v9352_v63 = vcombine.low %v1026_v50, %v1030_v52  ;;  %v9354_v3 = vcombine.low %v1027_v51, %v1031_v54  ;;  %v9671_v50 = vld [vmem:[%s13249_s3 + $0x28] sm:$0xff]   ;;  %v1053_v52 = vrot.slane %v13004_v0, %v1052_v45  ;;  %v9673_v54 = vld [vmem:[%s13249_s3 + $0x70] sm:$0xff]  }
 0x3e0   :  { %7611 = vmatprep.subr.bf16.mxu1 %v9307_v5  ;;  %v9361_v5 = vcombine.high %v1034_v60, %v1038_v33  ;;  %v9672_v51 = vld [vmem:[%s13249_s3 + $0xa8] sm:$0xff]  }
 0x3e2   :  { %7284 = vmatpush1.bf16.msra.mxu0 %v9304_v27  ;;  %v1043_v27 = vld [vmem:[%s13247_s1 + $0x1fd8] sm:$0xff] }
 0x3e3   :  { %7612 = vmatpush1.bf16.msra.mxu1 %v9306_v13  ;;  %7285 = vmatprep.subr.bf16.mxu0 %v9313_v1  ;;  %v1047_v13 = vld [vmem:[%s13247_s1 + $0x1ff8] sm:$0xff]  ;;  %v1065_v1 = vrot.slane %v13004_v0, %v1064_v2 }
 0x3e4   :  { %7613 = vmatprep.subr.bf16.mxu1 %v9315_v14  ;;  %v9360_v14 = vcombine.low %v1034_v60, %v1038_v33  ;;  %v9371_v17 = vcombine.high %v1043_v27, %v1047_v13  ;;  %v9676_v60 = vld [vmem:[%s13249_s3 + $0xb0] sm:$0xff]   ;;  %v9677_v33 = vld [vmem:[%s13249_s3 + $0x78] sm:$0xff]  }
 0x3e5   :  { %v9680_v2 = vld [vmem:[%s13249_s3 + $0xb8] sm:$0xff]  }
 0x3e6   :  { %7286 = vmatpush1.bf16.msra.mxu0 %v9312_v37  ;;  %v9528_v37 = vadd.f32 %v12130_v28, %v1065_v1  ;;  %v9652_v28 = vld [vmem:[%s13249_s3 + $0x80] sm:$0xff]   ;;  %v9688_v1 = vld [vmem:[%s13249_s3 + $0x188] sm:$0xff]  }
 0x3e7   :  { %7614 = vmatpush1.bf16.msra.mxu1 %v9314_v40  ;;  %7287 = vmatprep.subr.bf16.mxu0 %v9321_v20  ;;  %v9368_v40 = vcombine.low %v1042_v10, %v1046_v11  ;;  %v9370_v20 = vcombine.low %v1043_v27, %v1047_v13  ;;  %v9684_v10 = vld [vmem:[%s13249_s3 + $0x180] sm:$0xff]   ;;  %v9685_v11 = vld [vmem:[%s13249_s3 + $0x148] sm:$0xff]  }
 0x3e8   :  { %7615 = vmatprep.subr.bf16.mxu1 %v9323_v21  ;;  %v9649_v21 = vld [vmem:[%s13249_s3 + $0x40] sm:$0xff]   ;;  %v7641_v26 = vmax.f32 %v9528_v37, 0.0  ;;  %v9686_v27 = vld [vmem:[%s13249_s3 + $0x1c8] sm:$0xff]   ;;  %v9694_v37 = vld [vmem:[%s13249_s3 + $0x1d8] sm:$0xff]  }
 0x3e9   :  { %v9687_v13 = vld [vmem:[%s13249_s3 + $0x108] sm:$0xff]  }
 0x3ea   :  { %7288 = vmatpush1.bf16.msra.mxu0 %v9320_v7  ;;  %v7647_v7 = vpack.c.bf16 %v7639_v25, %v7639_v25  ;;  %v9699_v25 = vld [vmem:[%s13249_s3 + $0x120] sm:$0xff]  }
 0x3eb   :  { %7616 = vmatpush1.bf16.msra.mxu1 %v9322_v29  ;;  %7289 = vmatprep.subr.bf16.mxu0 %v9329_v30  ;;  %v9654_v29 = vld [vmem:[%s13249_s3 + $0xc8] sm:$0xff]   ;;  %v7649_v30 = vpack.c.bf16 %v7641_v26, %v7641_v26  ;;  %v9700_v26 = vld [vmem:[%s13249_s3 + $0x1a0] sm:$0xff]  }
 0x3ec   :  { %7617 = vmatprep.subr.bf16.mxu1 %v9331_v31  ;;  %v9655_v31 = vld [vmem:[%s13249_s3 + $0x8] sm:$0xff]  }
 0x3ee   :  { %7290 = vmatpush1.bf16.msra.mxu0 %v9328_v16  ;;  %v9661_v16 = vld [vmem:[%s13249_s3 + $0x58] sm:$0xff]  }
 0x3ef   :  { %7618 = vmatpush1.bf16.msra.mxu1 %v9330_v36  ;;  %7291 = vmatprep.subr.bf16.mxu0 %v9337_v38  ;;  %v9662_v36 = vld [vmem:[%s13249_s3 + $0xd8] sm:$0xff]  }
 0x3f0   :  { %7619 = vmatprep.subr.bf16.mxu1 %v9339_v39  ;;  %v9663_v38 = vld [vmem:[%s13249_s3 + $0x18] sm:$0xff]  }
 0x3f1   :  { %v9664_v39 = vld [vmem:[%s13249_s3 + $0x98] sm:$0xff]  }
 0x3f2   :  { %7292 = vmatpush1.bf16.msra.mxu0 %v9336_v46  ;;  %v9668_v46 = vld [vmem:[%s13249_s3 + $0xa0] sm:$0xff]  }
 0x3f3   :  { %7620 = vmatpush1.bf16.msra.mxu1 %v9338_v47  ;;  %7293 = vmatprep.subr.bf16.mxu0 %v9345_v58  ;;  %v9669_v47 = vld [vmem:[%s13249_s3 + $0x68] sm:$0xff]   ;;  %v1060_v58 = vsub.s32 2, %v9835_v43 }
 0x3f4   :  { %7621 = vmatprep.subr.bf16.mxu1 %v9347_v23  ;;  %v9670_v23 = vld [vmem:[%s13249_s3 + $0xe8] sm:$0xff]  }
 0x3f6   :  { %7294 = vmatpush1.bf16.msra.mxu0 %v9344_v55  ;;  %v1061_v55 = vrot.slane %v13004_v0, %v1060_v58 }
 0x3f7   :  { %7622 = vmatpush1.bf16.msra.mxu1 %v9346_v56  ;;  %7295 = vmatprep.subr.bf16.mxu0 %v9353_v57  ;;  %v9674_v56 = vld [vmem:[%s13249_s3 + $0xf0] sm:$0xff]  }
 0x3f8   :  { %7623 = vmatprep.subr.bf16.mxu1 %v9355_v4  ;;  %v9675_v57 = vld [vmem:[%s13249_s3 + $0x30] sm:$0xff]   ;;  %v9525_v4 = vadd.f32 %v12112_v18, %v1053_v52  ;;  %v9527_v62 = vadd.f32 %v12120_v22, %v1061_v55  ;;  %v9679_v18 = vld [vmem:[%s13249_s3 + $0x38] sm:$0xff]   ;;  %v9681_v22 = vld [vmem:[%s13249_s3 + $0x140] sm:$0xff]  }
 0x3fa   :  { %7296 = vmatpush1.bf16.msra.mxu0 %v9352_v63  ;;  %v7638_v61 = vmax.f32 %v9525_v4, 0.0  ;;  %v7640_v63 = vmax.f32 %v9527_v62, 0.0 }
 0x3fb   :  { %7624 = vmatpush1.bf16.msra.mxu1 %v9354_v3  ;;  %7297 = vmatprep.subr.bf16.mxu0 %v9361_v5  ;;  %v9682_v3 = vld [vmem:[%s13249_s3 + $0x1c0] sm:$0xff]  }
 0x3fc   :  { %7625 = vmatprep.subr.bf16.mxu1 %v9363_v6  ;;  %v9683_v5 = vld [vmem:[%s13249_s3 + $0x100] sm:$0xff]   ;;  %v7646_v6 = vpack.c.bf16 %v7638_v61, %v7638_v61  ;;  %v7648_v12 = vpack.c.bf16 %v7640_v63, %v7640_v63 }
 0x3fd   :  { %v9372_v63 = vld [vmem:[%s13250_s4] ss:$0 sm:$0xff]  ;;  %s9738_s4 = smov [#allocation2]  }
 0x3fe   :  { %7298 = vmatpush1.bf16.msra.mxu0 %v9360_v14  ;;  %v9689_v14 = vld [vmem:[%s13249_s3 + $0x150] sm:$0xff]   ;;  %s8340_s27 = sshll.u32 %s9738_s4, 4  ;;  %s8341_s27 = int_to_ptr.vmem [resolvable:$true] %s8340_s27 }
 0x3ff   :  { %7626 = vmatpush1.bf16.msra.mxu1 %v9362_v53  ;;  %7299 = vmatprep.subr.bf16.mxu0 %v9369_v15  ;;  %v9690_v53 = vld [vmem:[%s13249_s3 + $0x1d0] sm:$0xff]   ;;  %s9713_s28 = scalar_lea.vmem %s8341_s27, 32  ;;  %p9718_p1 = scmp.lt.s32.totalorder %s8341_s27, %s8341_s27 }
 0x400   :  { %7627 = vmatprep.subr.bf16.mxu1 %v9371_v17  ;;  %v9691_v15 = vld [vmem:[%s13249_s3 + $0x110] sm:$0xff]   ;;  %p9714_p0 = scmp.ne.s32.totalorder %s8341_s27, %s9713_s28  ;;  %p9719_p2 = scmp.lt.s32.totalorder %s9713_s28, %s9713_s28 }
 0x401   :  { %v9692_v17 = vld [vmem:[%s13249_s3 + $0x190] sm:$0xff]  }
 0x402   :  { %7300 = vmatpush1.bf16.msra.mxu0 %v9368_v40  ;;  %v9695_v40 = vld [vmem:[%s13249_s3 + $0x118] sm:$0xff]   ;;  %p9720_p3 = por %p9719_p2, %p9718_p1 }
 0x403   :  { %7628 = vmatpush1.bf16.msra.mxu1 %v9370_v20  ;;  %9437 = vmatprep.subr.bf16.mxu0 %v9649_v21  ;;  %v9696_v20 = vld [vmem:[%s13249_s3 + $0x198] sm:$0xff]   ;;  %v9697_v21 = vld [vmem:[%s13249_s3 + $0x160] sm:$0xff]  }
 0x404   :  { %9459 = vmatprep.subr.bf16.mxu1 %v9650_v19  ;;  %v9698_v19 = vld [vmem:[%s13249_s3 + $0x1e0] sm:$0xff]   ;;  %p9721_p4 = pnand %p9720_p3, %p9714_p0 }
 0x405   :  { %7302 = vmatmul.mubr.bf16.vlgmr.msra.gmra.mrb[4].mxu0 %v11452_v49 }
 0x406   :  { %7630 = vmatmul.mubr.bf16.vlgmr.msra.gmra.mrb[4].mxu1 %v11452_v49  ;;  %9438 = vmatpush3.bf16.msra.mxu0 %v9651_v24  ;;  %v9658_v49 = vld [vmem:[%s13249_s3 + $0xd0] sm:$0xff]   ;;  %v9701_v24 = vld [vmem:[%s13249_s3 + $0x168] sm:$0xff]  }
 0x407   :  { %8205 = vmatprep.mubr.bf16.mxu0 %v7647_v7  ;;  %9460 = vmatpush3.bf16.msra.mxu1 %v9652_v28  ;;  %v9702_v28 = vld [vmem:[%s13249_s3 + $0x1e8] sm:$0xff]  }
 0x408   :  { %8245 = vmatprep.mubr.bf16.mxu1 %v7649_v30  ;;  %9439 = vmatprep.subr.bf16.mxu0 %v9653_v48  ;;  %v9703_v48 = vld [vmem:[%s13249_s3 + $0x128] sm:$0xff]   ;;  %v9706_v30 = vld [vmem:[%s13249_s3 + $0x1f0] sm:$0xff]  }
 0x409   :  { %9461 = vmatprep.subr.bf16.mxu1 %v9654_v29  ;;  %v9704_v7 = vld [vmem:[%s13249_s3 + $0x1a8] sm:$0xff]   ;;  %v9705_v29 = vld [vmem:[%s13249_s3 + $0x170] sm:$0xff]  }
 0x40a   :  { %9440 = vmatpush3.bf16.msra.mxu0 %v9655_v31  ;;  %v9707_v31 = vld [vmem:[%s13249_s3 + $0x130] sm:$0xff]  }
 0x40b   :  { %9462 = vmatpush3.bf16.msra.mxu1 %v9656_v32  ;;  %9441 = vmatprep.subr.bf16.mxu0 %v9657_v59  ;;  %v9708_v32 = vld [vmem:[%s13249_s3 + $0x1b0] sm:$0xff]   ;;  %v9709_v59 = vld [vmem:[%s13249_s3 + $0x178] sm:$0xff]  }
 0x40c   :  { %9463 = vmatprep.subr.bf16.mxu1 %v9658_v49  ;;  %v9710_v49 = vld [vmem:[%s13249_s3 + $0x1f8] sm:$0xff]  }
 0x40e   :  { %9442 = vmatpush3.bf16.msra.mxu0 %v9659_v34  ;;  %v9711_v34 = vld [vmem:[%s13249_s3 + $0x138] sm:$0xff]  }
 0x40f   :  { %9464 = vmatpush3.bf16.msra.mxu1 %v9660_v35  ;;  %9443 = vmatprep.subr.bf16.mxu0 %v9661_v16  ;;  %v9712_v35 = vld [vmem:[%s13249_s3 + $0x1b8] sm:$0xff]   ;;  %v1068_v16 = vsub.s32 4, %v9835_v43 }
 0x410   :  { %9465 = vmatprep.subr.bf16.mxu1 %v9662_v36  ;;  %v1076_v36 = vsub.s32 6, %v9835_v43 }
 0x412   :  { %9444 = vmatpush3.bf16.msra.mxu0 %v9663_v38  ;;  %v1072_v38 = vsub.s32 5, %v9835_v43 }
 0x413   :  { %9466 = vmatpush3.bf16.msra.mxu1 %v9664_v39  ;;  %9445 = vmatprep.subr.bf16.mxu0 %v9665_v41  ;;  %v1080_v39 = vsub.s32 7, %v9835_v43  ;;  %v1069_v41 = vrot.slane %v13004_v0, %v1068_v16 }
 0x414   :  { %9467 = vmatprep.subr.bf16.mxu1 %v9666_v42  ;;  %v1077_v42 = vrot.slane %v13004_v0, %v1076_v36 }
 0x415   :  { %v1081_v45 = vrot.slane %v13004_v0, %v1080_v39 }
 0x416   :  { %9446 = vmatpush3.bf16.msra.mxu0 %v9667_v44  ;;  %v1073_v44 = vrot.slane %v13004_v0, %v1072_v38 }
 0x417   :  { %9468 = vmatpush3.bf16.msra.mxu1 %v9668_v46  ;;  %9447 = vmatprep.subr.bf16.mxu0 %v9669_v47 }
 0x418   :  { %9469 = vmatprep.subr.bf16.mxu1 %v9670_v23 }
 0x41a   :  { %9448 = vmatpush3.bf16.msra.mxu0 %v9671_v50 }
 0x41b   :  { %9470 = vmatpush3.bf16.msra.mxu1 %v9672_v51  ;;  %9449 = vmatprep.subr.bf16.mxu0 %v9673_v54 }
 0x41c   :  { %9471 = vmatprep.subr.bf16.mxu1 %v9674_v56 }
 0x41e   :  { %9450 = vmatpush3.bf16.msra.mxu0 %v9675_v57 }
 0x41f   :  { %9472 = vmatpush3.bf16.msra.mxu1 %v9676_v60  ;;  %9451 = vmatprep.subr.bf16.mxu0 %v9677_v33 }
 0x420   :  { %9473 = vmatprep.subr.bf16.mxu1 %v9678_v8 }
 0x422   :  { %9452 = vmatpush3.bf16.msra.mxu0 %v9679_v18 }
 0x423   :  { %9474 = vmatpush3.bf16.msra.mxu1 %v9680_v2  ;;  %9481 = vmatprep.subr.bf16.mxu0 %v9681_v22 }
 0x424   :  { %9503 = vmatprep.subr.bf16.mxu1 %v9682_v3 }
 0x425   :  { %8206 = vmatmul.mubr.bf16.vlgmr.msra.gmra.mrb[8].mxu0 %v7646_v6 }
 0x426   :  { %8246 = vmatmul.mubr.bf16.vlgmr.msra.gmra.mrb[8].mxu1 %v7648_v12  ;;  %9482 = vmatpush3.bf16.msra.mxu0 %v9683_v5 }
 0x427   :  { %9504 = vmatpush3.bf16.msra.mxu1 %v9684_v10  ;;  %9483 = vmatprep.subr.bf16.mxu0 %v9685_v11 }
 0x428   :  { %9505 = vmatprep.subr.bf16.mxu1 %v9686_v27 }
 0x42a   :  { %9484 = vmatpush3.bf16.msra.mxu0 %v9687_v13 }
 0x42b   :  { %9506 = vmatpush3.bf16.msra.mxu1 %v9688_v1  ;;  %9485 = vmatprep.subr.bf16.mxu0 %v9689_v14 }
 0x42c   :  { %9507 = vmatprep.subr.bf16.mxu1 %v9690_v53 }
 0x42e   :  { %9486 = vmatpush3.bf16.msra.mxu0 %v9691_v15 }
 0x42f   :  { %9508 = vmatpush3.bf16.msra.mxu1 %v9692_v17  ;;  %9487 = vmatprep.subr.bf16.mxu0 %v9693_v9 }
 0x430   :  { %9509 = vmatprep.subr.bf16.mxu1 %v9694_v37 }
 0x432   :  { %9488 = vmatpush3.bf16.msra.mxu0 %v9695_v40 }
 0x433   :  { %9510 = vmatpush3.bf16.msra.mxu1 %v9696_v20  ;;  %9489 = vmatprep.subr.bf16.mxu0 %v9697_v21 }
 0x434   :  { %9511 = vmatprep.subr.bf16.mxu1 %v9698_v19 }
 0x436   :  { %9490 = vmatpush3.bf16.msra.mxu0 %v9699_v25 }
 0x437   :  { %9512 = vmatpush3.bf16.msra.mxu1 %v9700_v26  ;;  %9491 = vmatprep.subr.bf16.mxu0 %v9701_v24 }
 0x438   :  { %9513 = vmatprep.subr.bf16.mxu1 %v9702_v28 }
 0x43a   :  { %9492 = vmatpush3.bf16.msra.mxu0 %v9703_v48 }
 0x43b   :  { %9514 = vmatpush3.bf16.msra.mxu1 %v9704_v7  ;;  %9493 = vmatprep.subr.bf16.mxu0 %v9705_v29 }
 0x43c   :  { %9515 = vmatprep.subr.bf16.mxu1 %v9706_v30 }
 0x43e   :  { %9494 = vmatpush3.bf16.msra.mxu0 %v9707_v31 }
 0x43f   :  { %9516 = vmatpush3.bf16.msra.mxu1 %v9708_v32  ;;  %9495 = vmatprep.subr.bf16.mxu0 %v9709_v59 }
 0x440   :  { %9517 = vmatprep.subr.bf16.mxu1 %v9710_v49 }
 0x442   :  { %9496 = vmatpush3.bf16.msra.mxu0 %v9711_v34 }
 0x443   :  { %9518 = vmatpush3.bf16.msra.mxu1 %v9712_v35 }
 0x4d8   :  { %v7303_v46 = vpop.f32.mrb[4].mxu0 }
 0x4d9   :  { %v9529_v47 = vadd.f32 %v7303_v46, %v1069_v41  ;;  %v7631_v58 = vpop.f32.mrb[4].mxu1  ;;  %v7305_v23 = vpop.f32.mrb[5].mxu0 }
 0x4da   :  { %v9531_v50 = vadd.f32 %v7631_v58, %v1077_v42  ;;  %v9530_v52 = vadd.f32 %v7305_v23, %v1073_v44  ;;  %v7633_v51 = vpop.f32.mrb[5].mxu1  ;;  %v7307_v54 = vpop.f32.mrb[6].mxu0 }
 0x4db   :  { %v7642_v55 = vmax.f32 %v9529_v47, 0.0  ;;  %v9532_v56 = vadd.f32 %v7633_v51, %v1081_v45  ;;  %v7635_v57 = vpop.f32.mrb[6].mxu1  ;;  %v7308_v43 = vpop.f32.mrb[7].mxu0 }
 0x4dc   :  { %v7644_v4 = vmax.f32 %v9531_v50, 0.0  ;;  %v7643_v60 = vmax.f32 %v9530_v52, 0.0  ;;  %v7636_v33 = vpop.f32.mrb[7].mxu1 }
 0x4dd   :  { %v7645_v62 = vmax.f32 %v9532_v56, 0.0  ;;  %v7650_v18 = vpack.c.bf16 %v7642_v55, %v7642_v55 }
 0x4de   :  { %v7651_v8 = vpack.c.bf16 %v7643_v60, %v7643_v60  ;;  %v7652_v0 = vpack.c.bf16 %v7644_v4, %v7644_v4 }
 0x4df   :  { %v7653_v61 = vpack.c.bf16 %v7645_v62, %v7645_v62 }
 0x4e0   :  { %8285 = vmatprep.mubr.bf16.mxu0 %v7651_v8 }
 0x4e1   :  { %8325 = vmatprep.mubr.bf16.mxu1 %v7653_v61  ;;  %8286 = vmatmul.mubr.bf16.vlgmr.msra.gmra.mrb[12].mxu0 %v7650_v18 }
 0x4e2   :  { %8326 = vmatmul.mubr.bf16.vlgmr.msra.gmra.mrb[12].mxu1 %v7652_v0 }
 0x4f8   :  { %v9453_v2 = vpop.f32.mrb[8].mxu0 }
 0x4f9   :  { %v9475_v22 = vpop.f32.mrb[8].mxu1  ;;  %v9454_v3 = vpop.f32.mrb[9].mxu0 }
 0x4fa   :  { %v9455_v5 = vadd.f32 %v9454_v3, %v9453_v2  ;;  %v9476_v6 = vpop.f32.mrb[9].mxu1  ;;  %v9456_v10 = vpop.f32.mrb[10].mxu0 }
 0x4fb   :  { %v9477_v11 = vadd.f32 %v9476_v6, %v9475_v22  ;;  %v9478_v12 = vpop.f32.mrb[10].mxu1  ;;  %v9457_v27 = vpop.f32.mrb[11].mxu0 }
 0x4fc   :  { %v8208_v13 = vadd.f32 %v9455_v5, %v9372_v63  ;;  %v9479_v1 = vpop.f32.mrb[11].mxu1 }
 0x4fe   :  { %v8248_v14 = vadd.f32 %v9477_v11, %v8208_v13 }
 0x5b4   :  { %v9497_v53 = vpop.f32.mrb[12].mxu0 }
 0x5b5   :  { %v9519_v15 = vpop.f32.mrb[12].mxu1  ;;  %v9498_v17 = vpop.f32.mrb[13].mxu0 }
 0x5b6   :  { %v9499_v9 = vadd.f32 %v9498_v17, %v9497_v53  ;;  %v9520_v37 = vpop.f32.mrb[13].mxu1  ;;  %v9500_v40 = vpop.f32.mrb[14].mxu0 }
 0x5b7   :  { %v9521_v20 = vadd.f32 %v9520_v37, %v9519_v15  ;;  %v9522_v21 = vpop.f32.mrb[14].mxu1  ;;  %v9501_v19 = vpop.f32.mrb[15].mxu0 }
 0x5b8   :  { %v8288_v25 = vadd.f32 %v9499_v9, %v8248_v14  ;;  %v9523_v26 = vpop.f32.mrb[15].mxu1 }
 0x5ba   :  { %v8328_v24 = vadd.f32 %v9521_v20, %v8288_v25 }
 0x5bc   :  { %8333 = vst [vmem:[#allocation2] sm:$0x3] %v8328_v24 }
 0x5bd   :  { %9724 = shalt.err (!%p9721_p4)
}
 0x5be   :  { %s9725_s6 = scalar_lea.hbm %s13251_s5, 32 }
 0x5bf   :  { %p9726_p5 = scmp.ne.s32.totalorder %s13251_s5, %s9725_s6  ;;  %p9729_p6 = scmp.lt.u32.totalorder %s9725_s6, %s13251_s5 }
 0x5c1   :  { %p9731_p7 = pnand %p9729_p6, %p9726_p5 }
 0x5c3   :  { %9734 = shalt.err (!%p9731_p7)
}
 0x5c4   :  { %8343 = dma.vmem_to_hbm [thread:$0]  %s8341_s27, 32, %s13251_s5, [#allocation3]  }
 0x5c5   :  { %9735 = dma.done.wait [#allocation3], 32  }
 0x5c6   :  { %9736 = vsyncadd [#allocation3], 4294967264 }
 0x5c7   :  { %8347 = vsyncpa [#allocation3], 1 }

</bundles_post_ra>
